<compile_context>
chip_gen: v7x
topology: tpu7x:2x2x1
jax: 0.10.0
libtpu: 0.0.40
codegen_flags: <defaults>
</compile_context>

<pallas_src>
import functools

import numpy as np
import jax
import jax.numpy as jnp
from jax import lax
from jax.experimental import pallas as pl
from jax.experimental.pallas import tpu as pltpu


# ------------------------------ in-kernel helpers -----------------------------
def _zero_pad_hw1(y):
    """Zero-pad a (H, W, C) VMEM tile by 1 on each spatial side (no HBM pass)."""
    H, W, C = y.shape
    zrow = jnp.zeros((1, W, C), y.dtype)
    y = jnp.concatenate([zrow, y, zrow], axis=0)            # (H+2, W, C)
    zcol = jnp.zeros((H + 2, 1, C), y.dtype)
    return jnp.concatenate([zcol, y, zcol], axis=1)          # (H+2, W+2, C)


def _im2col_3x3(y, Ho, Wo, stride):
    """(H, W, C) -> (Ho*Wo, 9*C) patch matrix for a 3x3 / pad=1 / stride=s conv.

    Folds the 9 taps into the contraction (K) dimension so the conv becomes a
    single MXU matmul with K = 9*C instead of 9 matmuls with K = C.
    """
    H, W, C = y.shape
    yp = _zero_pad_hw1(y)
    cols = []
    for kh in range(3):
        for kw in range(3):
            if stride == 1:
                tap = yp[kh:kh + Ho, kw:kw + Wo, :]
            else:
                # direct strided conv: static strided slice of the padded tile
                tap = lax.slice(yp, (kh, kw, 0),
                                (kh + (Ho - 1) * stride + 1,
                                 kw + (Wo - 1) * stride + 1, C),
                                (stride, stride, 1))
            cols.append(tap.reshape(Ho * Wo, C))
    return jnp.concatenate(cols, axis=-1)                    # (Ho*Wo, 9*C)


# ------------------------------ fused block kernel ----------------------------
def _wide_basic_kernel(x_ref, s1_ref, t1_ref, w1_ref, b1_ref,
                       s2_ref, t2_ref, w2_ref, b2_ref, *rest,
                       stride, has_sc):
    if has_sc:
        scw_ref, scb_ref, o_ref = rest
    else:
        (o_ref,) = rest

    _, H, W, Cin = x_ref.shape
    Cmid = w1_ref.shape[-1]
    Cout = w2_ref.shape[-1]
    Ho = (H - 1) // stride + 1
    Wo = (W - 1) // stride + 1

    x = x_ref[0]                                             # (H, W, Cin) f32

    # ---- bn1 (folded scale/shift) + relu, elementwise in f32 ----
    y1 = jnp.maximum(x * s1_ref[...].reshape(1, 1, Cin)
                     + t1_ref[...].reshape(1, 1, Cin), 0.0)

    # ---- conv1: 3x3 / stride 1 / pad 1, single bf16 MXU matmul, f32 accumulate ----
    p1 = _im2col_3x3(y1, H, W, 1).astype(jnp.bfloat16)       # (H*W, 9*Cin)
    h = jnp.dot(p1, w1_ref[...],
                preferred_element_type=jnp.float32) + b1_ref[...]   # (H*W, Cmid)
    # TODO(synk): dropout treated as identity (inference mode, no RNG mask).

    # ---- bn2 + relu (f32) ----
    y2 = jnp.maximum(h * s2_ref[...] + t2_ref[...], 0.0)     # (H*W, Cmid)

    # ---- conv2: 3x3 / stride s / pad 1, computed directly at the strided grid ----
    p2 = _im2col_3x3(y2.reshape(H, W, Cmid), Ho, Wo, stride).astype(jnp.bfloat16)
    acc = jnp.dot(p2, w2_ref[...],
                  preferred_element_type=jnp.float32) + b2_ref[...]  # (Ho*Wo, Cout)

    # ---- fused shortcut + residual add epilogue ----
    if has_sc:
        xs = x
        if stride != 1:
            # in-kernel strided subsample of x for the 1x1/stride-s shortcut conv
            xs = lax.slice(x, (0, 0, 0),
                           ((Ho - 1) * stride + 1, (Wo - 1) * stride + 1, Cin),
                           (stride, stride, 1))
        sc = jnp.dot(xs.reshape(Ho * Wo, Cin).astype(jnp.bfloat16), scw_ref[...],
                     preferred_element_type=jnp.float32) + scb_ref[...]
        acc = acc + sc
    else:
        acc = acc + x.reshape(Ho * Wo, Cout)                 # identity residual (f32)

    o_ref[...] = acc.reshape(1, Ho, Wo, Cout).astype(o_ref.dtype)


# ------------------------------- WideBasic forward ----------------------------
def wide_basic_forward(x_nchw, p, stride):
    eps = 1e-5
    x = jnp.transpose(x_nchw, (0, 2, 3, 1))                  # NCHW -> NHWC (layout glue)
    N, H, W, Cin = x.shape
    Cmid = p['conv1_w'].shape[-1]
    Cout = p['conv2_w'].shape[-1]
    Ho = (H - 1) // stride + 1
    Wo = (W - 1) // stride + 1
    has_sc = (stride != 1) or (Cin != Cout)

    # fold BN (eval mode) into per-channel scale/shift
    s1 = p['bn1_gamma'] / jnp.sqrt(p['bn1_var'] + eps)
    t1 = p['bn1_beta'] - p['bn1_mean'] * s1
    s2 = p['bn2_gamma'] / jnp.sqrt(p['bn2_var'] + eps)
    t2 = p['bn2_beta'] - p['bn2_mean'] * s2

    # weights pre-reshaped for the K-folded im2col matmuls, pre-cast to bf16
    w1 = p['conv1_w'].reshape(9 * Cin, Cmid).astype(jnp.bfloat16)
    w2 = p['conv2_w'].reshape(9 * Cmid, Cout).astype(jnp.bfloat16)

    inputs = [x,
              s1.reshape(1, Cin), t1.reshape(1, Cin), w1, p['conv1_b'].reshape(1, Cmid),
              s2.reshape(1, Cmid), t2.reshape(1, Cmid), w2, p['conv2_b'].reshape(1, Cout)]
    in_specs = [
        pl.BlockSpec((1, H, W, Cin), lambda n: (n, 0, 0, 0)),
        pl.BlockSpec((1, Cin), lambda n: (0, 0)),
        pl.BlockSpec((1, Cin), lambda n: (0, 0)),
        pl.BlockSpec((9 * Cin, Cmid), lambda n: (0, 0)),
        pl.BlockSpec((1, Cmid), lambda n: (0, 0)),
        pl.BlockSpec((1, Cmid), lambda n: (0, 0)),
        pl.BlockSpec((1, Cmid), lambda n: (0, 0)),
        pl.BlockSpec((9 * Cmid, Cout), lambda n: (0, 0)),
        pl.BlockSpec((1, Cout), lambda n: (0, 0)),
    ]
    if has_sc:
        inputs += [p['sc_w'].astype(jnp.bfloat16), p['sc_b'].reshape(1, Cout)]
        in_specs += [pl.BlockSpec((Cin, Cout), lambda n: (0, 0)),
                     pl.BlockSpec((1, Cout), lambda n: (0, 0))]

    kernel = functools.partial(_wide_basic_kernel, stride=stride, has_sc=has_sc)
    out = pl.pallas_call(
        kernel,
        out_shape=jax.ShapeDtypeStruct((N, Ho, Wo, Cout), x.dtype),
        grid=(N,),
        in_specs=in_specs,
        out_specs=pl.BlockSpec((1, Ho, Wo, Cout), lambda n: (n, 0, 0, 0)),
        compiler_params=pltpu.CompilerParams(dimension_semantics=("parallel",)),
    )(*inputs)

    return jnp.transpose(out, (0, 3, 1, 2))                  # NHWC -> NCHW


# ----------------------------- deterministic params ---------------------------
def init_params(key, in_planes, planes):
    ks = jax.random.split(key, 14)
    f32 = jnp.float32
    p = {}
    p['bn1_gamma'] = 1.0 + 0.1 * jax.random.normal(ks[0], (in_planes,), f32)
    p['bn1_beta'] = 0.1 * jax.random.normal(ks[1], (in_planes,), f32)
    p['bn1_mean'] = 0.1 * jax.random.normal(ks[2], (in_planes,), f32)
    p['bn1_var'] = jnp.abs(jax.random.normal(ks[3], (in_planes,), f32)) + 0.5
    p['conv1_w'] = 0.1 * jax.random.normal(ks[4], (3, 3, in_planes, planes), f32)
    p['conv1_b'] = 0.05 * jax.random.normal(ks[5], (planes,), f32)
    p['bn2_gamma'] = 1.0 + 0.1 * jax.random.normal(ks[6], (planes,), f32)
    p['bn2_beta'] = 0.1 * jax.random.normal(ks[7], (planes,), f32)
    p['bn2_mean'] = 0.1 * jax.random.normal(ks[8], (planes,), f32)
    p['bn2_var'] = jnp.abs(jax.random.normal(ks[9], (planes,), f32)) + 0.5
    p['conv2_w'] = 0.1 * jax.random.normal(ks[10], (3, 3, planes, planes), f32)
    p['conv2_b'] = 0.05 * jax.random.normal(ks[11], (planes,), f32)
    p['sc_w'] = 0.1 * jax.random.normal(ks[12], (in_planes, planes), f32)
    p['sc_b'] = 0.05 * jax.random.normal(ks[13], (planes,), f32)
    return p


# ------------------------------- pure JAX reference ---------------------------
def ref_forward(x_nchw, p, stride):
    eps = 1e-5
    x = jnp.transpose(x_nchw, (0, 2, 3, 1))
    dn = ('NHWC', 'HWIO', 'NHWC')

    def bn(v, g, b, m, var):
        return (v - m) / jnp.sqrt(var + eps) * g + b

    y = jnp.maximum(bn(x, p['bn1_gamma'], p['bn1_beta'], p['bn1_mean'], p['bn1_var']), 0.0)
    c1 = lax.conv_general_dilated(y, p['conv1_w'], (1, 1), [(1, 1), (1, 1)],
                                  dimension_numbers=dn) + p['conv1_b']
    y2 = jnp.maximum(bn(c1, p['bn2_gamma'], p['bn2_beta'], p['bn2_mean'], p['bn2_var']), 0.0)
    c2 = lax.conv_general_dilated(y2, p['conv2_w'], (stride, stride), [(1, 1), (1, 1)],
                                  dimension_numbers=dn) + p['conv2_b']
    in_planes, planes = x.shape[-1], c2.shape[-1]
    if stride != 1 or in_planes != planes:
        sc = lax.conv_general_dilated(x, p['sc_w'][None, None], (stride, stride),
                                      [(0, 0), (0, 0)], dimension_numbers=dn) + p['sc_b']
    else:
        sc = x
    return jnp.transpose(c2 + sc, (0, 3, 1, 2))


if __name__ == "__main__":
    key = jax.random.PRNGKey(0)
    configs = [
        # (N, in_planes, planes, H, W, stride)
        (2, 4, 8, 16, 16, 1),   # channel-expanding block -> fused 1x1-conv shortcut path
        (2, 8, 8, 16, 16, 1),   # identity-shortcut path
    ]
    for (N, cin, planes, H, W, stride) in configs:
        key, kx, kp = jax.random.split(key, 3)
        x = jax.random.normal(kx, (N, cin, H, W), jnp.float32)
        params = init_params(kp, cin, planes)

        out = jax.block_until_ready(wide_basic_forward(x, params, stride))
        ref = jax.block_until_ready(ref_forward(x, params, stride))
        assert out.shape == ref.shape, (out.shape, ref.shape)
        # bf16 MXU matmuls with f32 accumulation vs. the f32 XLA reference
        np.testing.assert_allclose(np.asarray(out), np.asarray(ref), rtol=3e-2, atol=3e-2)

    print("KERNEL_OK")
</pallas_src>

<mosaic_0001>
module attributes {stable_mosaic.version = 11 : i64} {
  func.func @_wide_basic_kernel(%arg0: i32, %arg1: memref<1x16x16x4xf32, #tpu.memory_space<vmem>>, %arg2: memref<1x4xf32, #tpu.memory_space<vmem>>, %arg3: memref<1x4xf32, #tpu.memory_space<vmem>>, %arg4: memref<36x8xbf16, #tpu.memory_space<vmem>>, %arg5: memref<1x8xf32, #tpu.memory_space<vmem>>, %arg6: memref<1x8xf32, #tpu.memory_space<vmem>>, %arg7: memref<1x8xf32, #tpu.memory_space<vmem>>, %arg8: memref<72x8xbf16, #tpu.memory_space<vmem>>, %arg9: memref<1x8xf32, #tpu.memory_space<vmem>>, %arg10: memref<4x8xbf16, #tpu.memory_space<vmem>>, %arg11: memref<1x8xf32, #tpu.memory_space<vmem>>, %arg12: memref<1x16x16x8xf32, #tpu.memory_space<vmem>>) attributes {dimension_semantics = [#tpu.dimension_semantics<parallel>], iteration_bounds = array<i64: 2>, scalar_prefetch = 0 : i64, scratch_operands = 0 : i64, tpu.core_type = #tpu.core_type<tc>, window_params = [{transform_indices = @transform_0, window_bounds = array<i64: 1, 16, 16, 4>}, {pipeline_mode = #tpu.pipeline_mode<synchronous>, transform_indices = @transform_1, window_bounds = array<i64: 1, 4>}, {pipeline_mode = #tpu.pipeline_mode<synchronous>, transform_indices = @transform_2, window_bounds = array<i64: 1, 4>}, {pipeline_mode = #tpu.pipeline_mode<synchronous>, transform_indices = @transform_3, window_bounds = array<i64: 36, 8>}, {pipeline_mode = #tpu.pipeline_mode<synchronous>, transform_indices = @transform_4, window_bounds = array<i64: 1, 8>}, {pipeline_mode = #tpu.pipeline_mode<synchronous>, transform_indices = @transform_5, window_bounds = array<i64: 1, 8>}, {pipeline_mode = #tpu.pipeline_mode<synchronous>, transform_indices = @transform_6, window_bounds = array<i64: 1, 8>}, {pipeline_mode = #tpu.pipeline_mode<synchronous>, transform_indices = @transform_7, window_bounds = array<i64: 72, 8>}, {pipeline_mode = #tpu.pipeline_mode<synchronous>, transform_indices = @transform_8, window_bounds = array<i64: 1, 8>}, {pipeline_mode = #tpu.pipeline_mode<synchronous>, transform_indices = @transform_9, window_bounds = array<i64: 4, 8>}, {pipeline_mode = #tpu.pipeline_mode<synchronous>, transform_indices = @transform_10, window_bounds = array<i64: 1, 8>}, {transform_indices = @transform_11, window_bounds = array<i64: 1, 16, 16, 8>}]} {
    %c0 = arith.constant 0 : index
    %c0_0 = arith.constant 0 : index
    %c0_1 = arith.constant 0 : index
    %c0_2 = arith.constant 0 : index
    %0 = vector.load %arg1[%c0, %c0_0, %c0_1, %c0_2] : memref<1x16x16x4xf32, #tpu.memory_space<vmem>>, vector<1x16x16x4xf32>
    %1 = vector.shape_cast %0 : vector<1x16x16x4xf32> to vector<16x16x4xf32>
    %c0_3 = arith.constant 0 : index
    %c0_4 = arith.constant 0 : index
    %2 = vector.load %arg2[%c0_3, %c0_4] : memref<1x4xf32, #tpu.memory_space<vmem>>, vector<1x4xf32>
    %3 = vector.shape_cast %2 : vector<1x4xf32> to vector<1x1x4xf32>
    %4 = vector.broadcast %3 : vector<1x1x4xf32> to vector<16x16x4xf32>
    %5 = arith.mulf %1, %4 : vector<16x16x4xf32>
    %c0_5 = arith.constant 0 : index
    %c0_6 = arith.constant 0 : index
    %6 = vector.load %arg3[%c0_5, %c0_6] : memref<1x4xf32, #tpu.memory_space<vmem>>, vector<1x4xf32>
    %7 = vector.shape_cast %6 : vector<1x4xf32> to vector<1x1x4xf32>
    %8 = vector.broadcast %7 : vector<1x1x4xf32> to vector<16x16x4xf32>
    %9 = arith.addf %5, %8 : vector<16x16x4xf32>
    %cst = arith.constant 0.000000e+00 : f32
    %10 = vector.broadcast %cst : f32 to vector<16x16x4xf32>
    %11 = arith.maximumf %9, %10 : vector<16x16x4xf32>
    %cst_7 = arith.constant 0.000000e+00 : f32
    %12 = vector.broadcast %cst_7 : f32 to vector<1x16x4xf32>
    %13 = tpu.concatenate %12, %11, %12 in 0 : vector<1x16x4xf32>, vector<16x16x4xf32>, vector<1x16x4xf32> -> vector<18x16x4xf32>
    %cst_8 = arith.constant 0.000000e+00 : f32
    %14 = vector.broadcast %cst_8 : f32 to vector<18x1x4xf32>
    %15 = tpu.concatenate %14, %13, %14 in 1 : vector<18x1x4xf32>, vector<18x16x4xf32>, vector<18x1x4xf32> -> vector<18x18x4xf32>
    %16 = vector.extract_strided_slice %15 {offsets = [0, 0, 0], sizes = [16, 16, 4], strides = [1, 1, 1]} : vector<18x18x4xf32> to vector<16x16x4xf32>
    %17 = vector.shape_cast %16 : vector<16x16x4xf32> to vector<256x4xf32>
    %18 = vector.extract_strided_slice %15 {offsets = [0, 1, 0], sizes = [16, 16, 4], strides = [1, 1, 1]} : vector<18x18x4xf32> to vector<16x16x4xf32>
    %19 = vector.shape_cast %18 : vector<16x16x4xf32> to vector<256x4xf32>
    %20 = vector.extract_strided_slice %15 {offsets = [0, 2, 0], sizes = [16, 16, 4], strides = [1, 1, 1]} : vector<18x18x4xf32> to vector<16x16x4xf32>
    %21 = vector.shape_cast %20 : vector<16x16x4xf32> to vector<256x4xf32>
    %22 = vector.extract_strided_slice %15 {offsets = [1, 0, 0], sizes = [16, 16, 4], strides = [1, 1, 1]} : vector<18x18x4xf32> to vector<16x16x4xf32>
    %23 = vector.shape_cast %22 : vector<16x16x4xf32> to vector<256x4xf32>
    %24 = vector.extract_strided_slice %15 {offsets = [1, 1, 0], sizes = [16, 16, 4], strides = [1, 1, 1]} : vector<18x18x4xf32> to vector<16x16x4xf32>
    %25 = vector.shape_cast %24 : vector<16x16x4xf32> to vector<256x4xf32>
    %26 = vector.extract_strided_slice %15 {offsets = [1, 2, 0], sizes = [16, 16, 4], strides = [1, 1, 1]} : vector<18x18x4xf32> to vector<16x16x4xf32>
    %27 = vector.shape_cast %26 : vector<16x16x4xf32> to vector<256x4xf32>
    %28 = vector.extract_strided_slice %15 {offsets = [2, 0, 0], sizes = [16, 16, 4], strides = [1, 1, 1]} : vector<18x18x4xf32> to vector<16x16x4xf32>
    %29 = vector.shape_cast %28 : vector<16x16x4xf32> to vector<256x4xf32>
    %30 = vector.extract_strided_slice %15 {offsets = [2, 1, 0], sizes = [16, 16, 4], strides = [1, 1, 1]} : vector<18x18x4xf32> to vector<16x16x4xf32>
    %31 = vector.shape_cast %30 : vector<16x16x4xf32> to vector<256x4xf32>
    %32 = vector.extract_strided_slice %15 {offsets = [2, 2, 0], sizes = [16, 16, 4], strides = [1, 1, 1]} : vector<18x18x4xf32> to vector<16x16x4xf32>
    %33 = vector.shape_cast %32 : vector<16x16x4xf32> to vector<256x4xf32>
    %34 = tpu.concatenate %17, %19, %21, %23, %25, %27, %29, %31, %33 in 1 : vector<256x4xf32>, vector<256x4xf32>, vector<256x4xf32>, vector<256x4xf32>, vector<256x4xf32>, vector<256x4xf32>, vector<256x4xf32>, vector<256x4xf32>, vector<256x4xf32> -> vector<256x36xf32>
    %35 = arith.truncf %34 : vector<256x36xf32> to vector<256x36xbf16>
    %c0_9 = arith.constant 0 : index
    %c0_10 = arith.constant 0 : index
    %36 = vector.load %arg4[%c0_9, %c0_10] : memref<36x8xbf16, #tpu.memory_space<vmem>>, vector<36x8xbf16>
    %cst_11 = arith.constant dense<0.000000e+00> : vector<256x8xf32>
    %37 = tpu.matmul %35, %36, %cst_11 {dimension_numbers = #tpu.dot_dimension_numbers<[1], [0], [0], [1], [0, 0, 1, 1], [], []>} : vector<256x36xbf16>, vector<36x8xbf16>, vector<256x8xf32> -> vector<256x8xf32>
    %c0_12 = arith.constant 0 : index
    %c0_13 = arith.constant 0 : index
    %38 = vector.load %arg5[%c0_12, %c0_13] : memref<1x8xf32, #tpu.memory_space<vmem>>, vector<1x8xf32>
    %39 = vector.broadcast %38 : vector<1x8xf32> to vector<256x8xf32>
    %40 = arith.addf %37, %39 : vector<256x8xf32>
    %c0_14 = arith.constant 0 : index
    %c0_15 = arith.constant 0 : index
    %41 = vector.load %arg6[%c0_14, %c0_15] : memref<1x8xf32, #tpu.memory_space<vmem>>, vector<1x8xf32>
    %42 = vector.broadcast %41 : vector<1x8xf32> to vector<256x8xf32>
    %43 = arith.mulf %40, %42 : vector<256x8xf32>
    %c0_16 = arith.constant 0 : index
    %c0_17 = arith.constant 0 : index
    %44 = vector.load %arg7[%c0_16, %c0_17] : memref<1x8xf32, #tpu.memory_space<vmem>>, vector<1x8xf32>
    %45 = vector.broadcast %44 : vector<1x8xf32> to vector<256x8xf32>
    %46 = arith.addf %43, %45 : vector<256x8xf32>
    %cst_18 = arith.constant 0.000000e+00 : f32
    %47 = vector.broadcast %cst_18 : f32 to vector<256x8xf32>
    %48 = arith.maximumf %46, %47 : vector<256x8xf32>
    %49 = vector.shape_cast %48 : vector<256x8xf32> to vector<16x16x8xf32>
    %cst_19 = arith.constant 0.000000e+00 : f32
    %50 = vector.broadcast %cst_19 : f32 to vector<1x16x8xf32>
    %51 = tpu.concatenate %50, %49, %50 in 0 : vector<1x16x8xf32>, vector<16x16x8xf32>, vector<1x16x8xf32> -> vector<18x16x8xf32>
    %cst_20 = arith.constant 0.000000e+00 : f32
    %52 = vector.broadcast %cst_20 : f32 to vector<18x1x8xf32>
    %53 = tpu.concatenate %52, %51, %52 in 1 : vector<18x1x8xf32>, vector<18x16x8xf32>, vector<18x1x8xf32> -> vector<18x18x8xf32>
    %54 = vector.extract_strided_slice %53 {offsets = [0, 0, 0], sizes = [16, 16, 8], strides = [1, 1, 1]} : vector<18x18x8xf32> to vector<16x16x8xf32>
    %55 = vector.shape_cast %54 : vector<16x16x8xf32> to vector<256x8xf32>
    %56 = vector.extract_strided_slice %53 {offsets = [0, 1, 0], sizes = [16, 16, 8], strides = [1, 1, 1]} : vector<18x18x8xf32> to vector<16x16x8xf32>
    %57 = vector.shape_cast %56 : vector<16x16x8xf32> to vector<256x8xf32>
    %58 = vector.extract_strided_slice %53 {offsets = [0, 2, 0], sizes = [16, 16, 8], strides = [1, 1, 1]} : vector<18x18x8xf32> to vector<16x16x8xf32>
    %59 = vector.shape_cast %58 : vector<16x16x8xf32> to vector<256x8xf32>
    %60 = vector.extract_strided_slice %53 {offsets = [1, 0, 0], sizes = [16, 16, 8], strides = [1, 1, 1]} : vector<18x18x8xf32> to vector<16x16x8xf32>
    %61 = vector.shape_cast %60 : vector<16x16x8xf32> to vector<256x8xf32>
    %62 = vector.extract_strided_slice %53 {offsets = [1, 1, 0], sizes = [16, 16, 8], strides = [1, 1, 1]} : vector<18x18x8xf32> to vector<16x16x8xf32>
    %63 = vector.shape_cast %62 : vector<16x16x8xf32> to vector<256x8xf32>
    %64 = vector.extract_strided_slice %53 {offsets = [1, 2, 0], sizes = [16, 16, 8], strides = [1, 1, 1]} : vector<18x18x8xf32> to vector<16x16x8xf32>
    %65 = vector.shape_cast %64 : vector<16x16x8xf32> to vector<256x8xf32>
    %66 = vector.extract_strided_slice %53 {offsets = [2, 0, 0], sizes = [16, 16, 8], strides = [1, 1, 1]} : vector<18x18x8xf32> to vector<16x16x8xf32>
    %67 = vector.shape_cast %66 : vector<16x16x8xf32> to vector<256x8xf32>
    %68 = vector.extract_strided_slice %53 {offsets = [2, 1, 0], sizes = [16, 16, 8], strides = [1, 1, 1]} : vector<18x18x8xf32> to vector<16x16x8xf32>
    %69 = vector.shape_cast %68 : vector<16x16x8xf32> to vector<256x8xf32>
    %70 = vector.extract_strided_slice %53 {offsets = [2, 2, 0], sizes = [16, 16, 8], strides = [1, 1, 1]} : vector<18x18x8xf32> to vector<16x16x8xf32>
    %71 = vector.shape_cast %70 : vector<16x16x8xf32> to vector<256x8xf32>
    %72 = tpu.concatenate %55, %57, %59, %61, %63, %65, %67, %69, %71 in 1 : vector<256x8xf32>, vector<256x8xf32>, vector<256x8xf32>, vector<256x8xf32>, vector<256x8xf32>, vector<256x8xf32>, vector<256x8xf32>, vector<256x8xf32>, vector<256x8xf32> -> vector<256x72xf32>
    %73 = arith.truncf %72 : vector<256x72xf32> to vector<256x72xbf16>
    %c0_21 = arith.constant 0 : index
    %c0_22 = arith.constant 0 : index
    %74 = vector.load %arg8[%c0_21, %c0_22] : memref<72x8xbf16, #tpu.memory_space<vmem>>, vector<72x8xbf16>
    %cst_23 = arith.constant dense<0.000000e+00> : vector<256x8xf32>
    %75 = tpu.matmul %73, %74, %cst_23 {dimension_numbers = #tpu.dot_dimension_numbers<[1], [0], [0], [1], [0, 0, 1, 1], [], []>} : vector<256x72xbf16>, vector<72x8xbf16>, vector<256x8xf32> -> vector<256x8xf32>
    %c0_24 = arith.constant 0 : index
    %c0_25 = arith.constant 0 : index
    %76 = vector.load %arg9[%c0_24, %c0_25] : memref<1x8xf32, #tpu.memory_space<vmem>>, vector<1x8xf32>
    %77 = vector.broadcast %76 : vector<1x8xf32> to vector<256x8xf32>
    %78 = arith.addf %75, %77 : vector<256x8xf32>
    %79 = vector.shape_cast %1 : vector<16x16x4xf32> to vector<256x4xf32>
    %80 = arith.truncf %79 : vector<256x4xf32> to vector<256x4xbf16>
    %c0_26 = arith.constant 0 : index
    %c0_27 = arith.constant 0 : index
    %81 = vector.load %arg10[%c0_26, %c0_27] : memref<4x8xbf16, #tpu.memory_space<vmem>>, vector<4x8xbf16>
    %cst_28 = arith.constant dense<0.000000e+00> : vector<256x8xf32>
    %82 = tpu.matmul %80, %81, %cst_28 {dimension_numbers = #tpu.dot_dimension_numbers<[1], [0], [0], [1], [0, 0, 1, 1], [], []>} : vector<256x4xbf16>, vector<4x8xbf16>, vector<256x8xf32> -> vector<256x8xf32>
    %c0_29 = arith.constant 0 : index
    %c0_30 = arith.constant 0 : index
    %83 = vector.load %arg11[%c0_29, %c0_30] : memref<1x8xf32, #tpu.memory_space<vmem>>, vector<1x8xf32>
    %84 = vector.broadcast %83 : vector<1x8xf32> to vector<256x8xf32>
    %85 = arith.addf %82, %84 : vector<256x8xf32>
    %86 = arith.addf %78, %85 : vector<256x8xf32>
    %87 = vector.shape_cast %86 : vector<256x8xf32> to vector<1x16x16x8xf32>
    %c0_31 = arith.constant 0 : index
    %c0_32 = arith.constant 0 : index
    %c0_33 = arith.constant 0 : index
    %c0_34 = arith.constant 0 : index
    %88 = vector.load %arg12[%c0_31, %c0_32, %c0_33, %c0_34] : memref<1x16x16x8xf32, #tpu.memory_space<vmem>>, vector<1x16x16x8xf32>
    tpu.vector_store %arg12[%c0_31, %c0_32, %c0_33, %c0_34], %87 {strides = array<i32>} : memref<1x16x16x8xf32, #tpu.memory_space<vmem>>, vector<1x16x16x8xf32>,
    return
  }
  func.func @transform_0(%arg0: i32) -> (i32, i32, i32, i32) {
    %c0_i32 = arith.constant 0 : i32
    %c0_i32_0 = arith.constant 0 : i32
    %c0_i32_1 = arith.constant 0 : i32
    %c0_i32_2 = arith.constant 0 : i32
    return %arg0, %c0_i32, %c0_i32_0, %c0_i32_1 : i32, i32, i32, i32
  }
  func.func @transform_1(%arg0: i32) -> (i32, i32) {
    %c0_i32 = arith.constant 0 : i32
    %c0_i32_0 = arith.constant 0 : i32
    %c0_i32_1 = arith.constant 0 : i32
    return %c0_i32, %c0_i32_0 : i32, i32
  }
  func.func @transform_2(%arg0: i32) -> (i32, i32) {
    %c0_i32 = arith.constant 0 : i32
    %c0_i32_0 = arith.constant 0 : i32
    %c0_i32_1 = arith.constant 0 : i32
    return %c0_i32, %c0_i32_0 : i32, i32
  }
  func.func @transform_3(%arg0: i32) -> (i32, i32) {
    %c0_i32 = arith.constant 0 : i32
    %c0_i32_0 = arith.constant 0 : i32
    %c0_i32_1 = arith.constant 0 : i32
    return %c0_i32, %c0_i32_0 : i32, i32
  }
  func.func @transform_4(%arg0: i32) -> (i32, i32) {
    %c0_i32 = arith.constant 0 : i32
    %c0_i32_0 = arith.constant 0 : i32
    %c0_i32_1 = arith.constant 0 : i32
    return %c0_i32, %c0_i32_0 : i32, i32
  }
  func.func @transform_5(%arg0: i32) -> (i32, i32) {
    %c0_i32 = arith.constant 0 : i32
    %c0_i32_0 = arith.constant 0 : i32
    %c0_i32_1 = arith.constant 0 : i32
    return %c0_i32, %c0_i32_0 : i32, i32
  }
  func.func @transform_6(%arg0: i32) -> (i32, i32) {
    %c0_i32 = arith.constant 0 : i32
    %c0_i32_0 = arith.constant 0 : i32
    %c0_i32_1 = arith.constant 0 : i32
    return %c0_i32, %c0_i32_0 : i32, i32
  }
  func.func @transform_7(%arg0: i32) -> (i32, i32) {
    %c0_i32 = arith.constant 0 : i32
    %c0_i32_0 = arith.constant 0 : i32
    %c0_i32_1 = arith.constant 0 : i32
    return %c0_i32, %c0_i32_0 : i32, i32
  }
  func.func @transform_8(%arg0: i32) -> (i32, i32) {
    %c0_i32 = arith.constant 0 : i32
    %c0_i32_0 = arith.constant 0 : i32
    %c0_i32_1 = arith.constant 0 : i32
    return %c0_i32, %c0_i32_0 : i32, i32
  }
  func.func @transform_9(%arg0: i32) -> (i32, i32) {
    %c0_i32 = arith.constant 0 : i32
    %c0_i32_0 = arith.constant 0 : i32
    %c0_i32_1 = arith.constant 0 : i32
    return %c0_i32, %c0_i32_0 : i32, i32
  }
  func.func @transform_10(%arg0: i32) -> (i32, i32) {
    %c0_i32 = arith.constant 0 : i32
    %c0_i32_0 = arith.constant 0 : i32
    %c0_i32_1 = arith.constant 0 : i32
    return %c0_i32, %c0_i32_0 : i32, i32
  }
  func.func @transform_11(%arg0: i32) -> (i32, i32, i32, i32) {
    %c0_i32 = arith.constant 0 : i32
    %c0_i32_0 = arith.constant 0 : i32
    %c0_i32_1 = arith.constant 0 : i32
    %c0_i32_2 = arith.constant 0 : i32
    return %arg0, %c0_i32, %c0_i32_0, %c0_i32_1 : i32, i32, i32, i32
  }
}

</mosaic_0001>

<bundles_post_ra>
// kernel: tpu_custom_call.1
= control target key start
LH: loop header
LB: loop body
LE: loop exit
PB: predicated region body
PF: predicated region fallthrough
CT: control target
= control target key end

     0   :  { %s6086_s17 = smov 0   ;;  %s9301_s0 = inlined_call_operand.vmem [shape: f32[2,16,16,4], index: 0, kind: input, shape index: {}]   ;;  %s9302_s1 = inlined_call_operand.vmem [shape: f32[1,4], index: 1, kind: input, shape index: {}]   ;;  %s9303_s2 = inlined_call_operand.vmem [shape: f32[1,4], index: 2, kind: input, shape index: {}]   ;;  %s9304_s3 = inlined_call_operand.vmem [shape: bf16[36,8], index: 3, kind: input, shape index: {}]   ;;  %s9305_s4 = inlined_call_operand.vmem [shape: f32[1,8], index: 4, kind: input, shape index: {}]   ;;  %s9306_s5 = inlined_call_operand.vmem [shape: f32[1,8], index: 5, kind: input, shape index: {}]   ;;  %s9307_s6 = inlined_call_operand.vmem [shape: f32[1,8], index: 6, kind: input, shape index: {}]   ;;  %s9308_s7 = inlined_call_operand.vmem [shape: bf16[72,8], index: 7, kind: input, shape index: {}]   ;;  %s9309_s8 = inlined_call_operand.vmem [shape: f32[1,8], index: 8, kind: input, shape index: {}]   ;;  %s9310_s9 = inlined_call_operand.vmem [shape: bf16[4,8], index: 9, kind: input, shape index: {}]   ;;  %s9311_s10 = inlined_call_operand.vmem [shape: f32[1,8], index: 10, kind: input, shape index: {}]   ;;  %s9312_s11 = inlined_call_operand.vmem [shape: f32[2,16,16,8], index: 11, kind: output, shape index: {}]  }
   0x1 LB: > { %s4309_s18 = sadd.s32 4294967295, %s6011_s17   ;;  %p4313_p0 = scmp.ge.s32.totalorder %s6011_s17, 1  ;;  %s6011_s17 = sphi %s6086_s17, %s21_s17  }
   0x2   : > { %p337_p1 = scmp.lt.s32.totalorder %s6011_s17, 3 }
   0x4   : > { %p338_p2 = pnand %p4313_p0, %p337_p1 }
   0x6   : > { %341 = sbr.rel (%p338_p2) target bundleno = 1179 (0x49b), region = 64 }
   0xd   : > { %vm563_vm0 = vcmask 1040384   ;;  %p377_p3 = scmp.lt.s32.totalorder %s4309_s18, 1  ;;  %v6013_v0 = vmov 0.0   ;;  %vm729_vm1 = vcmask 1046528   ;;  %vm810_vm2 = vcmask 1045504   ;;  %s6014_s27 = smov 4  }
   0xe   : > { %v6094_v1 = vrot.slane %v6013_v0, 7  ;;  %v6108_v5 = vld [vmem:[%s9302_s1] ss:$0 sm:$0xff]  ;;  %s6015_s28 = smov 8   ;;  %s6016_s29 = smov 12   ;;  %vm2027_vm3 = vcmask 1041408  }
   0xf   : > { %s9742_s18 = smov (!%p377_p3, %s4309_s18), 1  ;;  %v6116_v9 = vld [vmem:[%s9303_s2] ss:$0 sm:$0xff]  ;;  %s6017_s30 = smov 16   ;;  %vm1671_vm4 = vcmask 31744   ;;  %vm1704_vm5 = vcmask 64512  }
  0x10   : > { %9467 = vst [vmem:[#allocation2_spill] sm:$0xff] %v6094_v1  ;;  %v6100_v2 = vsel %vm563_vm0, 0.0, %v6094_v1  ;;  %v680_v3 = vsel %vm563_vm0, %v6094_v1, 0.0  ;;  %v731_v4 = vrot.slane %v6094_v1, 1  ;;  %v812_v6 = vrot.slane %v6094_v1, 2  ;;  %s4383_s21 = sshll.u32 %s9742_s18, 8 }
  0x11   : > { %9468 = vst [vmem:[#allocation3_spill] sm:$0xff] %v6100_v2  ;;  %v730_v7 = vrot.slane %v6100_v2, 1  ;;  %v733_v8 = vrot.slane %v680_v3, 1  ;;  %v811_v10 = vrot.slane %v6100_v2, 2  ;;  %s6124_s26 = scalar_lea.vmem %s9301_s0, %s4383_s21  ;;  %v814_v13 = vrot.slane %v680_v3, 2  ;;  %s6018_s12 = smov 20  }
  0x12   : > { %v6129_v14 = vld [vmem:[%s6124_s26 + $0x10] sm:$0xff]  ;;  %v6132_v15 = vld [vmem:[%s6124_s26 + $0x18] sm:$0xff]  ;;  %v388_v16 = vld [vmem:[%s6124_s26] sm:$0xff]  ;;  %s6019_s19 = smov 24   ;;  %s6020_s23 = smov 28   ;;  %vm1737_vm6 = vcmask 97280  }
  0x13   : > { %v732_v11 = vsel %vm729_vm1, %v730_v7, %v731_v4  ;;  %v734_v12 = vsel %vm729_vm1, %v731_v4, %v733_v8  ;;  %9469 = vst [vmem:[#allocation4_spill] sm:$0xff] %v6129_v14  ;;  %9470 = vst [vmem:[#allocation5_spill] sm:$0xff] %v6132_v15  ;;  %v6136_v17 = vsel %vm810_vm2, %v811_v10, %v812_v6  ;;  %v389_v22 = vld [vmem:[%s6124_s26 + $0x8] sm:$0xff]  ;;  %v392_v23 = vld [vmem:[%s6124_s26 + $0x20] sm:$0xff]  ;;  %s6021_s24 = smov 32   ;;  %vm1770_vm7 = vcmask 130048  }
  0x14   : > { %v6138_v18 = vpack.i.bf16 %v734_v12, %v732_v11  ;;  %v429_v19 = vmul.f32 %v6108_v5, %v6129_v14  ;;  %v430_v20 = vmul.f32 %v6108_v5, %v6132_v15  ;;  %v393_v24 = vld [vmem:[%s6124_s26 + $0x28] sm:$0xff]  ;;  %v427_v25 = vmul.f32 %v6108_v5, %v388_v16  ;;  %v394_v29 = vld [vmem:[%s6124_s26 + $0x30] sm:$0xff]  ;;  %v395_v30 = vld [vmem:[%s6124_s26 + $0x38] sm:$0xff]  ;;  %s6022_s25 = smov 48   ;;  %s6025_s22 = smov 40  }
  0x15   : > { %v428_v26 = vmul.f32 %v6108_v5, %v389_v22  ;;  %v431_v27 = vmul.f32 %v6108_v5, %v392_v23  ;;  %v432_v28 = vmul.f32 %v6108_v5, %v393_v24  ;;  %v433_v33 = vmul.f32 %v6108_v5, %v394_v29  ;;  %v397_v12 = vld [vmem:[%s6124_s26 + $0x48] sm:$0xff]  ;;  %v398_v22 = vld [vmem:[%s6124_s26 + $0x50] sm:$0xff] }
  0x16   : > { %9471 = vst [vmem:[#allocation6_spill] sm:$0xff] %v6138_v18  ;;  %4688 = vrot.lane.b32.xlu0 %v6138_v18, %s6014_s27  ;;  %v468_v31 = vadd.f32 %v6116_v9, %v429_v19  ;;  %v469_v32 = vadd.f32 %v6116_v9, %v430_v20  ;;  %v434_v34 = vmul.f32 %v6108_v5, %v395_v30  ;;  %v413_v21 = vld [vmem:[%s6124_s26 + $0xc8] sm:$0xff]  ;;  %v414_v14 = vld [vmem:[%s6124_s26 + $0xd0] sm:$0xff]  ;;  %vm1803_vm8 = vcmask 162816  }
  0x17   : > { %v466_v35 = vadd.f32 %v6116_v9, %v427_v25  ;;  %v467_v36 = vadd.f32 %v6116_v9, %v428_v26  ;;  %v470_v37 = vadd.f32 %v6116_v9, %v431_v27  ;;  %v471_v38 = vadd.f32 %v6116_v9, %v432_v28  ;;  %v399_v27 = vld [vmem:[%s6124_s26 + $0x58] sm:$0xff]  ;;  %v400_v28 = vld [vmem:[%s6124_s26 + $0x60] sm:$0xff] }
  0x18   : > { %v500_v39 = vmax.f32 %v468_v31, 0.0  ;;  %v501_v40 = vmax.f32 %v469_v32, 0.0  ;;  %v472_v41 = vadd.f32 %v6116_v9, %v433_v33  ;;  %v473_v42 = vadd.f32 %v6116_v9, %v434_v34 }
  0x19   : > { %v498_v43 = vmax.f32 %v466_v35, 0.0  ;;  %v499_v44 = vmax.f32 %v467_v36, 0.0  ;;  %v502_v45 = vmax.f32 %v470_v37, 0.0  ;;  %v503_v46 = vmax.f32 %v471_v38, 0.0  ;;  %v401_v37 = vld [vmem:[%s6124_s26 + $0x68] sm:$0xff] }
  0x1a   : > { %v569_v47 = vrot.slane %v500_v39, 7  ;;  %v570_v48 = vrot.slane %v501_v40, 7  ;;  %v504_v49 = vmax.f32 %v472_v41, 0.0  ;;  %v6168_v50 = vsel %vm810_vm2, %v812_v6, %v814_v13  ;;  %v396_v6 = vld [vmem:[%s6124_s26 + $0x40] sm:$0xff] }
  0x1b   : > { %v566_v51 = vrot.slane %v498_v43, 7  ;;  %v567_v52 = vrot.slane %v499_v44, 7  ;;  %v572_v53 = vrot.slane %v502_v45, 7  ;;  %v573_v54 = vrot.slane %v503_v46, 7 }
  0x1c   : > { %v6171_v55 = vsel %vm563_vm0, %v569_v47, %v570_v48  ;;  %v6174_v56 = vsel %vm563_vm0, 0.0, %v569_v47  ;;  %v6177_v57 = vsel %vm563_vm0, %v570_v48, 0.0  ;;  %v505_v58 = vmax.f32 %v473_v42, 0.0 }
  0x1d   : > { %v740_v59 = vrot.slane %v6174_v56, 1  ;;  %v741_v60 = vrot.slane %v6171_v55, 1  ;;  %v743_v61 = vrot.slane %v6177_v57, 1  ;;  %v575_v62 = vrot.slane %v504_v49, 7 }
  0x1e   : > { %v6183_v63 = vsel %vm563_vm0, %v566_v51, %v567_v52  ;;  %v6186_v0 = vsel %vm563_vm0, 0.0, %v566_v51  ;;  %v6189_v3 = vsel %vm563_vm0, %v567_v52, 0.0  ;;  %v6192_v4 = vsel %vm563_vm0, %v572_v53, %v573_v54  ;;  %v402_v51 = vld [vmem:[%s6124_s26 + $0x70] sm:$0xff] }
  0x1f   : > { %v742_v7 = vsel %vm729_vm1, %v740_v59, %v741_v60  ;;  %v744_v8 = vsel %vm729_vm1, %v741_v60, %v743_v61  ;;  %v735_v10 = vrot.slane %v6186_v0, 1  ;;  %v736_v11 = vrot.slane %v6183_v63, 1  ;;  %v403_v59 = vld [vmem:[%s6124_s26 + $0x78] sm:$0xff] }
  0x20   : > { %v6200_v13 = vpack.i.bf16 %v744_v8, %v742_v7  ;;  %v738_v16 = vrot.slane %v6189_v3, 1  ;;  %v6204_v19 = vsel %vm563_vm0, 0.0, %v572_v53  ;;  %v6207_v20 = vsel %vm563_vm0, %v573_v54, 0.0 }
  0x21   : > { %v737_v23 = vsel %vm729_vm1, %v735_v10, %v736_v11  ;;  %v745_v24 = vrot.slane %v6204_v19, 1  ;;  %v746_v25 = vrot.slane %v6192_v4, 1  ;;  %v748_v26 = vrot.slane %v6207_v20, 1 }
  0x22   : > { %9472 = vst [vmem:[#allocation7_spill] sm:$0xff] %v6200_v13  ;;  %4698 = vrot.lane.b32.xlu1 %v6200_v13, %s6014_s27  ;;  %v739_v29 = vsel %vm729_vm1, %v736_v11, %v738_v16  ;;  %v576_v30 = vrot.slane %v505_v58, 7  ;;  %v6220_v31 = vsel %vm563_vm0, 0.0, %v575_v62  ;;  %v435_v32 = vmul.f32 %v6108_v5, %v396_v6 }
  0x23   : > { %v6223_v33 = vpack.i.bf16 %v739_v29, %v737_v23  ;;  %v747_v34 = vsel %vm729_vm1, %v745_v24, %v746_v25  ;;  %v749_v35 = vsel %vm729_vm1, %v746_v25, %v748_v26  ;;  %v750_v36 = vrot.slane %v6220_v31, 1 }
  0x24   : > { %v6229_v38 = vpack.i.bf16 %v749_v35, %v747_v34  ;;  %v6232_v39 = vsel %vm563_vm0, %v575_v62, %v576_v30  ;;  %v6235_v40 = vsel %vm563_vm0, %v576_v30, 0.0  ;;  %v436_v41 = vmul.f32 %v6108_v5, %v397_v12 }
  0x25   : > { %9473 = vst [vmem:[#allocation8_spill] sm:$0xff] %v6223_v33  ;;  %9475 = vst [vmem:[#allocation10_spill] sm:$0xff] %v6232_v39  ;;  %4693 = vrot.lane.b32.xlu0 %v6223_v33, %s6014_s27  ;;  %v751_v42 = vrot.slane %v6232_v39, 1  ;;  %v753_v43 = vrot.slane %v6235_v40, 1  ;;  %v474_v44 = vadd.f32 %v6116_v9, %v435_v32  ;;  %v437_v45 = vmul.f32 %v6108_v5, %v398_v22 }
  0x26   : > { %9474 = vst [vmem:[#allocation9_spill] sm:$0xff] %v6229_v38  ;;  %4703 = vrot.lane.b32.xlu1 %v6229_v38, %s6014_s27  ;;  %v475_v46 = vadd.f32 %v6116_v9, %v436_v41  ;;  %v438_v47 = vmul.f32 %v6108_v5, %v399_v27  ;;  %v439_v48 = vmul.f32 %v6108_v5, %v400_v28  ;;  %vm1836_vm9 = vcmask 195584  }
  0x27   : > { %v440_v49 = vmul.f32 %v6108_v5, %v401_v37  ;;  %v752_v52 = vsel %vm729_vm1, %v750_v36, %v751_v42  ;;  %v754_v53 = vsel %vm729_vm1, %v751_v42, %v753_v43  ;;  %v506_v54 = vmax.f32 %v474_v44, 0.0 }
  0x28   : > { %v476_v58 = vadd.f32 %v6116_v9, %v437_v45  ;;  %v6255_v60 = vpack.i.bf16 %v754_v53, %v752_v52  ;;  %v507_v61 = vmax.f32 %v475_v46, 0.0  ;;  %v477_v62 = vadd.f32 %v6116_v9, %v438_v47 }
  0x29   : > { %v478_v6 = vadd.f32 %v6116_v9, %v439_v48  ;;  %v578_v7 = vrot.slane %v506_v54, 7  ;;  %v479_v10 = vadd.f32 %v6116_v9, %v440_v49  ;;  %v441_v11 = vmul.f32 %v6108_v5, %v402_v51  ;;  %v404_v54 = vld [vmem:[%s6124_s26 + $0x80] sm:$0xff] }
  0x2a   : > { %9476 = vst [vmem:[#allocation11_spill] sm:$0xff] %v6255_v60  ;;  %v508_v8 = vmax.f32 %v476_v58, 0.0  ;;  %4708 = vrot.lane.b32.xlu0 %v6255_v60, %s6014_s27  ;;  %v579_v12 = vrot.slane %v507_v61, 7  ;;  %v509_v16 = vmax.f32 %v477_v62, 0.0  ;;  %v442_v23 = vmul.f32 %v6108_v5, %v403_v59  ;;  %v405_v58 = vld [vmem:[%s6124_s26 + $0x88] sm:$0xff]  ;;  %v406_v59 = vld [vmem:[%s6124_s26 + $0x90] sm:$0xff] }
  0x2b   : > { %v510_v22 = vmax.f32 %v478_v6, 0.0  ;;  %v6265_v24 = vsel %vm563_vm0, 0.0, %v578_v7  ;;  %v511_v26 = vmax.f32 %v479_v10, 0.0  ;;  %v480_v27 = vadd.f32 %v6116_v9, %v441_v11 }
  0x2c   : > { %v581_v25 = vrot.slane %v508_v8, 7  ;;  %v6269_v28 = vsel %vm563_vm0, %v578_v7, %v579_v12  ;;  %v6272_v29 = vsel %vm563_vm0, %v579_v12, 0.0  ;;  %v755_v30 = vrot.slane %v6265_v24, 1  ;;  %v407_v8 = vld [vmem:[%s6124_s26 + $0x98] sm:$0xff] }
  0x2d   : > { %v582_v32 = vrot.slane %v509_v16, 7  ;;  %v756_v34 = vrot.slane %v6269_v28, 1  ;;  %v758_v35 = vrot.slane %v6272_v29, 1  ;;  %v584_v37 = vrot.slane %v510_v22, 7 }
  0x2e   : > { %v6278_v36 = vsel %vm563_vm0, 0.0, %v581_v25  ;;  %v585_v44 = vrot.slane %v511_v26, 7  ;;  %v481_v12 = vadd.f32 %v6116_v9, %v442_v23  ;;  %v512_v16 = vmax.f32 %v480_v27, 0.0 }
  0x2f   : > { %9477 = vst [vmem:[#allocation12_spill] sm:$0xff] %v6278_v36  ;;  %v6281_v41 = vsel %vm563_vm0, %v581_v25, %v582_v32  ;;  %v6284_v42 = vsel %vm563_vm0, %v582_v32, 0.0  ;;  %v760_v43 = vrot.slane %v6278_v36, 1  ;;  %v757_v45 = vsel %vm729_vm1, %v755_v30, %v756_v34  ;;  %v408_v32 = vld [vmem:[%s6124_s26 + $0xa0] sm:$0xff] }
  0x30   : > { %9478 = vst [vmem:[#allocation13_spill] sm:$0xff] %v6281_v41  ;;  %v759_v46 = vsel %vm729_vm1, %v756_v34, %v758_v35  ;;  %v761_v47 = vrot.slane %v6281_v41, 1  ;;  %v763_v48 = vrot.slane %v6284_v42, 1  ;;  %v6294_v51 = vsel %vm563_vm0, %v584_v37, %v585_v44 }
  0x31   : > { %v6291_v49 = vpack.i.bf16 %v759_v46, %v757_v45  ;;  %9480 = vst [vmem:[#allocation15_spill] sm:$0xff] %v6294_v51  ;;  %v6297_v52 = vsel %vm563_vm0, 0.0, %v584_v37  ;;  %v6300_v53 = vsel %vm563_vm0, %v585_v44, 0.0  ;;  %v766_v7 = vrot.slane %v6294_v51, 1  ;;  %v409_v46 = vld [vmem:[%s6124_s26 + $0xa8] sm:$0xff] }
  0x32   : > { %9481 = vst [vmem:[#allocation16_spill] sm:$0xff] %v6297_v52  ;;  %v762_v61 = vsel %vm729_vm1, %v760_v43, %v761_v47  ;;  %v764_v62 = vsel %vm729_vm1, %v761_v47, %v763_v48  ;;  %v765_v6 = vrot.slane %v6297_v52, 1  ;;  %v768_v11 = vrot.slane %v6300_v53, 1 }
  0x33   : > { %9479 = vst [vmem:[#allocation14_spill] sm:$0xff] %v6291_v49  ;;  %4713 = vrot.lane.b32.xlu1 %v6291_v49, %s6014_s27  ;;  %v6312_v10 = vpack.i.bf16 %v764_v62, %v762_v61  ;;  %v443_v25 = vmul.f32 %v6108_v5, %v404_v54  ;;  %v444_v26 = vmul.f32 %v6108_v5, %v405_v58  ;;  %v513_v35 = vmax.f32 %v481_v12, 0.0 }
  0x34   : > { %v767_v22 = vsel %vm729_vm1, %v765_v6, %v766_v7  ;;  %v445_v30 = vmul.f32 %v6108_v5, %v406_v59  ;;  %v769_v34 = vsel %vm729_vm1, %v766_v7, %v768_v11  ;;  %v587_v37 = vrot.slane %v512_v16, 7 }
  0x35   : > { %9482 = vst [vmem:[#allocation17_spill] sm:$0xff] %v6312_v10  ;;  %4718 = vrot.lane.b32.xlu0 %v6312_v10, %s6014_s27  ;;  %v446_v23 = vmul.f32 %v6108_v5, %v407_v8  ;;  %v6325_v43 = vpack.i.bf16 %v769_v34, %v767_v22  ;;  %v482_v27 = vadd.f32 %v6116_v9, %v443_v25  ;;  %v588_v47 = vrot.slane %v513_v35, 7  ;;  %v416_v10 = vld [vmem:[%s6124_s26 + $0xe0] sm:$0xff] }
  0x36   : > { %v483_v44 = vadd.f32 %v6116_v9, %v444_v26  ;;  %v484_v45 = vadd.f32 %v6116_v9, %v445_v30  ;;  %v6332_v48 = vsel %vm563_vm0, 0.0, %v587_v37  ;;  %v447_v58 = vmul.f32 %v6108_v5, %v408_v32 }
  0x37   : > { %9483 = vst [vmem:[#allocation18_spill] sm:$0xff] %v6325_v43  ;;  %9484 = vst [vmem:[#allocation19_spill] sm:$0xff] %v6332_v48  ;;  %v485_v54 = vadd.f32 %v6116_v9, %v446_v23  ;;  %4723 = vrot.lane.b32.xlu1 %v6325_v43, %s6014_s27  ;;  %v770_v59 = vrot.slane %v6332_v48, 1  ;;  %v514_v61 = vmax.f32 %v482_v27, 0.0  ;;  %v6340_v7 = vsel %vm563_vm0, %v587_v37, %v588_v47 }
  0x38   : > { %v515_v62 = vmax.f32 %v483_v44, 0.0  ;;  %v516_v6 = vmax.f32 %v484_v45, 0.0  ;;  %9485 = vst [vmem:[#allocation20_spill] sm:$0xff] %v6340_v7  ;;  %v6343_v8 = vsel %vm563_vm0, %v588_v47, 0.0  ;;  %v448_v12 = vmul.f32 %v6108_v5, %v409_v46 }
  0x39   : > { %v517_v11 = vmax.f32 %v485_v54, 0.0  ;;  %v771_v16 = vrot.slane %v6340_v7, 1  ;;  %v773_v22 = vrot.slane %v6343_v8, 1  ;;  %v590_v25 = vrot.slane %v514_v61, 7 }
  0x3a   : > { %v591_v26 = vrot.slane %v515_v62, 7  ;;  %v593_v30 = vrot.slane %v516_v6, 7  ;;  %v486_v34 = vadd.f32 %v6116_v9, %v447_v58  ;;  %v487_v35 = vadd.f32 %v6116_v9, %v448_v12  ;;  %v410_v58 = vld [vmem:[%s6124_s26 + $0xb0] sm:$0xff] }
  0x3b   : > { %v594_v32 = vrot.slane %v517_v11, 7  ;;  %v772_v37 = vsel %vm729_vm1, %v770_v59, %v771_v16  ;;  %v774_v23 = vsel %vm729_vm1, %v771_v16, %v773_v22  ;;  %v6356_v44 = vsel %vm563_vm0, 0.0, %v590_v25  ;;  %v411_v11 = vld [vmem:[%s6124_s26 + $0xb8] sm:$0xff] }
  0x3c   : > { %v6353_v27 = vsel %vm563_vm0, %v590_v25, %v591_v26  ;;  %9487 = vst [vmem:[#allocation22_spill] sm:$0xff] %v6356_v44  ;;  %v6358_v45 = vpack.i.bf16 %v774_v23, %v772_v37  ;;  %v6361_v46 = vsel %vm563_vm0, %v591_v26, 0.0  ;;  %v775_v47 = vrot.slane %v6356_v44, 1 }
  0x3d   : > { %9486 = vst [vmem:[#allocation21_spill] sm:$0xff] %v6353_v27  ;;  %v776_v54 = vrot.slane %v6353_v27, 1  ;;  %v778_v59 = vrot.slane %v6361_v46, 1  ;;  %v6368_v61 = vsel %vm563_vm0, %v593_v30, %v594_v32  ;;  %v6371_v62 = vsel %vm563_vm0, 0.0, %v593_v30 }
  0x3e   : > { %9488 = vst [vmem:[#allocation23_spill] sm:$0xff] %v6358_v45  ;;  %9489 = vst [vmem:[#allocation24_spill] sm:$0xff] %v6368_v61  ;;  %v6374_v6 = vsel %vm563_vm0, %v594_v32, 0.0  ;;  %4728 = vrot.lane.b32.xlu0 %v6358_v45, %s6014_s27  ;;  %v780_v16 = vrot.slane %v6371_v62, 1  ;;  %v781_v22 = vrot.slane %v6368_v61, 1  ;;  %v518_v37 = vmax.f32 %v486_v34, 0.0 }
  0x3f   : > { %9490 = vst [vmem:[#allocation25_spill] sm:$0xff] %v6371_v62  ;;  %v777_v12 = vsel %vm729_vm1, %v775_v47, %v776_v54  ;;  %v783_v25 = vrot.slane %v6374_v6, 1  ;;  %v779_v26 = vsel %vm729_vm1, %v776_v54, %v778_v59  ;;  %v519_v30 = vmax.f32 %v487_v35, 0.0  ;;  %v412_v32 = vld [vmem:[%s6124_s26 + $0xc0] sm:$0xff] }
  0x40   : > { %v449_v23 = vmul.f32 %v6108_v5, %v410_v58  ;;  %v6388_v15 = vpack.i.bf16 %v779_v26, %v777_v12  ;;  %v782_v47 = vsel %vm729_vm1, %v780_v16, %v781_v22  ;;  %v450_v2 = vmul.f32 %v6108_v5, %v411_v11  ;;  %v415_v12 = vld [vmem:[%s6124_s26 + $0xd8] sm:$0xff] }
  0x41   : > { %v784_v18 = vsel %vm729_vm1, %v781_v22, %v783_v25  ;;  %v596_v45 = vrot.slane %v518_v37, 7  ;;  %v597_v54 = vrot.slane %v519_v30, 7  ;;  %v451_v58 = vmul.f32 %v6108_v5, %v412_v32 }
  0x42   : > { %9491 = vst [vmem:[#allocation26_spill] sm:$0xff] %v6388_v15  ;;  %v6393_v1 = vpack.i.bf16 %v784_v18, %v782_v47  ;;  %v488_v34 = vadd.f32 %v6116_v9, %v449_v23  ;;  %4733 = vrot.lane.b32.xlu1 %v6388_v15, %s6014_s27  ;;  %v489_v35 = vadd.f32 %v6116_v9, %v450_v2  ;;  %vm1869_vm10 = vcmask 228352  }
  0x43   : > { %v452_v59 = vmul.f32 %v6108_v5, %v413_v21  ;;  %v453_v16 = vmul.f32 %v6108_v5, %v414_v14  ;;  %v6406_v18 = vsel %vm563_vm0, %v596_v45, %v597_v54  ;;  %v6409_v11 = vsel %vm563_vm0, 0.0, %v596_v45 }
  0x44   : > { %9492 = vst [vmem:[#allocation27_spill] sm:$0xff] %v6393_v1  ;;  %4738 = vrot.lane.b32.xlu0 %v6393_v1, %s6014_s27  ;;  %9493 = vst [vmem:[#allocation28_spill] sm:$0xff] %v6406_v18  ;;  %v6412_v22 = vsel %vm563_vm0, %v597_v54, 0.0  ;;  %v520_v2 = vmax.f32 %v488_v34, 0.0  ;;  %v785_v25 = vrot.slane %v6409_v11, 1  ;;  %v786_v21 = vrot.slane %v6406_v18, 1 }
  0x45   : > { %9494 = vst [vmem:[#allocation29_spill] sm:$0xff] %v6409_v11  ;;  %v788_v14 = vrot.slane %v6412_v22, 1  ;;  %v521_v26 = vmax.f32 %v489_v35, 0.0  ;;  %v490_v30 = vadd.f32 %v6116_v9, %v451_v58  ;;  %v491_v23 = vadd.f32 %v6116_v9, %v452_v59  ;;  %v417_v58 = vld [vmem:[%s6124_s26 + $0xe8] sm:$0xff] }
  0x46   : > { %v599_v37 = vrot.slane %v520_v2, 7  ;;  %v454_v45 = vmul.f32 %v6108_v5, %v415_v12  ;;  %v787_v32 = vsel %vm729_vm1, %v785_v25, %v786_v21  ;;  %v492_v34 = vadd.f32 %v6116_v9, %v453_v16 }
  0x47   : > { %v789_v47 = vsel %vm729_vm1, %v786_v21, %v788_v14  ;;  %v600_v54 = vrot.slane %v521_v26, 7  ;;  %v522_v35 = vmax.f32 %v490_v30, 0.0  ;;  %v523_v2 = vmax.f32 %v491_v23, 0.0 }
  0x48   : > { %v6423_v1 = vpack.i.bf16 %v789_v47, %v787_v32  ;;  %v6426_v15 = vsel %vm563_vm0, 0.0, %v599_v37  ;;  %v493_v21 = vadd.f32 %v6116_v9, %v454_v45  ;;  %v524_v23 = vmax.f32 %v492_v34, 0.0 }
  0x49   : > { %9496 = vst [vmem:[#allocation31_spill] sm:$0xff] %v6426_v15  ;;  %v6431_v59 = vsel %vm563_vm0, %v599_v37, %v600_v54  ;;  %v6434_v12 = vsel %vm563_vm0, %v600_v54, 0.0  ;;  %v790_v25 = vrot.slane %v6426_v15, 1  ;;  %v602_v26 = vrot.slane %v522_v35, 7 }
  0x4a   : > { %9495 = vst [vmem:[#allocation30_spill] sm:$0xff] %v6423_v1  ;;  %9497 = vst [vmem:[#allocation32_spill] sm:$0xff] %v6431_v59  ;;  %4743 = vrot.lane.b32.xlu1 %v6423_v1, %s6014_s27  ;;  %v791_v16 = vrot.slane %v6431_v59, 1  ;;  %v793_v14 = vrot.slane %v6434_v12, 1  ;;  %v603_v30 = vrot.slane %v523_v2, 7  ;;  %v525_v32 = vmax.f32 %v493_v21, 0.0 }
  0x4b   : > { %v455_v37 = vmul.f32 %v6108_v5, %v416_v10  ;;  %v456_v47 = vmul.f32 %v6108_v5, %v417_v58  ;;  %v6450_v1 = vsel %vm563_vm0, 0.0, %v602_v26  ;;  %v605_v58 = vrot.slane %v524_v23, 7 }
  0x4c   : > { %v792_v54 = vsel %vm729_vm1, %v790_v25, %v791_v16  ;;  %v794_v43 = vsel %vm729_vm1, %v791_v16, %v793_v14  ;;  %v6447_v45 = vsel %vm563_vm0, %v602_v26, %v603_v30  ;;  %9499 = vst [vmem:[#allocation34_spill] sm:$0xff] %v6450_v1  ;;  %v6455_v35 = vsel %vm563_vm0, %v603_v30, 0.0 }
  0x4d   : > { %9498 = vst [vmem:[#allocation33_spill] sm:$0xff] %v6447_v45  ;;  %v6452_v60 = vpack.i.bf16 %v794_v43, %v792_v54  ;;  %v795_v34 = vrot.slane %v6450_v1, 1  ;;  %v796_v10 = vrot.slane %v6447_v45, 1  ;;  %v798_v2 = vrot.slane %v6455_v35, 1 }
  0x4e   : > { %v606_v25 = vrot.slane %v525_v32, 7  ;;  %v494_v21 = vadd.f32 %v6116_v9, %v455_v37  ;;  %v824_v16 = vrot.slane %v6177_v57, 2  ;;  %v495_v14 = vadd.f32 %v6116_v9, %v456_v47 }
  0x4f   : > { %9500 = vst [vmem:[#allocation35_spill] sm:$0xff] %v6452_v60  ;;  %4748 = vrot.lane.b32.xlu0 %v6452_v60, %s6014_s27  ;;  %v797_v43 = vsel %vm729_vm1, %v795_v34, %v796_v10  ;;  %v816_v26 = vrot.slane %v6186_v0, 2  ;;  %v799_v30 = vsel %vm729_vm1, %v796_v10, %v798_v2  ;;  %v6472_v23 = vsel %vm563_vm0, 0.0, %v605_v58 }
  0x50   : > { %v6469_v54 = vsel %vm563_vm0, %v605_v58, %v606_v25  ;;  %9502 = vst [vmem:[#allocation37_spill] sm:$0xff] %v6472_v23  ;;  %v6475_v32 = vsel %vm563_vm0, %v606_v25, 0.0  ;;  %v6477_v57 = vpack.i.bf16 %v799_v30, %v797_v43  ;;  %v800_v37 = vrot.slane %v6472_v23, 1 }
  0x51   : > { %9501 = vst [vmem:[#allocation36_spill] sm:$0xff] %v6469_v54  ;;  %v801_v34 = vrot.slane %v6469_v54, 1  ;;  %v803_v47 = vrot.slane %v6475_v32, 1  ;;  %v526_v60 = vmax.f32 %v494_v21, 0.0  ;;  %v527_v49 = vmax.f32 %v495_v14, 0.0 }
  0x52   : > { %9503 = vst [vmem:[#allocation38_spill] sm:$0xff] %v6477_v57  ;;  %v817_v10 = vrot.slane %v6183_v63, 2  ;;  %v819_v2 = vrot.slane %v6189_v3, 2  ;;  %4753 = vrot.lane.b32.xlu1 %v6477_v57, %s6014_s27  ;;  %v821_v43 = vrot.slane %v6174_v56, 2  ;;  %v822_v30 = vrot.slane %v6171_v55, 2 }
  0x53   : > { %v802_v58 = vsel %vm729_vm1, %v800_v37, %v801_v34  ;;  %v804_v25 = vsel %vm729_vm1, %v801_v34, %v803_v47  ;;  %v608_v38 = vrot.slane %v526_v60, 7  ;;  %v609_v21 = vrot.slane %v527_v49, 7 }
  0x54   : > { %v6490_v13 = vpack.i.bf16 %v804_v25, %v802_v58  ;;  %v6494_v14 = vpack.i.bf16 %v6168_v50, %v6136_v17  ;;  %v818_v3 = vsel %vm810_vm2, %v816_v26, %v817_v10  ;;  %v820_v57 = vsel %vm810_vm2, %v817_v10, %v819_v2 }
  0x55   : > { %v6501_v37 = vsel %vm563_vm0, %v608_v38, %v609_v21  ;;  %v6504_v34 = vsel %vm563_vm0, 0.0, %v608_v38  ;;  %v6507_v60 = vsel %vm563_vm0, %v609_v21, 0.0  ;;  %v823_v49 = vsel %vm810_vm2, %v821_v43, %v822_v30 }
  0x56   : > { %9504 = vst [vmem:[#allocation39_spill] sm:$0xff] %v6490_v13  ;;  %9505 = vst [vmem:[#allocation40_spill] sm:$0xff] %v6494_v14  ;;  %4758 = vrot.lane.b32.xlu0 %v6490_v13, %s6014_s27  ;;  %v805_v17 = vrot.slane %v6504_v34, 1  ;;  %v806_v50 = vrot.slane %v6501_v37, 1  ;;  %v808_v26 = vrot.slane %v6507_v60, 1  ;;  %v825_v47 = vsel %vm810_vm2, %v822_v30, %v824_v16 }
  0x57   : > { %9506 = vst [vmem:[#allocation41_spill] sm:$0xff] %v6501_v37  ;;  %9507 = vst [vmem:[#allocation42_spill] sm:$0xff] %v6504_v34  ;;  %v826_v10 = vrot.slane %v6204_v19, 2  ;;  %v827_v2 = vrot.slane %v6192_v4, 2  ;;  %v831_v38 = vrot.slane %v6220_v31, 2  ;;  %v832_v58 = vrot.slane %v6232_v39, 2 }
  0x58   : > { %v807_v25 = vsel %vm729_vm1, %v805_v17, %v806_v50  ;;  %v809_v43 = vsel %vm729_vm1, %v806_v50, %v808_v26  ;;  %v829_v21 = vrot.slane %v6207_v20, 2  ;;  %v834_v13 = vrot.slane %v6235_v40, 2 }
  0x59   : > { %v6522_v33 = vpack.i.bf16 %v809_v43, %v807_v25  ;;  %v6526_v16 = vpack.i.bf16 %v825_v47, %v823_v49  ;;  %v6528_v30 = vpack.i.bf16 %v820_v57, %v818_v3  ;;  %v833_v39 = vsel %vm810_vm2, %v831_v38, %v832_v58 }
  0x5a   : > { %4768 = vrot.lane.b32.xlu0 %v6494_v14, %s6015_s28  ;;  %v835_v17 = vsel %vm810_vm2, %v832_v58, %v834_v13  ;;  %v836_v20 = vrot.slane %v6265_v24, 2  ;;  %v841_v40 = vrot.slane %v6278_v36, 2  ;;  %v842_v50 = vrot.slane %v6281_v41, 2 }
  0x5b   : > { %9508 = vst [vmem:[#allocation43_spill] sm:$0xff] %v6522_v33  ;;  %4763 = vrot.lane.b32.xlu1 %v6522_v33, %s6014_s27  ;;  %v844_v26 = vrot.slane %v6284_v42, 2  ;;  %v828_v49 = vsel %vm810_vm2, %v826_v10, %v827_v2  ;;  %v830_v57 = vsel %vm810_vm2, %v827_v2, %v829_v21  ;;  %v837_v3 = vrot.slane %v6269_v28, 2  ;;  %s6023_s27 = smov 56  }
  0x5c   : > { %v839_v47 = vrot.slane %v6272_v29, 2  ;;  %v6544_v13 = vpack.i.bf16 %v835_v17, %v833_v39  ;;  %v843_v38 = vsel %vm810_vm2, %v841_v40, %v842_v50  ;;  %v851_v25 = vrot.slane %v6332_v48, 2 }
  0x5d   : > { %v845_v58 = vsel %vm810_vm2, %v842_v50, %v844_v26  ;;  %v852_v42 = vrot.slane %v6340_v7, 2  ;;  %v6552_v10 = vpack.i.bf16 %v830_v57, %v828_v49  ;;  %v846_v29 = vrot.slane %v6297_v52, 2 }
  0x5e   : > { %4778 = vrot.lane.b32.xlu0 %v6526_v16, %s6015_s28  ;;  %v847_v2 = vrot.slane %v6294_v51, 2  ;;  %v854_v39 = vrot.slane %v6343_v8, 2  ;;  %v838_v43 = vsel %vm810_vm2, %v836_v20, %v837_v3  ;;  %v840_v21 = vsel %vm810_vm2, %v837_v3, %v839_v47 }
  0x5f   : > { %4773 = vrot.lane.b32.xlu1 %v6528_v30, %s6015_s28  ;;  %v849_v17 = vrot.slane %v6300_v53, 2  ;;  %v6562_v40 = vpack.i.bf16 %v845_v58, %v843_v38  ;;  %v853_v50 = vsel %vm810_vm2, %v851_v25, %v852_v42  ;;  %v861_v49 = vrot.slane %v6371_v62, 2 }
  0x60   : > { %v855_v26 = vsel %vm810_vm2, %v852_v42, %v854_v39  ;;  %v862_v57 = vrot.slane %v6368_v61, 2  ;;  %v864_v8 = vrot.slane %v6374_v6, 2  ;;  %v6571_v20 = vpack.i.bf16 %v840_v21, %v838_v43 }
  0x61   : > { %v848_v53 = vsel %vm810_vm2, %v846_v29, %v847_v2  ;;  %v850_v3 = vsel %vm810_vm2, %v847_v2, %v849_v17  ;;  %v856_v47 = vrot.slane %v6356_v44, 2  ;;  %v857_v38 = vrot.slane %v6353_v27, 2 }
  0x62   : > { %4788 = vrot.lane.b32.xlu0 %v6544_v13, %s6015_s28  ;;  %v859_v58 = vrot.slane %v6361_v46, 2  ;;  %v6580_v25 = vpack.i.bf16 %v855_v26, %v853_v50  ;;  %v871_v6 = vrot.slane %v6426_v15, 2  ;;  %v872_v42 = vrot.slane %v6431_v59, 2 }
  0x63   : > { %4783 = vrot.lane.b32.xlu1 %v6552_v10, %s6015_s28  ;;  %v863_v39 = vsel %vm810_vm2, %v861_v49, %v862_v57  ;;  %v865_v29 = vsel %vm810_vm2, %v862_v57, %v864_v8  ;;  %v874_v2 = vrot.slane %v6434_v12, 2  ;;  %v6589_v43 = vpack.i.bf16 %v850_v3, %v848_v53 }
  0x64   : > { %v866_v46 = vrot.slane %v6409_v11, 2  ;;  %v867_v21 = vrot.slane %v6406_v18, 2  ;;  %v858_v17 = vsel %vm810_vm2, %v856_v47, %v857_v38  ;;  %v860_v50 = vsel %vm810_vm2, %v857_v38, %v859_v58  ;;  %v418_v38 = vld [vmem:[%s6124_s26 + $0xf0] sm:$0xff] }
  0x65   : > { %v869_v26 = vrot.slane %v6412_v22, 2  ;;  %v6598_v12 = vpack.i.bf16 %v865_v29, %v863_v39  ;;  %v873_v49 = vsel %vm810_vm2, %v871_v6, %v872_v42  ;;  %v875_v57 = vsel %vm810_vm2, %v872_v42, %v874_v2  ;;  %v419_v29 = vld [vmem:[%s6124_s26 + $0xf8] sm:$0xff] }
  0x66   : > { %4798 = vrot.lane.b32.xlu0 %v6562_v40, %s6015_s28  ;;  %v881_v8 = vrot.slane %v6472_v23, 2  ;;  %v882_v53 = vrot.slane %v6469_v54, 2  ;;  %v884_v3 = vrot.slane %v6475_v32, 2  ;;  %v6607_v22 = vpack.i.bf16 %v860_v50, %v858_v17 }
  0x67   : > { %4793 = vrot.lane.b32.xlu1 %v6571_v20, %s6015_s28  ;;  %9509 = vst [vmem:[#allocation44_spill] sm:$0xff] %v6598_v12  ;;  %v868_v47 = vsel %vm810_vm2, %v866_v46, %v867_v21  ;;  %v870_v58 = vsel %vm810_vm2, %v867_v21, %v869_v26  ;;  %v876_v6 = vrot.slane %v6450_v1, 2  ;;  %v877_v42 = vrot.slane %v6447_v45, 2 }
  0x68   : > { %v879_v39 = vrot.slane %v6455_v35, 2  ;;  %v6618_v32 = vpack.i.bf16 %v875_v57, %v873_v49  ;;  %v886_v2 = vrot.slane %v6504_v34, 2  ;;  %v887_v17 = vrot.slane %v6501_v37, 2 }
  0x69   : > { %v889_v46 = vrot.slane %v6507_v60, 2  ;;  %v883_v21 = vsel %vm810_vm2, %v881_v8, %v882_v53  ;;  %v885_v50 = vsel %vm810_vm2, %v882_v53, %v884_v3  ;;  %v457_v26 = vmul.f32 %v6108_v5, %v418_v38 }
  0x6a   : > { %4808 = vrot.lane.b32.xlu0 %v6580_v25, %s6015_s28  ;;  %v6628_v35 = vpack.i.bf16 %v870_v58, %v868_v47  ;;  %v458_v49 = vmul.f32 %v6108_v5, %v419_v29  ;;  %v878_v57 = vsel %vm810_vm2, %v876_v6, %v877_v42  ;;  %v880_v14 = vsel %vm810_vm2, %v877_v42, %v879_v39 }
  0x6b   : > { %4803 = vrot.lane.b32.xlu1 %v6589_v43, %s6015_s28  ;;  %v6636_v60 = vpack.i.bf16 %v885_v50, %v883_v21  ;;  %v888_v8 = vsel %vm810_vm2, %v886_v2, %v887_v17  ;;  %v890_v53 = vsel %vm810_vm2, %v887_v17, %v889_v46  ;;  %v6643_v5 = vpack.i.bf16 %v880_v14, %v878_v57 }
  0x6c   : > { %v497_v3 = vadd.f32 %v6116_v9, %v458_v49  ;;  %v4847_v38 = vpack.i.bf16 %v6183_v63, %v6186_v0  ;;  %v6647_v6 = vpack.i.bf16 %v890_v53, %v888_v8  ;;  %v6658_v2 = vpack.i.bf16 %v6192_v4, %v6204_v19 }
  0x6d   : > { %9510 = vst [vmem:[#allocation45_spill] sm:$0xff] %v6643_v5  ;;  %vm1902_vm11 = vcmask 261120   ;;  %vm1978_vm12 = vcmask 293888   ;;  %vm3789_vm13 = vcmask 1043456   ;;  %vm3549_vm14 = vcmask 326656  }
  0x6e   : > { %4818 = vrot.lane.b32.xlu0 %v6598_v12, %s6015_s28  ;;  %v496_v12 = vadd.f32 %v6116_v9, %v457_v26  ;;  %v529_v58 = vmax.f32 %v497_v3, 0.0  ;;  %9511 = vst [vmem:[#allocation46_spill] sm:$0xff] %v6647_v6  ;;  %v6667_v26 = vpack.i.bf16 %v6171_v55, %v6174_v56  ;;  %v6675_v3 = vpack.i.bf16 %v6269_v28, %v6265_v24 }
  0x6f   : > { %4813 = vrot.lane.b32.xlu1 %v6607_v22, %s6015_s28  ;;  %vm3582_vm15 = vcmask 392192  }
  0x70   : > { %v528_v47 = vmax.f32 %v496_v12, 0.0  ;;  %v612_v39 = vrot.slane %v529_v58, 7  ;;  %v9513_v58 = vld [vmem:[#allocation10_spill] sm:$0xff] }
  0x72   : > { %4828 = vrot.lane.b32.xlu0 %v6618_v32, %s6015_s28  ;;  %v611_v42 = vrot.slane %v528_v47, 7  ;;  %v696_v14 = vsel %vm563_vm0, %v612_v39, 0.0 }
  0x73   : > { %4823 = vrot.lane.b32.xlu1 %v6628_v35, %s6015_s28  ;;  %v896_v46 = vrot.slane %v696_v14, 1  ;;  %v901_v53 = vrot.slane %v696_v14, 2  ;;  %v6691_v14 = vpack.i.bf16 %v6294_v51, %v6297_v52  ;;  %v9530_v51 = vld [vmem:[#allocation39_spill] sm:$0xff] }
  0x74   : > { %v679_v29 = vsel %vm563_vm0, 0.0, %v611_v42  ;;  %v613_v9 = vsel %vm563_vm0, %v611_v42, %v612_v39  ;;  %v6683_v42 = vpack.i.bf16 %v9513_v58, %v6220_v31 }
  0x75   : > { %v893_v12 = vrot.slane %v679_v29, 1  ;;  %v894_v17 = vrot.slane %v613_v9, 1  ;;  %v898_v57 = vrot.slane %v679_v29, 2  ;;  %v899_v8 = vrot.slane %v613_v9, 2 }
  0x76   : > { %4838 = vrot.lane.b32.xlu0 %v6636_v60, %s6015_s28 }
  0x77   : > { %4833 = vrot.lane.b32.xlu1 %v6643_v5, %s6015_s28  ;;  %v895_v21 = vsel %vm729_vm1, %v893_v12, %v894_v17  ;;  %v897_v50 = vsel %vm729_vm1, %v894_v17, %v896_v46  ;;  %v900_v47 = vsel %vm810_vm2, %v898_v57, %v899_v8  ;;  %v6697_v12 = vpack.i.bf16 %v6281_v41, %v6278_v36 }
  0x78   : > { %v6669_v49 = vpack.i.bf16 %v897_v50, %v895_v21  ;;  %v6703_v17 = vpack.i.bf16 %v6353_v27, %v6356_v44  ;;  %v6709_v46 = vpack.i.bf16 %v6340_v7, %v6332_v48  ;;  %v6715_v21 = vpack.i.bf16 %v6406_v18, %v6409_v11  ;;  %v9525_v18 = vld [vmem:[#allocation23_spill] sm:$0xff]  ;;  %v9528_v27 = vld [vmem:[#allocation38_spill] sm:$0xff] }
  0x79   : > { %v6721_v50 = vpack.i.bf16 %v6368_v61, %v6371_v62  ;;  %v6727_v57 = vpack.i.bf16 %v6447_v45, %v6450_v1  ;;  %v9517_v1 = vld [vmem:[#allocation8_spill] sm:$0xff]  ;;  %v9523_v45 = vld [vmem:[#allocation17_spill] sm:$0xff]  ;;  %v9526_v62 = vld [vmem:[#allocation30_spill] sm:$0xff] }
  0x7a   : > { %4848 = vrot.lane.b32.xlu0 %v4847_v38, %s6016_s29  ;;  %9512 = vst [vmem:[#allocation47_spill] sm:$0xff] %v6669_v49  ;;  %v902_v38 = vsel %vm810_vm2, %v899_v8, %v901_v53  ;;  %v6733_v8 = vpack.i.bf16 %v6431_v59, %v6426_v15  ;;  %v6739_v53 = vpack.i.bf16 %v6501_v37, %v6504_v34  ;;  %v9518_v34 = vld [vmem:[#allocation9_spill] sm:$0xff]  ;;  %v9524_v15 = vld [vmem:[#allocation26_spill] sm:$0xff]  ;;  %v9527_v61 = vld [vmem:[#allocation27_spill] sm:$0xff] }
  0x7b   : > { %4843 = vrot.lane.b32.xlu1 %v6647_v6, %s6015_s28  ;;  %v6685_v39 = vpack.i.bf16 %v902_v38, %v900_v47  ;;  %v6745_v47 = vpack.i.bf16 %v6469_v54, %v6472_v23  ;;  %v6751_v38 = vpack.i.bf16 %v613_v9, %v679_v29  ;;  %v9519_v23 = vld [vmem:[#allocation7_spill] sm:$0xff]  ;;  %v9520_v54 = vld [vmem:[#allocation14_spill] sm:$0xff] }
  0x7c   : > { %9515 = vst [vmem:[#allocation48_spill] sm:$0xff] %v6739_v53  ;;  %v9521_v29 = vld [vmem:[#allocation11_spill] sm:$0xff] }
  0x7d   : > { %9514 = vst [vmem:[#allocation10_spill] sm:$0xff] %v6685_v39  ;;  %9516 = vst [vmem:[#allocation49_spill] sm:$0xff] %v6751_v38  ;;  %v9529_v48 = vld [vmem:[#allocation35_spill] sm:$0xff] }
  0x7e   : > { %4858 = vrot.lane.b32.xlu0 %v6658_v2, %s6016_s29 }
  0x7f   : > { %4853 = vrot.lane.b32.xlu1 %v6667_v26, %s6016_s29 }
  0x82   : > { %4868 = vrot.lane.b32.xlu0 %v6675_v3, %s6016_s29 }
  0x83   : > { %4863 = vrot.lane.b32.xlu1 %v6683_v42, %s6016_s29 }
  0x86   : > { %4878 = vrot.lane.b32.xlu0 %v6691_v14, %s6016_s29 }
  0x87   : > { %4873 = vrot.lane.b32.xlu1 %v6697_v12, %s6016_s29 }
  0x88   : > { %v6759_v37 = vpop.permute.xlu0 %4688 }
  0x8a   : > { %4888 = vrot.lane.b32.xlu0 %v6703_v17, %s6016_s29 }
  0x8b   : > { %4883 = vrot.lane.b32.xlu1 %v6709_v46, %s6016_s29 }
  0x8e   : > { %4898 = vrot.lane.b32.xlu0 %v6715_v21, %s6016_s29 }
  0x8f   : > { %4893 = vrot.lane.b32.xlu1 %v6721_v50, %s6016_s29 }
  0x92   : > { %4908 = vrot.lane.b32.xlu0 %v6727_v57, %s6016_s29 }
  0x93   : > { %4903 = vrot.lane.b32.xlu1 %v6733_v8, %s6016_s29 }
  0x94   : > { %v6767_v9 = vpop.permute.xlu1 %4698 }
  0x96   : > { %4918 = vrot.lane.b32.xlu0 %v6739_v53, %s6016_s29 }
  0x97   : > { %4913 = vrot.lane.b32.xlu1 %v6745_v47, %s6016_s29 }
  0x98   : > { %v6777_v59 = vpop.permute.xlu1 %4703 }
  0x9a   : > { %4928 = vrot.lane.b32.xlu0 %v9517_v1, %s6017_s30  ;;  %v6769_v1 = vpop.permute.xlu0 %4693 }
  0x9b   : > { %4923 = vrot.lane.b32.xlu1 %v6751_v38, %s6016_s29  ;;  %v9522_v38 = vld [vmem:[#allocation18_spill] sm:$0xff]  ;;  %s6024_s29 = smov 64  }
  0x9e   : > { %4938 = vrot.lane.b32.xlu0 %v9518_v34, %s6017_s30  ;;  %v6779_v11 = vpop.permute.xlu0 %4708 }
  0x9f   : > { %4933 = vrot.lane.b32.xlu1 %v9519_v23, %s6017_s30 }
  0xa2   : > { %4948 = vrot.lane.b32.xlu0 %v9520_v54, %s6017_s30 }
  0xa3   : > { %4943 = vrot.lane.b32.xlu1 %v9521_v29, %s6017_s30 }
  0xa5   : > { %v6787_v44 = vpop.permute.xlu1 %4713 }
  0xa6   : > { %4958 = vrot.lane.b32.xlu0 %v9522_v38, %s6017_s30 }
  0xa7   : > { %4953 = vrot.lane.b32.xlu1 %v9523_v45, %s6017_s30  ;;  %v6789_v53 = vpop.permute.xlu0 %4718 }
  0xa9   : > { %v6797_v7 = vpop.permute.xlu1 %4723 }
  0xaa   : > { %4968 = vrot.lane.b32.xlu0 %v9524_v15, %s6017_s30 }
  0xab   : > { %4963 = vrot.lane.b32.xlu1 %v9525_v18, %s6017_s30 }
  0xae   : > { %4978 = vrot.lane.b32.xlu0 %v9526_v62, %s6017_s30 }
  0xaf   : > { %4973 = vrot.lane.b32.xlu1 %v9527_v61, %s6017_s30 }
  0xb0   : > { %v6799_v52 = vpop.permute.xlu0 %4728 }
  0xb2   : > { %4988 = vrot.lane.b32.xlu0 %v9528_v27, %s6017_s30 }
  0xb3   : > { %4983 = vrot.lane.b32.xlu1 %v9529_v48, %s6017_s30 }
  0xb4   : > { %v6807_v36 = vpop.permute.xlu1 %4733 }
  0xb5   : > { %9531 = vst [vmem:[#allocation8_spill] sm:$0xff] %v6807_v36 }
  0xb6   : > { %4998 = vrot.lane.b32.xlu0 %v6522_v33, %s6017_s30  ;;  %v6809_v41 = vpop.permute.xlu0 %4738 }
  0xb7   : > { %4993 = vrot.lane.b32.xlu1 %v9530_v51, %s6017_s30  ;;  %9532 = vst [vmem:[#allocation9_spill] sm:$0xff] %v6809_v41  ;;  %v9539_v41 = vld [vmem:[#allocation44_spill] sm:$0xff] }
  0xba   : > { %5008 = vrot.lane.b32.xlu0 %v6528_v30, %s6018_s12 }
  0xbb   : > { %5003 = vrot.lane.b32.xlu1 %v6669_v49, %s6017_s30 }
  0xbc   : > { %v6817_v33 = vpop.permute.xlu1 %4743 }
  0xbd   : > { %9533 = vst [vmem:[#allocation7_spill] sm:$0xff] %v6817_v33 }
  0xbe   : > { %5018 = vrot.lane.b32.xlu0 %v6552_v10, %s6018_s12 }
  0xbf   : > { %5013 = vrot.lane.b32.xlu1 %v6526_v16, %s6018_s12 }
  0xc1   : > { %v6819_v51 = vpop.permute.xlu0 %4748 }
  0xc2   : > { %5028 = vrot.lane.b32.xlu0 %v6571_v20, %s6018_s12  ;;  %9534 = vst [vmem:[#allocation14_spill] sm:$0xff] %v6819_v51 }
  0xc3   : > { %5023 = vrot.lane.b32.xlu1 %v6544_v13, %s6018_s12 }
  0xc4   : > { %v6827_v30 = vpop.permute.xlu1 %4753 }
  0xc5   : > { %9535 = vst [vmem:[#allocation11_spill] sm:$0xff] %v6827_v30 }
  0xc6   : > { %5038 = vrot.lane.b32.xlu0 %v6589_v43, %s6018_s12 }
  0xc7   : > { %5033 = vrot.lane.b32.xlu1 %v6562_v40, %s6018_s12 }
  0xc8   : > { %v6829_v49 = vpop.permute.xlu0 %4758 }
  0xc9   : > { %9536 = vst [vmem:[#allocation18_spill] sm:$0xff] %v6829_v49  ;;  %v5967_v49 = vld [vmem:[%s9304_s3] sm:$0xff]  }
  0xca   : > { %5048 = vrot.lane.b32.xlu0 %v6607_v22, %s6018_s12  ;;  %4442 = vmatprep.subr.bf16.mxu0 %v5967_v49 }
  0xcb   : > { %5043 = vrot.lane.b32.xlu1 %v6580_v25, %s6018_s12  ;;  %4443 = vmatpush3.bf16.msra.mxu0 %v5967_v49  ;;  %v5969_v49 = vld [vmem:[%s9304_s3 + $0x10] ss:$0 sps:$4 sm:$0x33]  }
  0xcc   : > { %v6835_v51 = vpop.permute.xlu0 %4768 }
  0xcd   : > { %9537 = vst [vmem:[#allocation17_spill] sm:$0xff] %v6835_v51  ;;  %v6837_v33 = vpop.permute.xlu1 %4763 }
  0xce   : > { %9538 = vst [vmem:[#allocation26_spill] sm:$0xff] %v6837_v33  ;;  %5058 = vrot.lane.b32.xlu0 %v6628_v35, %s6018_s12 }
  0xcf   : > { %5053 = vrot.lane.b32.xlu1 %v9539_v41, %s6018_s12 }
  0xd0   : > { %v6843_v36 = vpop.permute.xlu0 %4778 }
  0xd1   : > { %9540 = vst [vmem:[#allocation23_spill] sm:$0xff] %v6843_v36  ;;  %v6845_v30 = vpop.permute.xlu1 %4773 }
  0xd2   : > { %9541 = vst [vmem:[#allocation30_spill] sm:$0xff] %v6845_v30  ;;  %5068 = vrot.lane.b32.xlu0 %v6643_v5, %s6018_s12  ;;  %v5968_v30 = vld [vmem:[%s9304_s3 + $0x8] sm:$0xff]  }
  0xd3   : > { %5063 = vrot.lane.b32.xlu1 %v6618_v32, %s6018_s12  ;;  %4444 = vmatprep.subr.bf16.mxu0 %v5968_v30 }
  0xd4   : > { %v6854_v33 = vpop.permute.xlu0 %4788  ;;  %4445 = vmatpush3.bf16.msra.mxu0 %v5968_v30 }
  0xd5   : > { %v6856_v51 = vpop.permute.xlu1 %4783  ;;  %4662 = vmatprep.subr.msk.bf16.mxu0 %vm2027_vm3, %v5969_v49 }
  0xd6   : > { %5078 = vrot.lane.b32.xlu0 %v6647_v6, %s6018_s12 }
  0xd7   : > { %5073 = vrot.lane.b32.xlu1 %v6636_v60, %s6018_s12 }
  0xd8   : > { %v6865_v36 = vpop.permute.xlu0 %4798 }
  0xd9   : > { %9542 = vst [vmem:[#allocation27_spill] sm:$0xff] %v6865_v36  ;;  %v6867_v5 = vpop.permute.xlu1 %4793 }
  0xda   : > { %5088 = vrot.lane.b32.xlu0 %v6667_v26, %s6019_s19  ;;  %v2029_v26 = vsel %vm2027_vm3, %v5969_v49, 0 }
  0xdb   : > { %5083 = vrot.lane.b32.xlu1 %v6685_v39, %s6018_s12  ;;  %4447 = vmatpush3.bf16.msra.mxu0 %v2029_v26 }
  0xdc   : > { %v6876_v6 = vpop.permute.xlu0 %4808 }
  0xdd   : > { %v6879_v36 = vpop.permute.xlu1 %4803 }
  0xde   : > { %9543 = vst [vmem:[#allocation38_spill] sm:$0xff] %v6879_v36  ;;  %5098 = vrot.lane.b32.xlu0 %v9519_v23, %s6020_s23 }
  0xdf   : > { %5093 = vrot.lane.b32.xlu1 %v6658_v2, %s6019_s19 }
  0xe0   : > { %v6886_v30 = vpop.permute.xlu0 %4818 }
  0xe1   : > { %v6888_v39 = vpop.permute.xlu1 %4813 }
  0xe2   : > { %5108 = vrot.lane.b32.xlu0 %v6526_v16, %s6021_s24 }
  0xe3   : > { %5103 = vrot.lane.b32.xlu1 %v9518_v34, %s6020_s23 }
  0xe4   : > { %v6894_v36 = vpop.permute.xlu0 %4828 }
  0xe5   : > { %v6896_v23 = vpop.permute.xlu1 %4823 }
  0xe6   : > { %5118 = vrot.lane.b32.xlu0 %v6683_v42, %s6019_s19 }
  0xe7   : > { %5113 = vrot.lane.b32.xlu1 %v6552_v10, %s6021_s24 }
  0xe8   : > { %v6902_v2 = vpop.permute.xlu0 %4838 }
  0xe9   : > { %v6904_v49 = vpop.permute.xlu1 %4833 }
  0xea   : > { %5128 = vrot.lane.b32.xlu0 %v9521_v29, %s6020_s23 }
  0xeb   : > { %5123 = vrot.lane.b32.xlu1 %v6675_v3, %s6019_s19 }
  0xec   : > { %v6910_v34 = vpop.permute.xlu0 %4848 }
  0xed   : > { %v6912_v16 = vpop.permute.xlu1 %4843 }
  0xee   : > { %5138 = vrot.lane.b32.xlu0 %v6544_v13, %s6021_s24 }
  0xef   : > { %5133 = vrot.lane.b32.xlu1 %v9520_v54, %s6020_s23 }
  0xf0   : > { %v6918_v10 = vpop.permute.xlu0 %4858 }
  0xf1   : > { %9544 = vst [vmem:[#allocation35_spill] sm:$0xff] %v6918_v10  ;;  %v6920_v42 = vpop.permute.xlu1 %4853  ;;  %v9614_v10 = vld [vmem:[#allocation27_spill] sm:$0xff] }
  0xf2   : > { %9545 = vst [vmem:[#allocation44_spill] sm:$0xff] %v6920_v42  ;;  %5148 = vrot.lane.b32.xlu0 %v6697_v12, %s6019_s19  ;;  %v9612_v42 = vld [vmem:[#allocation46_spill] sm:$0xff] }
  0xf3   : > { %5143 = vrot.lane.b32.xlu1 %v6571_v20, %s6021_s24 }
  0xf4   : > { %v6926_v3 = vpop.permute.xlu0 %4868 }
  0xf5   : > { %9546 = vst [vmem:[#allocation50_spill] sm:$0xff] %v6926_v3  ;;  %v6928_v29 = vpop.permute.xlu1 %4863 }
  0xf6   : > { %9547 = vst [vmem:[#allocation51_spill] sm:$0xff] %v6928_v29  ;;  %5158 = vrot.lane.b32.xlu0 %v9523_v45, %s6020_s23 }
  0xf7   : > { %5153 = vrot.lane.b32.xlu1 %v6691_v14, %s6019_s19 }
  0xf8   : > { %v6934_v54 = vpop.permute.xlu0 %4878 }
  0xf9   : > { %9548 = vst [vmem:[#allocation52_spill] sm:$0xff] %v6934_v54  ;;  %v6936_v13 = vpop.permute.xlu1 %4873  ;;  %v9589_v54 = vld [vmem:[#allocation18_spill] sm:$0xff] }
  0xfa   : > { %9549 = vst [vmem:[#allocation53_spill] sm:$0xff] %v6936_v13  ;;  %5168 = vrot.lane.b32.xlu0 %v6562_v40, %s6021_s24 }
  0xfb   : > { %5163 = vrot.lane.b32.xlu1 %v9522_v38, %s6020_s23 }
  0xfc   : > { %v6942_v20 = vpop.permute.xlu0 %4888 }
  0xfd   : > { %9550 = vst [vmem:[#allocation54_spill] sm:$0xff] %v6942_v20  ;;  %v6944_v12 = vpop.permute.xlu1 %4883  ;;  %v4706_v20 = vunpack.i.h.bf16 %v6777_v59 }
  0xfe   : > { %9551 = vst [vmem:[#allocation55_spill] sm:$0xff] %v6944_v12  ;;  %5178 = vrot.lane.b32.xlu0 %v6709_v46, %s6019_s19  ;;  %v9566_v12 = vld [vmem:[#allocation3_spill] sm:$0xff] }
  0xff   : > { %5173 = vrot.lane.b32.xlu1 %v6589_v43, %s6021_s24 }
 0x100   : > { %v6950_v45 = vpop.permute.xlu0 %4898 }
 0x101   : > { %9552 = vst [vmem:[#allocation56_spill] sm:$0xff] %v6950_v45  ;;  %v6952_v14 = vpop.permute.xlu1 %4893  ;;  %v4700_v45 = vunpack.i.l.bf16 %v6767_v9 }
 0x102   : > { %9553 = vst [vmem:[#allocation57_spill] sm:$0xff] %v6952_v14  ;;  %5188 = vrot.lane.b32.xlu0 %v9525_v18, %s6020_s23  ;;  %v9565_v14 = vld [vmem:[#allocation2_spill] sm:$0xff] }
 0x103   : > { %5183 = vrot.lane.b32.xlu1 %v6703_v17, %s6019_s19 }
 0x104   : > { %v6958_v40 = vpop.permute.xlu0 %4908 }
 0x105   : > { %v6960_v38 = vpop.permute.xlu1 %4903 }
 0x106   : > { %5198 = vrot.lane.b32.xlu0 %v6580_v25, %s6021_s24 }
 0x107   : > { %5193 = vrot.lane.b32.xlu1 %v9524_v15, %s6020_s23 }
 0x108   : > { %v6966_v43 = vpop.permute.xlu0 %4918 }
 0x109   : > { %9554 = vst [vmem:[#allocation58_spill] sm:$0xff] %v6966_v43  ;;  %v6968_v46 = vpop.permute.xlu1 %4913 }
 0x10a   : > { %9555 = vst [vmem:[#allocation59_spill] sm:$0xff] %v6968_v46  ;;  %5208 = vrot.lane.b32.xlu0 %v6721_v50, %s6019_s19  ;;  %v4796_v46 = vunpack.i.h.bf16 %v6867_v5 }
 0x10b   : > { %5203 = vrot.lane.b32.xlu1 %v6607_v22, %s6021_s24 }
 0x10c   : > { %v6974_v18 = vpop.permute.xlu0 %4928 }
 0x10d   : > { %9556 = vst [vmem:[#allocation60_spill] sm:$0xff] %v6974_v18  ;;  %v6976_v17 = vpop.permute.xlu1 %4923  ;;  %v9594_v18 = vld [vmem:[#allocation25_spill] sm:$0xff] }
 0x10e   : > { %9557 = vst [vmem:[#allocation61_spill] sm:$0xff] %v6976_v17  ;;  %5218 = vrot.lane.b32.xlu0 %v9527_v61, %s6020_s23 }
 0x10f   : > { %5213 = vrot.lane.b32.xlu1 %v6715_v21, %s6019_s19  ;;  %v4691_v21 = vunpack.i.h.bf16 %v6759_v37 }
 0x110   : > { %v6982_v15 = vpop.permute.xlu0 %4938 }
 0x111   : > { %9558 = vst [vmem:[#allocation62_spill] sm:$0xff] %v6982_v15  ;;  %v6984_v25 = vpop.permute.xlu1 %4933  ;;  %v4761_v15 = vunpack.i.h.bf16 %v9589_v54 }
 0x112   : > { %9559 = vst [vmem:[#allocation63_spill] sm:$0xff] %v6984_v25  ;;  %5228 = vrot.lane.b32.xlu0 %v9539_v41, %s6021_s24  ;;  %v4690_v41 = vunpack.i.l.bf16 %v6759_v37  ;;  %v4695_v37 = vunpack.i.l.bf16 %v6769_v1  ;;  %v9590_v25 = vld [vmem:[#allocation22_spill] sm:$0xff] }
 0x113   : > { %5223 = vrot.lane.b32.xlu1 %v9526_v62, %s6020_s23  ;;  %v4701_v62 = vunpack.i.h.bf16 %v6767_v9  ;;  %v4705_v9 = vunpack.i.l.bf16 %v6777_v59 }
 0x114   : > { %v6990_v22 = vpop.permute.xlu0 %4948 }
 0x115   : > { %9560 = vst [vmem:[#allocation64_spill] sm:$0xff] %v6990_v22  ;;  %v6992_v50 = vpop.permute.xlu1 %4943  ;;  %v9585_v22 = vld [vmem:[#allocation14_spill] sm:$0xff] }
 0x116   : > { %9561 = vst [vmem:[#allocation65_spill] sm:$0xff] %v6992_v50  ;;  %5238 = vrot.lane.b32.xlu0 %v6733_v8, %s6019_s19  ;;  %v4696_v8 = vunpack.i.h.bf16 %v6769_v1  ;;  %v7034_v1 = vsel %vm1671_vm4, %v6174_v56, %v4700_v45  ;;  %v7051_v56 = vsel %vm1671_vm4, %v6186_v0, %v4695_v37  ;;  %v4725_v45 = vunpack.i.l.bf16 %v6797_v7 }
 0x117   : > { %5233 = vrot.lane.b32.xlu1 %v6628_v35, %s6021_s24  ;;  %v4751_v13 = vunpack.i.h.bf16 %v9585_v22 }
 0x118   : > { %v6998_v61 = vpop.permute.xlu0 %4958  ;;  %v7040_v59 = vsel %vm1671_vm4, %v6183_v63, %v4696_v8  ;;  %v4726_v63 = vunpack.i.h.bf16 %v6797_v7 }
 0x119   : > { %9562 = vst [vmem:[#allocation66_spill] sm:$0xff] %v6998_v61  ;;  %v7002_v26 = vpop.permute.xlu1 %4953  ;;  %v7015_v61 = vsel %vm1671_vm4, %v9565_v14, %v4691_v21  ;;  %v4711_v21 = vunpack.i.h.bf16 %v6779_v11 }
 0x11a   : > { %9563 = vst [vmem:[#allocation67_spill] sm:$0xff] %v7002_v26  ;;  %5248 = vrot.lane.b32.xlu0 %v9529_v48, %s6020_s23  ;;  %v7020_v48 = vsel %vm1671_vm4, %v9566_v12, %v4690_v41  ;;  %v4710_v41 = vunpack.i.l.bf16 %v6779_v11  ;;  %v4720_v11 = vunpack.i.l.bf16 %v6789_v53 }
 0x11b   : > { %5243 = vrot.lane.b32.xlu1 %v6727_v57, %s6019_s19  ;;  %v7030_v57 = vsel %vm1671_vm4, %v6171_v55, %v4701_v62  ;;  %v7062_v62 = vsel %vm1671_vm4, %v6204_v19, %v4705_v9  ;;  %v7071_v0 = vsel %vm1671_vm4, %v9513_v58, %v4711_v21  ;;  %v9571_v58 = vld [vmem:[#allocation8_spill] sm:$0xff] }
 0x11c   : > { %v7011_v35 = vpop.permute.xlu0 %4968  ;;  %v7075_v7 = vsel %vm1671_vm4, %v6220_v31, %v4710_v41  ;;  %v4736_v37 = vunpack.i.h.bf16 %v9571_v58  ;;  %v9572_v31 = vld [vmem:[#allocation45_spill] sm:$0xff] }
 0x11d   : > { %9564 = vst [vmem:[#allocation68_spill] sm:$0xff] %v7011_v35  ;;  %v7024_v26 = vpop.permute.xlu1 %4963  ;;  %v4716_v35 = vunpack.i.h.bf16 %v6787_v44 }
 0x11e   : > { %9567 = vst [vmem:[#allocation69_spill] sm:$0xff] %v7024_v26  ;;  %5258 = vrot.lane.b32.xlu0 %v6618_v32, %s6021_s24  ;;  %v4715_v32 = vunpack.i.l.bf16 %v6787_v44  ;;  %v4721_v26 = vunpack.i.h.bf16 %v6789_v53  ;;  %v7058_v44 = vsel %vm1671_vm4, %v6192_v4, %v4706_v20  ;;  %v4730_v4 = vunpack.i.l.bf16 %v6799_v52 }
 0x11f   : > { %5253 = vrot.lane.b32.xlu1 %v9528_v27, %s6020_s23  ;;  %v4731_v27 = vunpack.i.h.bf16 %v6799_v52  ;;  %v7080_v19 = vsel %vm1671_vm4, %v6269_v28, %v4716_v35  ;;  %v9574_v52 = vld [vmem:[#allocation12_spill] sm:$0xff]  ;;  %v9575_v28 = vld [vmem:[#allocation15_spill] sm:$0xff] }
 0x120   : > { %v7047_v55 = vpop.permute.xlu0 %4978  ;;  %v7084_v53 = vsel %vm1671_vm4, %v6265_v24, %v4715_v32  ;;  %v7097_v21 = vsel %vm1671_vm4, %v9574_v52, %v4720_v11  ;;  %v7101_v35 = vsel %vm1671_vm4, %v9575_v28, %v4726_v63  ;;  %v9576_v24 = vld [vmem:[#allocation16_spill] sm:$0xff]  ;;  %v7118_v11 = vpack.i.bf16 %v9565_v14, %v9566_v12  ;;  %v9581_v63 = vld [vmem:[#allocation19_spill] sm:$0xff] }
 0x121   : > { %9568 = vst [vmem:[#allocation70_spill] sm:$0xff] %v7047_v55  ;;  %v7065_v8 = vpop.permute.xlu1 %4973  ;;  %v7105_v41 = vsel %vm1671_vm4, %v9576_v24, %v4725_v45  ;;  %v9579_v55 = vld [vmem:[#allocation39_spill] sm:$0xff]  ;;  %v7122_v52 = vsel %vm1671_vm4, %v9581_v63, %v4730_v4  ;;  %v9582_v45 = vld [vmem:[#allocation9_spill] sm:$0xff]  ;;  %v9586_v12 = vld [vmem:[#allocation48_spill] sm:$0xff]  ;;  %v4750_v4 = vunpack.i.l.bf16 %v9585_v22 }
 0x122   : > { %9569 = vst [vmem:[#allocation71_spill] sm:$0xff] %v7065_v8  ;;  %5268 = vrot.lane.b32.xlu0 %v6745_v47, %s6019_s19  ;;  %v9570_v47 = vld [vmem:[#allocation13_spill] sm:$0xff]  ;;  %9580 = vst [vmem:[#allocation45_spill] sm:$0xff] %v7118_v11  ;;  %v4741_v28 = vunpack.i.h.bf16 %v9582_v45  ;;  %v9583_v24 = vld [vmem:[#allocation7_spill] sm:$0xff] }
 0x123   : > { %v7088_v20 = vsel %vm1671_vm4, %v9570_v47, %v4721_v26  ;;  %5263 = vrot.lane.b32.xlu1 %v9572_v31, %s6021_s24  ;;  %v9577_v26 = vld [vmem:[#allocation20_spill] sm:$0xff]  ;;  %v4735_v47 = vunpack.i.l.bf16 %v9571_v58  ;;  %v9584_v58 = vld [vmem:[#allocation21_spill] sm:$0xff]  ;;  %v9588_v63 = vld [vmem:[#allocation11_spill] sm:$0xff] }
 0x124   : > { %v7093_v9 = vpop.permute.xlu0 %4988  ;;  %v7109_v32 = vsel %vm1671_vm4, %v9577_v26, %v4731_v27  ;;  %v4740_v27 = vunpack.i.l.bf16 %v9582_v45  ;;  %v4746_v26 = vunpack.i.h.bf16 %v9583_v24  ;;  %v7129_v8 = vsel %vm1671_vm4, %v9584_v58, %v4736_v37  ;;  %v9591_v58 = vld [vmem:[#allocation17_spill] sm:$0xff]  ;;  %v9593_v22 = vld [vmem:[#allocation24_spill] sm:$0xff] }
 0x125   : > { %9573 = vst [vmem:[#allocation13_spill] sm:$0xff] %v7093_v9  ;;  %v7112_v31 = vpop.permute.xlu1 %4983  ;;  %v4756_v50 = vunpack.i.h.bf16 %v9588_v63  ;;  %v4755_v45 = vunpack.i.l.bf16 %v9588_v63  ;;  %v7143_v37 = vsel %vm1671_vm4, %v9590_v25, %v4735_v47  ;;  %v4771_v29 = vunpack.i.h.bf16 %v9591_v58  ;;  %v9595_v25 = vld [vmem:[#allocation28_spill] sm:$0xff]  ;;  %v9596_v47 = vld [vmem:[#allocation29_spill] sm:$0xff] }
 0x126   : > { %9578 = vst [vmem:[#allocation8_spill] sm:$0xff] %v7112_v31  ;;  %5278 = vrot.lane.b32.xlu0 %v9579_v55, %s6020_s23  ;;  %v4745_v55 = vunpack.i.l.bf16 %v9583_v24  ;;  %v4760_v24 = vunpack.i.l.bf16 %v9589_v54  ;;  %v7154_v63 = vsel %vm1671_vm4, %v9593_v22, %v4741_v28  ;;  %v7158_v17 = vsel %vm1671_vm4, %v9594_v18, %v4740_v27  ;;  %v9599_v22 = vld [vmem:[#allocation43_spill] sm:$0xff]  ;;  %v9605_v9 = vld [vmem:[#allocation37_spill] sm:$0xff] }
 0x127   : > { %5273 = vrot.lane.b32.xlu1 %v9586_v12, %s6019_s19  ;;  %v4770_v12 = vunpack.i.l.bf16 %v9591_v58  ;;  %v7162_v54 = vsel %vm1671_vm4, %v9595_v25, %v4746_v26  ;;  %v9601_v27 = vld [vmem:[#allocation31_spill] sm:$0xff]  ;;  %v9602_v25 = vld [vmem:[#allocation33_spill] sm:$0xff] }
 0x128   : > { %v7135_v14 = vpop.permute.xlu0 %4998  ;;  %v7166_v58 = vsel %vm1671_vm4, %v9596_v47, %v4745_v55  ;;  %v7180_v26 = vsel %vm1671_vm4, %v9601_v27, %v4750_v4  ;;  %v7184_v55 = vsel %vm1671_vm4, %v9602_v25, %v4756_v50  ;;  %v9603_v47 = vld [vmem:[#allocation34_spill] sm:$0xff]  ;;  %v7200_v4 = vsel %vm1704_vm5, %v7015_v61, %v4771_v29  ;;  %v9606_v27 = vld [vmem:[#allocation23_spill] sm:$0xff]  ;;  %v9610_v61 = vld [vmem:[#allocation41_spill] sm:$0xff] }
 0x129   : > { %9587 = vst [vmem:[#allocation12_spill] sm:$0xff] %v7135_v14  ;;  %v7148_v3 = vpop.permute.xlu1 %4993  ;;  %v7204_v50 = vsel %vm1704_vm5, %v7020_v48, %v4770_v12  ;;  %v4781_v25 = vunpack.i.h.bf16 %v9606_v27  ;;  %v4790_v29 = vunpack.i.l.bf16 %v6854_v33  ;;  %v9611_v48 = vld [vmem:[#allocation42_spill] sm:$0xff] }
 0x12a   : > { %9592 = vst [vmem:[#allocation15_spill] sm:$0xff] %v7148_v3  ;;  %5288 = vrot.lane.b32.xlu0 %v6636_v60, %s6021_s24  ;;  %v9597_v3 = vld [vmem:[#allocation32_spill] sm:$0xff]  ;;  %v9598_v60 = vld [vmem:[#allocation26_spill] sm:$0xff] }
 0x12b   : > { %v7170_v14 = vsel %vm1671_vm4, %v9597_v3, %v4751_v13  ;;  %v4766_v31 = vunpack.i.h.bf16 %v9598_v60  ;;  %v4765_v28 = vunpack.i.l.bf16 %v9598_v60  ;;  %5283 = vrot.lane.b32.xlu1 %v9599_v22, %s6020_s23  ;;  %v7188_v3 = vsel %vm1671_vm4, %v9603_v47, %v4755_v45  ;;  %v9604_v13 = vld [vmem:[#allocation36_spill] sm:$0xff]  ;;  %v9608_v47 = vld [vmem:[#allocation49_spill] sm:$0xff] }
 0x12c   : > { %v7176_v18 = vpop.permute.xlu0 %5008  ;;  %v7192_v60 = vsel %vm1671_vm4, %v9604_v13, %v4761_v15  ;;  %v7196_v22 = vsel %vm1671_vm4, %v9605_v9, %v4760_v24  ;;  %v9609_v15 = vld [vmem:[#allocation30_spill] sm:$0xff]  ;;  %v4780_v24 = vunpack.i.l.bf16 %v9606_v27  ;;  %v4785_v27 = vunpack.i.l.bf16 %v6856_v51 }
 0x12d   : > { %9600 = vst [vmem:[#allocation16_spill] sm:$0xff] %v7176_v18  ;;  %v7207_v45 = vpop.permute.xlu1 %5003  ;;  %v4776_v13 = vunpack.i.h.bf16 %v9609_v15  ;;  %v4775_v9 = vunpack.i.l.bf16 %v9609_v15  ;;  %v7217_v18 = vsel %vm1671_vm4, %v9610_v61, %v4766_v31  ;;  %v7221_v12 = vsel %vm1671_vm4, %v9611_v48, %v4765_v28 }
 0x12e   : > { %9607 = vst [vmem:[#allocation20_spill] sm:$0xff] %v7207_v45  ;;  %5298 = vrot.lane.b32.xlu0 %v9608_v47, %s6019_s19  ;;  %v4786_v45 = vunpack.i.h.bf16 %v6856_v51  ;;  %v4791_v47 = vunpack.i.h.bf16 %v6854_v33  ;;  %v4801_v31 = vunpack.i.h.bf16 %v9614_v10  ;;  %v4800_v61 = vunpack.i.l.bf16 %v9614_v10  ;;  %v9615_v51 = vld [vmem:[#allocation47_spill] sm:$0xff] }
 0x12f   : > { %5293 = vrot.lane.b32.xlu1 %v9612_v42, %s6021_s24  ;;  %v7235_v28 = vsel %vm1704_vm5, %v7030_v57, %v4781_v25  ;;  %v4795_v48 = vunpack.i.l.bf16 %v6867_v5  ;;  %v4811_v33 = vunpack.i.h.bf16 %v6876_v6  ;;  %v4810_v42 = vunpack.i.l.bf16 %v6876_v6  ;;  %v9616_v25 = vld [vmem:[#allocation38_spill] sm:$0xff] }
 0x130   : > { %v7227_v15 = vpop.permute.xlu0 %5018  ;;  %v7250_v10 = vsel %vm1704_vm5, %v7040_v59, %v4776_v13  ;;  %v7254_v5 = vsel %vm1704_vm5, %v7034_v1, %v4780_v24  ;;  %v7258_v6 = vsel %vm1704_vm5, %v7075_v7, %v4790_v29  ;;  %v7262_v57 = vsel %vm1704_vm5, %v7058_v44, %v4786_v45 }
 0x131   : > { %9613 = vst [vmem:[#allocation39_spill] sm:$0xff] %v7227_v15  ;;  %v7240_v43 = vpop.permute.xlu1 %5013  ;;  %v7246_v15 = vsel %vm1704_vm5, %v7051_v56, %v4775_v9  ;;  %v7266_v56 = vsel %vm1704_vm5, %v7071_v0, %v4791_v47  ;;  %v4806_v59 = vunpack.i.h.bf16 %v9616_v25  ;;  %v4805_v13 = vunpack.i.l.bf16 %v9616_v25 }
 0x132   : > { %5308 = vrot.lane.b32.xlu0 %v9615_v51, %s6020_s23  ;;  %v7276_v7 = vsel %vm1704_vm5, %v7062_v62, %v4785_v27  ;;  %v7280_v44 = vsel %vm1704_vm5, %v7080_v19, %v4796_v46  ;;  %v7284_v0 = vsel %vm1704_vm5, %v7097_v21, %v4800_v61  ;;  %v7288_v45 = vsel %vm1704_vm5, %v7088_v20, %v4801_v31  ;;  %v9617_v21 = vld [vmem:[#allocation10_spill] sm:$0xff] }
 0x133   : > { %5303 = vrot.lane.b32.xlu1 %v7118_v11, %s6019_s19  ;;  %v7292_v9 = vsel %vm1704_vm5, %v7084_v53, %v4795_v48  ;;  %v7296_v62 = vsel %vm1704_vm5, %v7122_v52, %v4810_v42  ;;  %v7300_v46 = vsel %vm1704_vm5, %v7109_v32, %v4811_v33  ;;  %v4816_v20 = vunpack.i.h.bf16 %v6888_v39  ;;  %v9618_v31 = vld [vmem:[#allocation6_spill] sm:$0xff] }
 0x134   : > { %v7272_v1 = vpop.permute.xlu0 %5028  ;;  %v4815_v24 = vunpack.i.l.bf16 %v6888_v39  ;;  %v4821_v53 = vunpack.i.h.bf16 %v6886_v30  ;;  %v4820_v29 = vunpack.i.l.bf16 %v6886_v30  ;;  %v7312_v52 = vsel %vm1704_vm5, %v7101_v35, %v4806_v59 }
 0x135   : > { %v7302_v19 = vpop.permute.xlu1 %5023  ;;  %v7316_v32 = vsel %vm1704_vm5, %v7105_v41, %v4805_v13  ;;  %v4831_v47 = vunpack.i.h.bf16 %v6894_v36  ;;  %v4830_v27 = vunpack.i.l.bf16 %v6894_v36  ;;  %v4826_v61 = vunpack.i.h.bf16 %v6896_v23 }
 0x136   : > { %5318 = vrot.lane.b32.xlu0 %v9617_v21, %s6021_s24  ;;  %v4825_v30 = vunpack.i.l.bf16 %v6896_v23  ;;  %v4841_v35 = vunpack.i.h.bf16 %v6902_v2  ;;  %v4840_v48 = vunpack.i.l.bf16 %v6902_v2  ;;  %v4836_v41 = vunpack.i.h.bf16 %v6904_v49 }
 0x137   : > { %5313 = vrot.lane.b32.xlu1 %v9618_v31, %s6020_s23  ;;  %v4835_v33 = vunpack.i.l.bf16 %v6904_v49  ;;  %v4851_v42 = vunpack.i.h.bf16 %v6910_v34  ;;  %v4850_v36 = vunpack.i.l.bf16 %v6910_v34  ;;  %v7338_v23 = vsel %vm1704_vm5, %v7129_v8, %v4816_v20 }
 0x138   : > { %v7322_v39 = vpop.permute.xlu0 %5038  ;;  %v7342_v2 = vsel %vm1704_vm5, %v7143_v37, %v4815_v24  ;;  %v7346_v49 = vsel %vm1704_vm5, %v7158_v17, %v4820_v29  ;;  %v7350_v34 = vsel %vm1704_vm5, %v7154_v63, %v4821_v53  ;;  %v1729_v25 = vsel %vm1704_vm5, %v7180_v26, %v4830_v27  ;;  %v9621_v37 = vld [vmem:[#allocation40_spill] sm:$0xff] }
 0x139   : > { %v7332_v51 = vpop.permute.xlu1 %5033  ;;  %9619 = vst [vmem:[#allocation19_spill] sm:$0xff] %v7346_v49  ;;  %9620 = vst [vmem:[#allocation9_spill] sm:$0xff] %v7350_v34  ;;  %v1730_v59 = vsel %vm1704_vm5, %v7170_v14, %v4831_v47  ;;  %v4846_v8 = vunpack.i.h.bf16 %v6912_v16  ;;  %v4845_v13 = vunpack.i.l.bf16 %v6912_v16  ;;  %v1728_v17 = vsel %vm1704_vm5, %v7162_v54, %v4826_v61  ;;  %v9624_v61 = vld [vmem:[#allocation35_spill] sm:$0xff] }
 0x13a   : > { %5328 = vrot.lane.b32.xlu0 %v9618_v31, %s6015_s28  ;;  %v1727_v63 = vsel %vm1704_vm5, %v7166_v58, %v4825_v30  ;;  %v1733_v26 = vsel %vm1704_vm5, %v7196_v22, %v4840_v48  ;;  %v1734_v14 = vsel %vm1704_vm5, %v7192_v60, %v4841_v35  ;;  %v1732_v16 = vsel %vm1704_vm5, %v7184_v55, %v4836_v41  ;;  %v9625_v35 = vld [vmem:[#allocation59_spill] sm:$0xff] }
 0x13b   : > { %5323 = vrot.lane.b32.xlu1 %v9621_v37, %s6021_s24  ;;  %v1731_v20 = vsel %vm1704_vm5, %v7188_v3, %v4835_v33  ;;  %v7376_v24 = vsel %vm1737_vm6, %v7204_v50, %v4850_v36  ;;  %v7380_v54 = vsel %vm1737_vm6, %v7200_v4, %v4851_v42  ;;  %v4906_v60 = vunpack.i.h.bf16 %v6960_v38  ;;  %v9622_v4 = vld [vmem:[#allocation58_spill] sm:$0xff]  ;;  %v9628_v37 = vld [vmem:[#allocation8_spill] sm:$0xff] }
 0x13c   : > { %v7360_v21 = vpop.permute.xlu0 %5048  ;;  %v4905_v22 = vunpack.i.l.bf16 %v6960_v38  ;;  %v4911_v55 = vunpack.i.h.bf16 %v6958_v40  ;;  %v4910_v53 = vunpack.i.l.bf16 %v6958_v40  ;;  %v7390_v3 = vsel %vm1704_vm5, %v7217_v18, %v4846_v8  ;;  %v9626_v18 = vld [vmem:[#allocation44_spill] sm:$0xff] }
 0x13d   : > { %v7382_v58 = vpop.permute.xlu1 %5043  ;;  %v7394_v50 = vsel %vm1704_vm5, %v7221_v12, %v4845_v13  ;;  %v4921_v29 = vunpack.i.h.bf16 %v9622_v4  ;;  %v4920_v47 = vunpack.i.l.bf16 %v9622_v4  ;;  %v4861_v38 = vunpack.i.h.bf16 %v9624_v61  ;;  %v9627_v12 = vld [vmem:[#allocation13_spill] sm:$0xff] }
 0x13e   : > { %v4860_v30 = vunpack.i.l.bf16 %v9624_v61  ;;  %v4916_v40 = vunpack.i.h.bf16 %v9625_v35  ;;  %v4915_v48 = vunpack.i.l.bf16 %v9625_v35  ;;  %v4856_v41 = vunpack.i.h.bf16 %v9626_v18 }
 0x13f   : > { %v4855_v33 = vunpack.i.l.bf16 %v9626_v18  ;;  %v4991_v42 = vunpack.i.h.bf16 %v9627_v12  ;;  %v4990_v36 = vunpack.i.l.bf16 %v9627_v12  ;;  %v1760_v13 = vsel %vm1737_vm6, %v1727_v63, %v4905_v22 }
 0x140   : > { %v7398_v27 = vpop.permute.xlu0 %5058  ;;  %v1761_v4 = vsel %vm1737_vm6, %v1728_v17, %v4906_v60  ;;  %v1762_v61 = vsel %vm1737_vm6, %v1729_v25, %v4910_v53  ;;  %v1763_v31 = vsel %vm1737_vm6, %v1730_v59, %v4911_v55  ;;  %v1766_v35 = vsel %vm1737_vm6, %v1733_v26, %v4920_v47  ;;  %v9629_v59 = vld [vmem:[#allocation12_spill] sm:$0xff]  ;;  %v9630_v47 = vld [vmem:[#allocation15_spill] sm:$0xff] }
 0x141   : > { %9623 = vst [vmem:[#allocation7_spill] sm:$0xff] %v7398_v27  ;;  %v7408_v8 = vpop.permute.xlu1 %5053  ;;  %v1767_v11 = vsel %vm1737_vm6, %v1734_v14, %v4921_v29  ;;  %v4986_v18 = vunpack.i.h.bf16 %v9628_v37  ;;  %v4985_v34 = vunpack.i.l.bf16 %v9628_v37  ;;  %v1764_v12 = vsel %vm1737_vm6, %v1731_v20, %v4915_v48 }
 0x142   : > { %v1765_v49 = vsel %vm1737_vm6, %v1732_v16, %v4916_v40  ;;  %v1795_v17 = vsel %vm1770_vm7, %v1762_v61, %v4990_v36  ;;  %v1796_v25 = vsel %vm1770_vm7, %v1763_v31, %v4991_v42  ;;  %v5001_v60 = vunpack.i.h.bf16 %v9629_v59 }
 0x143   : > { %v5000_v26 = vunpack.i.l.bf16 %v9629_v59  ;;  %v1793_v16 = vsel %vm1770_vm7, %v1760_v13, %v4985_v34  ;;  %v1794_v29 = vsel %vm1770_vm7, %v1761_v4, %v4986_v18  ;;  %v4995_v31 = vunpack.i.l.bf16 %v9630_v47 }
 0x144   : > { %v5069_v27 = vpop.permute.xlu0 %5068  ;;  %v1800_v13 = vsel %vm1770_vm7, %v1767_v11, %v5001_v60  ;;  %v7456_v60 = vsel %vm1737_vm6, %v7254_v5, %v4860_v30 }
 0x145   : > { %v5071_v63 = vunpack.i.h.bf16 %v5069_v27  ;;  %v5070_v22 = vunpack.i.l.bf16 %v5069_v27  ;;  %v5064_v14 = vpop.permute.xlu1 %5063  ;;  %v4996_v27 = vunpack.i.h.bf16 %v9630_v47  ;;  %v1799_v34 = vsel %vm1770_vm7, %v1766_v35, %v5000_v26 }
 0x146   : > { %v5066_v55 = vunpack.i.h.bf16 %v5064_v14  ;;  %v5065_v53 = vunpack.i.l.bf16 %v5064_v14  ;;  %v7460_v26 = vsel %vm1737_vm6, %v7235_v28, %v4861_v38 }
 0x147   : > { %v7425_v37 = vsel %vm1803_vm8, %v1795_v17, %v5070_v22  ;;  %v7428_v20 = vsel %vm1803_vm8, %v1796_v25, %v5071_v63  ;;  %v9631_v22 = vld [vmem:[#allocation61_spill] sm:$0xff] }
 0x148   : > { %v5079_v40 = vpop.permute.xlu0 %5078  ;;  %v7435_v48 = vsel %vm1803_vm8, %v1793_v16, %v5065_v53  ;;  %v7438_v42 = vsel %vm1803_vm8, %v1794_v29, %v5066_v55  ;;  %v4926_v63 = vunpack.i.h.bf16 %v9631_v22  ;;  %v4925_v17 = vunpack.i.l.bf16 %v9631_v22  ;;  %v9632_v16 = vld [vmem:[#allocation20_spill] sm:$0xff] }
 0x149   : > { %v5081_v36 = vunpack.i.h.bf16 %v5079_v40  ;;  %v5080_v61 = vunpack.i.l.bf16 %v5079_v40  ;;  %v5074_v4 = vpop.permute.xlu1 %5073  ;;  %v1797_v55 = vsel %vm1770_vm7, %v1764_v12, %v4995_v31  ;;  %v1798_v53 = vsel %vm1770_vm7, %v1765_v49, %v4996_v27  ;;  %v9633_v31 = vld [vmem:[#allocation60_spill] sm:$0xff] }
 0x14a   : > { %v5076_v18 = vunpack.i.h.bf16 %v5074_v4  ;;  %v5075_v25 = vunpack.i.l.bf16 %v5074_v4  ;;  %v5006_v29 = vunpack.i.h.bf16 %v9632_v16  ;;  %v5005_v35 = vunpack.i.l.bf16 %v9632_v16  ;;  %v9636_v16 = vld [vmem:[#allocation51_spill] sm:$0xff] }
 0x14b   : > { %v7445_v59 = vsel %vm1803_vm8, %v1799_v34, %v5080_v61  ;;  %v7448_v14 = vsel %vm1803_vm8, %v1800_v13, %v5081_v36  ;;  %v1740_v49 = vsel %vm1737_vm6, %v7246_v15, %v4855_v33  ;;  %v1741_v27 = vsel %vm1737_vm6, %v7250_v10, %v4856_v41  ;;  %v9634_v33 = vld [vmem:[#allocation16_spill] sm:$0xff] }
 0x14c   : > { %v5089_v11 = vpop.permute.xlu0 %5088  ;;  %v7463_v47 = vsel %vm1803_vm8, %v1797_v55, %v5075_v25  ;;  %v7466_v12 = vsel %vm1803_vm8, %v1798_v53, %v5076_v18  ;;  %v4931_v40 = vunpack.i.h.bf16 %v9633_v31  ;;  %v4930_v5 = vunpack.i.l.bf16 %v9633_v31 }
 0x14d   : > { %v5084_v30 = vpop.permute.xlu1 %5083  ;;  %v1768_v28 = vsel %vm1737_vm6, %v7394_v50, %v4925_v17  ;;  %v1769_v38 = vsel %vm1737_vm6, %v7390_v3, %v4926_v63  ;;  %v5011_v10 = vunpack.i.h.bf16 %v9634_v33  ;;  %v5010_v41 = vunpack.i.l.bf16 %v9634_v33  ;;  %v9635_v63 = vld [vmem:[#allocation50_spill] sm:$0xff] }
 0x14e   : > { %v5086_v36 = vunpack.i.h.bf16 %v5084_v30  ;;  %v5085_v61 = vunpack.i.l.bf16 %v5084_v30  ;;  %v1801_v22 = vsel %vm1770_vm7, %v1768_v28, %v5005_v35  ;;  %v1802_v15 = vsel %vm1770_vm7, %v1769_v38, %v5006_v29  ;;  %v9637_v28 = vld [vmem:[#allocation63_spill] sm:$0xff] }
 0x14f   : > { %v5091_v17 = vunpack.i.h.bf16 %v5089_v11  ;;  %v5090_v3 = vunpack.i.l.bf16 %v5089_v11  ;;  %v4871_v4 = vunpack.i.h.bf16 %v9635_v63  ;;  %v4870_v18 = vunpack.i.l.bf16 %v9635_v63 }
 0x150   : > { %v5099_v34 = vpop.permute.xlu0 %5098  ;;  %v7483_v13 = vsel %vm1803_vm8, %v1801_v22, %v5085_v61  ;;  %v7486_v50 = vsel %vm1803_vm8, %v1802_v15, %v5086_v36  ;;  %v4866_v29 = vunpack.i.h.bf16 %v9636_v16  ;;  %v4865_v35 = vunpack.i.l.bf16 %v9636_v16 }
 0x151   : > { %v5094_v25 = vpop.permute.xlu1 %5093  ;;  %v5101_v55 = vunpack.i.h.bf16 %v5099_v34  ;;  %v5100_v53 = vunpack.i.l.bf16 %v5099_v34  ;;  %v1771_v31 = vsel %vm1770_vm7, %v7376_v24, %v4930_v5  ;;  %v1772_v30 = vsel %vm1770_vm7, %v7380_v54, %v4931_v40 }
 0x152   : > { %v4936_v38 = vunpack.i.h.bf16 %v9637_v28  ;;  %v4935_v11 = vunpack.i.l.bf16 %v9637_v28  ;;  %v1804_v36 = vsel %vm1803_vm8, %v1771_v31, %v5010_v41  ;;  %v1805_v61 = vsel %vm1803_vm8, %v1772_v30, %v5011_v10 }
 0x153   : > { %v1837_v34 = vsel %vm1836_vm9, %v1804_v36, %v5090_v3  ;;  %v1838_v63 = vsel %vm1836_vm9, %v1805_v61, %v5091_v17  ;;  %v5016_v24 = vunpack.i.h.bf16 %v7240_v43  ;;  %v5015_v5 = vunpack.i.l.bf16 %v7240_v43 }
 0x154   : > { %v5109_v22 = vpop.permute.xlu0 %5108  ;;  %v1870_v40 = vsel %vm1869_vm10, %v1837_v34, %v5100_v53  ;;  %v1871_v16 = vsel %vm1869_vm10, %v1838_v63, %v5101_v55  ;;  %v5096_v28 = vunpack.i.h.bf16 %v5094_v25  ;;  %v5095_v41 = vunpack.i.l.bf16 %v5094_v25 }
 0x155   : > { %v5111_v15 = vunpack.i.h.bf16 %v5109_v22  ;;  %v5110_v33 = vunpack.i.l.bf16 %v5109_v22  ;;  %v5104_v54 = vpop.permute.xlu1 %5103  ;;  %v7510_v3 = vsel %vm1737_vm6, %v7258_v6, %v4870_v18  ;;  %v1744_v43 = vsel %vm1737_vm6, %v7276_v7, %v4865_v35  ;;  %v9638_v22 = vld [vmem:[#allocation62_spill] sm:$0xff] }
 0x156   : > { %v5106_v17 = vunpack.i.h.bf16 %v5104_v54  ;;  %v5105_v30 = vunpack.i.l.bf16 %v5104_v54  ;;  %v7516_v55 = vsel %vm1737_vm6, %v7266_v56, %v4871_v4  ;;  %v1773_v25 = vsel %vm1770_vm7, %v1740_v49, %v4935_v11  ;;  %v9639_v49 = vld [vmem:[#allocation39_spill] sm:$0xff] }
 0x157   : > { %v1903_v10 = vsel %vm1902_vm11, %v1870_v40, %v5110_v33  ;;  %v1904_v31 = vsel %vm1902_vm11, %v1871_v16, %v5111_v15  ;;  %v1774_v53 = vsel %vm1770_vm7, %v1741_v27, %v4936_v38  ;;  %v4941_v15 = vunpack.i.h.bf16 %v9638_v22 }
 0x158   : > { %v5119_v36 = vpop.permute.xlu0 %5118  ;;  %v1935_v61 = vpack.c.bf16 %v1904_v31, %v1903_v10  ;;  %v4940_v6 = vunpack.i.l.bf16 %v9638_v22  ;;  %v1806_v18 = vsel %vm1803_vm8, %v1773_v25, %v5015_v5  ;;  %v1807_v33 = vsel %vm1803_vm8, %v1774_v53, %v5016_v24  ;;  %v9640_v25 = vld [vmem:[#allocation52_spill] sm:$0xff] }
 0x159   : > { %v5114_v34 = vpop.permute.xlu1 %5113  ;;  %v1839_v7 = vsel %vm1836_vm9, %v1806_v18, %v5095_v41  ;;  %v1840_v56 = vsel %vm1836_vm9, %v1807_v33, %v5096_v28  ;;  %v5021_v11 = vunpack.i.h.bf16 %v9639_v49  ;;  %v5020_v27 = vunpack.i.l.bf16 %v9639_v49  ;;  %v9641_v18 = vld [vmem:[#allocation65_spill] sm:$0xff] }
 0x15a   : > { %4448 = vmatprep.mubr.msk.bf16.mxu0 %vm1978_vm12, %v1935_v61  ;;  %v5116_v4 = vunpack.i.h.bf16 %v5114_v34  ;;  %v5115_v35 = vunpack.i.l.bf16 %v5114_v34  ;;  %v1872_v38 = vsel %vm1869_vm10, %v1839_v7, %v5105_v30  ;;  %v1873_v63 = vsel %vm1869_vm10, %v1840_v56, %v5106_v17 }
 0x15b   : > { %v5121_v40 = vunpack.i.h.bf16 %v5119_v36  ;;  %v5120_v16 = vunpack.i.l.bf16 %v5119_v36  ;;  %v1745_v28 = vsel %vm1737_vm6, %v7262_v57, %v4866_v29  ;;  %v4881_v53 = vunpack.i.h.bf16 %v9640_v25 }
 0x15c   : > { %v5129_v5 = vpop.permute.xlu0 %5128  ;;  %v1905_v24 = vsel %vm1902_vm11, %v1872_v38, %v5115_v35  ;;  %v1906_v54 = vsel %vm1902_vm11, %v1873_v63, %v5116_v4  ;;  %v4880_v30 = vunpack.i.l.bf16 %v9640_v25  ;;  %v1775_v17 = vsel %vm1770_vm7, %v7456_v60, %v4940_v6 }
 0x15d   : > { %v5124_v41 = vpop.permute.xlu1 %5123  ;;  %v5131_v10 = vunpack.i.h.bf16 %v5129_v5  ;;  %v5130_v31 = vunpack.i.l.bf16 %v5129_v5  ;;  %v1936_v61 = vpack.c.bf16 %v1906_v54, %v1905_v24  ;;  %v1776_v22 = vsel %vm1770_vm7, %v7460_v26, %v4941_v15  ;;  %v9642_v5 = vld [vmem:[#allocation53_spill] sm:$0xff] }
 0x15e   : > { %v4946_v33 = vunpack.i.h.bf16 %v9641_v18  ;;  %v4945_v36 = vunpack.i.l.bf16 %v9641_v18  ;;  %v1808_v57 = vsel %vm1803_vm8, %v1775_v17, %v5020_v27  ;;  %v1809_v29 = vsel %vm1803_vm8, %v1776_v22, %v5021_v11 }
 0x15f   : > { %4449 = vmatmul.mubr.msk.bf16.vlgmr.msra.gmra.mrb[0].mxu0 %vm1978_vm12, %v1936_v61  ;;  %v1841_v7 = vsel %vm1836_vm9, %v1808_v57, %v5120_v16  ;;  %v1842_v56 = vsel %vm1836_vm9, %v1809_v29, %v5121_v40  ;;  %v5026_v6 = vunpack.i.h.bf16 %v7302_v19  ;;  %v5025_v26 = vunpack.i.l.bf16 %v7302_v19 }
 0x160   : > { %v5139_v34 = vpop.permute.xlu0 %5138  ;;  %v1874_v15 = vsel %vm1869_vm10, %v1841_v7, %v5130_v31  ;;  %v1875_v35 = vsel %vm1869_vm10, %v1842_v56, %v5131_v10  ;;  %v5126_v27 = vunpack.i.h.bf16 %v5124_v41  ;;  %v5125_v11 = vunpack.i.l.bf16 %v5124_v41  ;;  %v9643_v31 = vld [vmem:[#allocation64_spill] sm:$0xff] }
 0x161   : > { %v5141_v4 = vunpack.i.h.bf16 %v5139_v34  ;;  %v5140_v60 = vunpack.i.l.bf16 %v5139_v34  ;;  %v5134_v49 = vpop.permute.xlu1 %5133  ;;  %v4876_v24 = vunpack.i.h.bf16 %v9642_v5  ;;  %v4875_v25 = vunpack.i.l.bf16 %v9642_v5 }
 0x162   : > { %v5136_v54 = vunpack.i.h.bf16 %v5134_v49  ;;  %v5135_v40 = vunpack.i.l.bf16 %v5134_v49  ;;  %v7558_v19 = vsel %vm1737_vm6, %v7284_v0, %v4880_v30  ;;  %v1777_v10 = vsel %vm1770_vm7, %v1744_v43, %v4945_v36 }
 0x163   : > { %v1907_v38 = vsel %vm1902_vm11, %v1874_v15, %v5140_v60  ;;  %v1908_v63 = vsel %vm1902_vm11, %v1875_v35, %v5141_v4  ;;  %v1778_v41 = vsel %vm1770_vm7, %v1745_v28, %v4946_v33  ;;  %v4951_v17 = vunpack.i.h.bf16 %v9643_v31 }
 0x164   : > { %v5149_v16 = vpop.permute.xlu0 %5148  ;;  %v1937_v61 = vpack.c.bf16 %v1908_v63, %v1907_v38  ;;  %v4950_v22 = vunpack.i.l.bf16 %v9643_v31  ;;  %v1810_v18 = vsel %vm1803_vm8, %v1777_v10, %v5025_v26  ;;  %v1811_v57 = vsel %vm1803_vm8, %v1778_v41, %v5026_v6 }
 0x165   : > { %v5144_v29 = vpop.permute.xlu1 %5143  ;;  %v1843_v34 = vsel %vm1836_vm9, %v1810_v18, %v5125_v11  ;;  %v1844_v0 = vsel %vm1836_vm9, %v1811_v57, %v5126_v27  ;;  %v5031_v43 = vunpack.i.h.bf16 %v7272_v1  ;;  %v5030_v28 = vunpack.i.l.bf16 %v7272_v1 }
 0x166   : > { %4452 = vmatprep.mubr.msk.bf16.mxu0 %vm1978_vm12, %v1937_v61  ;;  %v5146_v30 = vunpack.i.h.bf16 %v5144_v29  ;;  %v5145_v7 = vunpack.i.l.bf16 %v5144_v29  ;;  %v1876_v33 = vsel %vm1869_vm10, %v1843_v34, %v5135_v40  ;;  %v1877_v36 = vsel %vm1869_vm10, %v1844_v0, %v5136_v54  ;;  %v9644_v54 = vld [vmem:[#allocation67_spill] sm:$0xff]  ;;  %v9645_v29 = vld [vmem:[#allocation54_spill] sm:$0xff] }
 0x167   : > { %v5151_v6 = vunpack.i.h.bf16 %v5149_v16  ;;  %v5150_v26 = vunpack.i.l.bf16 %v5149_v16  ;;  %v7577_v15 = vsel %vm1737_vm6, %v7288_v45, %v4881_v53  ;;  %v1748_v1 = vsel %vm1737_vm6, %v7292_v9, %v4875_v25 }
 0x168   : > { %v5159_v56 = vpop.permute.xlu0 %5158  ;;  %v1909_v4 = vsel %vm1902_vm11, %v1876_v33, %v5145_v7  ;;  %v1910_v60 = vsel %vm1902_vm11, %v1877_v36, %v5146_v30  ;;  %v1749_v38 = vsel %vm1737_vm6, %v7280_v44, %v4876_v24  ;;  %v1779_v63 = vsel %vm1770_vm7, %v7510_v3, %v4950_v22 }
 0x169   : > { %v5154_v35 = vpop.permute.xlu1 %5153  ;;  %v5161_v49 = vunpack.i.h.bf16 %v5159_v56  ;;  %v5160_v27 = vunpack.i.l.bf16 %v5159_v56  ;;  %v1938_v11 = vpack.c.bf16 %v1910_v60, %v1909_v4  ;;  %v1780_v5 = vsel %vm1770_vm7, %v7516_v55, %v4951_v17  ;;  %v9647_v4 = vld [vmem:[#allocation66_spill] sm:$0xff] }
 0x16a   : > { %v4956_v40 = vunpack.i.h.bf16 %v9644_v54  ;;  %v4955_v45 = vunpack.i.l.bf16 %v9644_v54  ;;  %v1812_v53 = vsel %vm1803_vm8, %v1779_v63, %v5030_v28  ;;  %v1813_v16 = vsel %vm1803_vm8, %v1780_v5, %v5031_v43  ;;  %v9646_v28 = vld [vmem:[#allocation55_spill] sm:$0xff] }
 0x16b   : > { %4453 = vmatmul.mubr.msk.bf16.gmra.mrb[4].mxu0 %vm1978_vm12, %v1938_v11  ;;  %v1845_v61 = vsel %vm1836_vm9, %v1812_v53, %v5150_v26  ;;  %v1846_v44 = vsel %vm1836_vm9, %v1813_v16, %v5151_v6  ;;  %v5036_v25 = vunpack.i.h.bf16 %v7332_v51  ;;  %v5035_v55 = vunpack.i.l.bf16 %v7332_v51 }
 0x16c   : > { %v5169_v9 = vpop.permute.xlu0 %5168  ;;  %v1878_v10 = vsel %vm1869_vm10, %v1845_v61, %v5160_v27  ;;  %v1879_v41 = vsel %vm1869_vm10, %v1846_v44, %v5161_v49  ;;  %v5156_v17 = vunpack.i.h.bf16 %v5154_v35  ;;  %v5155_v22 = vunpack.i.l.bf16 %v5154_v35 }
 0x16d   : > { %v5171_v24 = vunpack.i.h.bf16 %v5169_v9  ;;  %v5170_v3 = vunpack.i.l.bf16 %v5169_v9  ;;  %v5164_v31 = vpop.permute.xlu1 %5163  ;;  %v4891_v34 = vunpack.i.h.bf16 %v9645_v29  ;;  %v4885_v33 = vunpack.i.l.bf16 %v9646_v28 }
 0x16e   : > { %v5166_v0 = vunpack.i.h.bf16 %v5164_v31  ;;  %v5165_v30 = vunpack.i.l.bf16 %v5164_v31  ;;  %v4890_v51 = vunpack.i.l.bf16 %v9645_v29  ;;  %v1781_v36 = vsel %vm1770_vm7, %v1748_v1, %v4955_v45 }
 0x16f   : > { %v1911_v18 = vsel %vm1902_vm11, %v1878_v10, %v5170_v3  ;;  %v1912_v57 = vsel %vm1902_vm11, %v1879_v41, %v5171_v24  ;;  %v1782_v56 = vsel %vm1770_vm7, %v1749_v38, %v4956_v40  ;;  %v4961_v60 = vunpack.i.h.bf16 %v9647_v4 }
 0x170   : > { %v5179_v7 = vpop.permute.xlu0 %5178  ;;  %v1939_v43 = vpack.c.bf16 %v1912_v57, %v1911_v18  ;;  %v4960_v6 = vunpack.i.l.bf16 %v9647_v4  ;;  %v1814_v26 = vsel %vm1803_vm8, %v1781_v36, %v5035_v55  ;;  %v1815_v35 = vsel %vm1803_vm8, %v1782_v56, %v5036_v25 }
 0x171   : > { %v5174_v49 = vpop.permute.xlu1 %5173  ;;  %v1847_v27 = vsel %vm1836_vm9, %v1814_v26, %v5155_v22  ;;  %v1848_v11 = vsel %vm1836_vm9, %v1815_v35, %v5156_v17  ;;  %v5041_v1 = vunpack.i.h.bf16 %v7322_v39  ;;  %v5040_v38 = vunpack.i.l.bf16 %v7322_v39  ;;  %v9648_v17 = vld [vmem:[#allocation69_spill] sm:$0xff] }
 0x172   : > { %4456 = vmatprep.mubr.msk.bf16.mxu0 %vm1978_vm12, %v1939_v43  ;;  %v5176_v63 = vunpack.i.h.bf16 %v5174_v49  ;;  %v5175_v5 = vunpack.i.l.bf16 %v5174_v49  ;;  %v1880_v54 = vsel %vm1869_vm10, %v1847_v27, %v5165_v30  ;;  %v1881_v40 = vsel %vm1869_vm10, %v1848_v11, %v5166_v0  ;;  %v9649_v27 = vld [vmem:[#allocation57_spill] sm:$0xff] }
 0x173   : > { %v5181_v9 = vunpack.i.h.bf16 %v5179_v7  ;;  %v5180_v61 = vunpack.i.l.bf16 %v5179_v7  ;;  %v4886_v44 = vunpack.i.h.bf16 %v9646_v28  ;;  %v1752_v39 = vsel %vm1737_vm6, %v7316_v32, %v4885_v33 }
 0x174   : > { %v5189_v45 = vpop.permute.xlu0 %5188  ;;  %v1913_v53 = vsel %vm1902_vm11, %v1880_v54, %v5175_v5  ;;  %v1914_v16 = vsel %vm1902_vm11, %v1881_v40, %v5176_v63  ;;  %v1754_v10 = vsel %vm1737_vm6, %v7296_v62, %v4890_v51  ;;  %v1783_v41 = vsel %vm1770_vm7, %v7558_v19, %v4960_v6 }
 0x175   : > { %v5184_v24 = vpop.permute.xlu1 %5183  ;;  %v5191_v3 = vunpack.i.h.bf16 %v5189_v45  ;;  %v5190_v25 = vunpack.i.l.bf16 %v5189_v45  ;;  %v1940_v55 = vpack.c.bf16 %v1914_v16, %v1913_v53  ;;  %v1784_v31 = vsel %vm1770_vm7, %v7577_v15, %v4961_v60 }
 0x176   : > { %v4966_v22 = vunpack.i.h.bf16 %v9648_v17  ;;  %v4965_v18 = vunpack.i.l.bf16 %v9648_v17  ;;  %v1816_v57 = vsel %vm1803_vm8, %v1783_v41, %v5040_v38  ;;  %v1817_v29 = vsel %vm1803_vm8, %v1784_v31, %v5041_v1  ;;  %v9650_v1 = vld [vmem:[#allocation68_spill] sm:$0xff] }
 0x177   : > { %4457 = vmatmul.mubr.msk.bf16.gmra.mrb[8].mxu0 %vm1978_vm12, %v1940_v55  ;;  %v1849_v0 = vsel %vm1836_vm9, %v1816_v57, %v5180_v61  ;;  %v1850_v62 = vsel %vm1836_vm9, %v1817_v29, %v5181_v9  ;;  %v5046_v7 = vunpack.i.h.bf16 %v7382_v58  ;;  %v5045_v15 = vunpack.i.l.bf16 %v7382_v58  ;;  %v9651_v31 = vld [vmem:[#allocation56_spill] sm:$0xff] }
 0x178   : > { %v5199_v32 = vpop.permute.xlu0 %5198  ;;  %v1882_v43 = vsel %vm1869_vm10, %v1849_v0, %v5190_v25  ;;  %v1883_v28 = vsel %vm1869_vm10, %v1850_v62, %v5191_v3  ;;  %v5186_v51 = vunpack.i.h.bf16 %v5184_v24  ;;  %v5185_v36 = vunpack.i.l.bf16 %v5184_v24 }
 0x179   : > { %v5201_v30 = vunpack.i.h.bf16 %v5199_v32  ;;  %v5200_v19 = vunpack.i.l.bf16 %v5199_v32  ;;  %v5194_v33 = vpop.permute.xlu1 %5193  ;;  %v1753_v60 = vsel %vm1737_vm6, %v7312_v52, %v4886_v44  ;;  %v1755_v58 = vsel %vm1737_vm6, %v7300_v46, %v4891_v34 }
 0x17a   : > { %v5196_v6 = vunpack.i.h.bf16 %v5194_v33  ;;  %v5195_v26 = vunpack.i.l.bf16 %v5194_v33  ;;  %v4895_v11 = vunpack.i.l.bf16 %v9649_v27  ;;  %v1785_v63 = vsel %vm1770_vm7, %v1752_v39, %v4965_v18 }
 0x17b   : > { %v1915_v56 = vsel %vm1902_vm11, %v1882_v43, %v5200_v19  ;;  %v1916_v4 = vsel %vm1902_vm11, %v1883_v28, %v5201_v30  ;;  %v1786_v5 = vsel %vm1770_vm7, %v1753_v60, %v4966_v22  ;;  %v4971_v38 = vunpack.i.h.bf16 %v9650_v1  ;;  %v9652_v30 = vld [vmem:[#allocation71_spill] sm:$0xff] }
 0x17c   : > { %v5209_v35 = vpop.permute.xlu0 %5208  ;;  %v1941_v49 = vpack.c.bf16 %v1916_v4, %v1915_v56  ;;  %v4970_v54 = vunpack.i.l.bf16 %v9650_v1  ;;  %v1818_v40 = vsel %vm1803_vm8, %v1785_v63, %v5045_v15  ;;  %v1819_v52 = vsel %vm1803_vm8, %v1786_v5, %v5046_v7 }
 0x17d   : > { %v5204_v45 = vpop.permute.xlu1 %5203  ;;  %v1851_v53 = vsel %vm1836_vm9, %v1818_v40, %v5185_v36  ;;  %v1852_v46 = vsel %vm1836_vm9, %v1819_v52, %v5186_v51  ;;  %v5051_v9 = vunpack.i.h.bf16 %v7360_v21  ;;  %v5050_v61 = vunpack.i.l.bf16 %v7360_v21 }
 0x17e   : > { %4460 = vmatprep.mubr.msk.bf16.mxu0 %vm1978_vm12, %v1941_v49  ;;  %v5206_v34 = vunpack.i.h.bf16 %v5204_v45  ;;  %v5205_v16 = vunpack.i.l.bf16 %v5204_v45  ;;  %v1884_v44 = vsel %vm1869_vm10, %v1851_v53, %v5195_v26  ;;  %v1885_v24 = vsel %vm1869_vm10, %v1852_v46, %v5196_v6  ;;  %v9654_v45 = vld [vmem:[#allocation70_spill] sm:$0xff] }
 0x17f   : > { %v5211_v39 = vunpack.i.h.bf16 %v5209_v35  ;;  %v5210_v41 = vunpack.i.l.bf16 %v5209_v35  ;;  %v4900_v17 = vunpack.i.l.bf16 %v9651_v31  ;;  %v4896_v32 = vunpack.i.h.bf16 %v9649_v27 }
 0x180   : > { %v5219_v3 = vpop.permute.xlu0 %5218  ;;  %v1917_v25 = vsel %vm1902_vm11, %v1884_v44, %v5205_v16  ;;  %v1918_v55 = vsel %vm1902_vm11, %v1885_v24, %v5206_v34  ;;  %v1756_v21 = vsel %vm1737_vm6, %v7342_v2, %v4895_v11  ;;  %v1787_v0 = vsel %vm1770_vm7, %v1754_v10, %v4970_v54 }
 0x181   : > { %v5214_v22 = vpop.permute.xlu1 %5213  ;;  %v5221_v18 = vunpack.i.h.bf16 %v5219_v3  ;;  %v5220_v57 = vunpack.i.l.bf16 %v5219_v3  ;;  %v1942_v29 = vpack.c.bf16 %v1918_v55, %v1917_v25  ;;  %v1788_v62 = vsel %vm1770_vm7, %v1755_v58, %v4971_v38  ;;  %v9653_v38 = vld [vmem:[#allocation19_spill] sm:$0xff] }
 0x182   : > { %v4976_v19 = vunpack.i.h.bf16 %v9652_v30  ;;  %v4975_v7 = vunpack.i.l.bf16 %v9652_v30  ;;  %v1820_v15 = vsel %vm1803_vm8, %v1787_v0, %v5050_v61  ;;  %v1821_v43 = vsel %vm1803_vm8, %v1788_v62, %v5051_v9  ;;  %v9655_v3 = vld [vmem:[#allocation7_spill] sm:$0xff] }
 0x183   : > { %4461 = vmatmul.mubr.msk.bf16.gmra.mrb[12].mxu0 %vm1978_vm12, %v1942_v29  ;;  %v1853_v33 = vsel %vm1836_vm9, %v1820_v15, %v5210_v41  ;;  %v1854_v51 = vsel %vm1836_vm9, %v1821_v43, %v5211_v39  ;;  %v5056_v10 = vunpack.i.h.bf16 %v7408_v8  ;;  %v5055_v56 = vunpack.i.l.bf16 %v7408_v8  ;;  %v9656_v29 = vld [vmem:[#allocation9_spill] sm:$0xff] }
 0x184   : > { %v5229_v28 = vpop.permute.xlu0 %5228  ;;  %v1886_v4 = vsel %vm1869_vm10, %v1853_v33, %v5220_v57  ;;  %v1887_v60 = vsel %vm1869_vm10, %v1854_v51, %v5221_v18  ;;  %v5216_v26 = vunpack.i.h.bf16 %v5214_v22  ;;  %v5215_v35 = vunpack.i.l.bf16 %v5214_v22 }
 0x185   : > { %v5231_v2 = vunpack.i.h.bf16 %v5229_v28  ;;  %v5230_v36 = vunpack.i.l.bf16 %v5229_v28  ;;  %v5224_v6 = vpop.permute.xlu1 %5223  ;;  %v1757_v27 = vsel %vm1737_vm6, %v7338_v23, %v4896_v32  ;;  %v4901_v8 = vunpack.i.h.bf16 %v9651_v31 }
 0x186   : > { %v5226_v11 = vunpack.i.h.bf16 %v5224_v6  ;;  %v5225_v63 = vunpack.i.l.bf16 %v5224_v6  ;;  %v1758_v54 = vsel %vm1737_vm6, %v9653_v38, %v4900_v17  ;;  %v1789_v40 = vsel %vm1770_vm7, %v1756_v21, %v4975_v7 }
 0x187   : > { %v1919_v49 = vsel %vm1902_vm11, %v1886_v4, %v5230_v36  ;;  %v1920_v58 = vsel %vm1902_vm11, %v1887_v60, %v5231_v2  ;;  %v1790_v52 = vsel %vm1770_vm7, %v1757_v27, %v4976_v19  ;;  %v4981_v53 = vunpack.i.h.bf16 %v9654_v45 }
 0x188   : > { %v5239_v5 = vpop.permute.xlu0 %5238  ;;  %v1943_v1 = vpack.c.bf16 %v1920_v58, %v1919_v49  ;;  %v4980_v46 = vunpack.i.l.bf16 %v9654_v45  ;;  %v1822_v34 = vsel %vm1803_vm8, %v1789_v40, %v5055_v56  ;;  %v1823_v23 = vsel %vm1803_vm8, %v1790_v52, %v5056_v10 }
 0x189   : > { %v5234_v16 = vpop.permute.xlu1 %5233  ;;  %v1855_v9 = vsel %vm1836_vm9, %v1822_v34, %v5215_v35  ;;  %v1856_v61 = vsel %vm1836_vm9, %v1823_v23, %v5216_v26  ;;  %v5061_v25 = vunpack.i.h.bf16 %v9655_v3  ;;  %v5060_v55 = vunpack.i.l.bf16 %v9655_v3 }
 0x18a   : > { %4464 = vmatprep.mubr.msk.bf16.mxu0 %vm1978_vm12, %v1943_v1  ;;  %v5236_v44 = vunpack.i.h.bf16 %v5234_v16  ;;  %v5235_v24 = vunpack.i.l.bf16 %v5234_v16  ;;  %v1888_v39 = vsel %vm1869_vm10, %v1855_v9, %v5225_v63  ;;  %v1889_v41 = vsel %vm1869_vm10, %v1856_v61, %v5226_v11 }
 0x18b   : > { %v5241_v18 = vunpack.i.h.bf16 %v5239_v5  ;;  %v5240_v57 = vunpack.i.l.bf16 %v5239_v5  ;;  %v1759_v32 = vsel %vm1737_vm6, %v9656_v29, %v4901_v8  ;;  %v1791_v19 = vsel %vm1770_vm7, %v1758_v54, %v4980_v46 }
 0x18c   : > { %v5249_v31 = vpop.permute.xlu0 %5248  ;;  %v1921_v17 = vsel %vm1902_vm11, %v1888_v39, %v5235_v24  ;;  %v1922_v22 = vsel %vm1902_vm11, %v1889_v41, %v5236_v44  ;;  %v1792_v7 = vsel %vm1770_vm7, %v1759_v32, %v4981_v53  ;;  %v1824_v15 = vsel %vm1803_vm8, %v1791_v19, %v5060_v55 }
 0x18d   : > { %v5244_v21 = vpop.permute.xlu1 %5243  ;;  %v5251_v0 = vunpack.i.h.bf16 %v5249_v31  ;;  %v5250_v62 = vunpack.i.l.bf16 %v5249_v31  ;;  %v1944_v30 = vpack.c.bf16 %v1922_v22, %v1921_v17  ;;  %v1825_v43 = vsel %vm1803_vm8, %v1792_v7, %v5061_v25 }
 0x18e   : > { %v1857_v33 = vsel %vm1836_vm9, %v1824_v15, %v5240_v57  ;;  %v1858_v51 = vsel %vm1836_vm9, %v1825_v43, %v5241_v18  ;;  %v5246_v60 = vunpack.i.h.bf16 %v5244_v21  ;;  %v5245_v6 = vunpack.i.l.bf16 %v5244_v21 }
 0x18f   : > { %4465 = vmatmul.mubr.msk.bf16.gmra.mrb[16].mxu0 %vm1978_vm12, %v1944_v30  ;;  %v1890_v10 = vsel %vm1869_vm10, %v1857_v33, %v5250_v62  ;;  %v1891_v56 = vsel %vm1869_vm10, %v1858_v51, %v5251_v0 }
 0x190   : > { %v5259_v28 = vpop.permute.xlu0 %5258  ;;  %v1859_v5 = vsel %vm1836_vm9, %v7435_v48, %v5245_v6  ;;  %v1860_v1 = vsel %vm1836_vm9, %v7438_v42, %v5246_v60 }
 0x191   : > { %v5261_v2 = vunpack.i.h.bf16 %v5259_v28  ;;  %v5260_v36 = vunpack.i.l.bf16 %v5259_v28  ;;  %v5254_v4 = vpop.permute.xlu1 %5253 }
 0x192   : > { %v5256_v49 = vunpack.i.h.bf16 %v5254_v4  ;;  %v5255_v58 = vunpack.i.l.bf16 %v5254_v4 }
 0x193   : > { %v1923_v26 = vsel %vm1902_vm11, %v1890_v10, %v5260_v36  ;;  %v1924_v35 = vsel %vm1902_vm11, %v1891_v56, %v5261_v2 }
 0x194   : > { %v5269_v27 = vpop.permute.xlu0 %5268  ;;  %v1945_v11 = vpack.c.bf16 %v1924_v35, %v1923_v26  ;;  %v1892_v54 = vsel %vm1869_vm10, %v1859_v5, %v5255_v58  ;;  %v1893_v40 = vsel %vm1869_vm10, %v1860_v1, %v5256_v49 }
 0x195   : > { %v5264_v63 = vpop.permute.xlu1 %5263  ;;  %v5271_v46 = vunpack.i.h.bf16 %v5269_v27  ;;  %v5270_v34 = vunpack.i.l.bf16 %v5269_v27 }
 0x196   : > { %4468 = vmatprep.mubr.msk.bf16.mxu0 %vm1978_vm12, %v1945_v11  ;;  %v5266_v8 = vunpack.i.h.bf16 %v5264_v63  ;;  %v5265_v38 = vunpack.i.l.bf16 %v5264_v63 }
 0x197   : > { %v1861_v61 = vsel %vm1836_vm9, %v7425_v37, %v5270_v34  ;;  %v1862_v44 = vsel %vm1836_vm9, %v7428_v20, %v5271_v46  ;;  %v9657_v34 = vld [vmem:[#allocation40_spill] sm:$0xff] }
 0x198   : > { %v5279_v52 = vpop.permute.xlu0 %5278  ;;  %v1925_v45 = vsel %vm1902_vm11, %v1892_v54, %v5265_v38  ;;  %v1926_v53 = vsel %vm1902_vm11, %v1893_v40, %v5266_v8  ;;  %5333 = vrot.lane.b32.xlu0 %v9657_v34, %s6017_s30 }
 0x199   : > { %v5274_v23 = vpop.permute.xlu1 %5273  ;;  %v5281_v16 = vunpack.i.h.bf16 %v5279_v52  ;;  %v5280_v9 = vunpack.i.l.bf16 %v5279_v52  ;;  %v1946_v48 = vpack.c.bf16 %v1926_v53, %v1925_v45 }
 0x19a   : > { %v5276_v41 = vunpack.i.h.bf16 %v5274_v23  ;;  %v5275_v31 = vunpack.i.l.bf16 %v5274_v23  ;;  %v7769_v23 = vld [vmem:[%s9305_s4] ss:$0 sm:$0xff] }
 0x19b   : > { %4469 = vmatmul.mubr.msk.bf16.gmra.mrb[20].mxu0 %vm1978_vm12, %v1946_v48  ;;  %v1894_v25 = vsel %vm1869_vm10, %v1861_v61, %v5280_v9  ;;  %v1895_v55 = vsel %vm1869_vm10, %v1862_v44, %v5281_v16  ;;  %v7774_v9 = vld [vmem:[%s9306_s5] ss:$0 sm:$0xff] }
 0x19c   : > { %v5289_v42 = vpop.permute.xlu0 %5288  ;;  %v1863_v20 = vsel %vm1836_vm9, %v7463_v47, %v5275_v31  ;;  %v1864_v21 = vsel %vm1836_vm9, %v7466_v12, %v5276_v41  ;;  %v7780_v61 = vld [vmem:[%s9307_s6] ss:$0 sm:$0xff] }
 0x19d   : > { %v5291_v24 = vunpack.i.h.bf16 %v5289_v42  ;;  %v5290_v3 = vunpack.i.l.bf16 %v5289_v42  ;;  %v5284_v39 = vpop.permute.xlu1 %5283 }
 0x19e   : > { %v5286_v18 = vunpack.i.h.bf16 %v5284_v39  ;;  %v5285_v57 = vunpack.i.l.bf16 %v5284_v39 }
 0x19f   : > { %v1927_v17 = vsel %vm1902_vm11, %v1894_v25, %v5290_v3  ;;  %v1928_v22 = vsel %vm1902_vm11, %v1895_v55, %v5291_v24 }
 0x1a0   : > { %v5299_v29 = vpop.permute.xlu0 %5298  ;;  %v1947_v37 = vpack.c.bf16 %v1928_v22, %v1927_v17  ;;  %v1896_v30 = vsel %vm1869_vm10, %v1863_v20, %v5285_v57  ;;  %v1897_v19 = vsel %vm1869_vm10, %v1864_v21, %v5286_v18 }
 0x1a1   : > { %v5294_v32 = vpop.permute.xlu1 %5293  ;;  %v5301_v28 = vunpack.i.h.bf16 %v5299_v29  ;;  %v5300_v33 = vunpack.i.l.bf16 %v5299_v29 }
 0x1a2   : > { %4472 = vmatprep.mubr.msk.bf16.mxu0 %vm1978_vm12, %v1947_v37  ;;  %v5296_v0 = vunpack.i.h.bf16 %v5294_v32  ;;  %v5295_v62 = vunpack.i.l.bf16 %v5294_v32 }
 0x1a3   : > { %v1865_v10 = vsel %vm1836_vm9, %v7445_v59, %v5300_v33  ;;  %v1866_v56 = vsel %vm1836_vm9, %v7448_v14, %v5301_v28 }
 0x1a4   : > { %v5309_v7 = vpop.permute.xlu0 %5308  ;;  %v1929_v15 = vsel %vm1902_vm11, %v1896_v30, %v5295_v62  ;;  %v1930_v43 = vsel %vm1902_vm11, %v1897_v19, %v5296_v0 }
 0x1a5   : > { %v5304_v51 = vpop.permute.xlu1 %5303  ;;  %v5311_v2 = vunpack.i.h.bf16 %v5309_v7  ;;  %v5310_v36 = vunpack.i.l.bf16 %v5309_v7  ;;  %v1948_v47 = vpack.c.bf16 %v1930_v43, %v1929_v15 }
 0x1a6   : > { %v5306_v49 = vunpack.i.h.bf16 %v5304_v51  ;;  %v5305_v58 = vunpack.i.l.bf16 %v5304_v51 }
 0x1a7   : > { %4473 = vmatmul.mubr.msk.bf16.gmra.mrb[24].mxu0 %vm1978_vm12, %v1948_v47  ;;  %v1898_v6 = vsel %vm1869_vm10, %v1865_v10, %v5310_v36  ;;  %v1899_v26 = vsel %vm1869_vm10, %v1866_v56, %v5311_v2 }
 0x1a8   : > { %v5319_v12 = vpop.permute.xlu0 %5318  ;;  %v1867_v14 = vsel %vm1836_vm9, %v7483_v13, %v5305_v58  ;;  %v1868_v8 = vsel %vm1836_vm9, %v7486_v50, %v5306_v49  ;;  %v9658_v13 = vld [vmem:[#allocation45_spill] sm:$0xff]  ;;  %v9659_v50 = vld [vmem:[#allocation6_spill] sm:$0xff] }
 0x1a9   : > { %v5321_v4 = vunpack.i.h.bf16 %v5319_v12  ;;  %v5320_v60 = vunpack.i.l.bf16 %v5319_v12  ;;  %v5314_v35 = vpop.permute.xlu1 %5313  ;;  %5338 = vrot.lane.b32.xlu0 %v9658_v13, %s6022_s25 }
 0x1aa   : > { %v5316_v63 = vunpack.i.h.bf16 %v5314_v35  ;;  %v5315_v5 = vunpack.i.l.bf16 %v5314_v35 }
 0x1ab   : > { %v1931_v27 = vsel %vm1902_vm11, %v1898_v6, %v5320_v60  ;;  %v1932_v11 = vsel %vm1902_vm11, %v1899_v26, %v5321_v4 }
 0x1ac   : > { %v1949_v1 = vpack.c.bf16 %v1932_v11, %v1931_v27  ;;  %v1900_v40 = vsel %vm1869_vm10, %v1867_v14, %v5315_v5  ;;  %v1901_v52 = vsel %vm1869_vm10, %v1868_v8, %v5316_v63 }
 0x1ad   : > { %v5324_v59 = vpop.permute.xlu1 %5323  ;;  %5343 = vrot.lane.b32.xlu0 %v9659_v50, %s6023_s27 }
 0x1ae   : > { %4476 = vmatprep.mubr.msk.bf16.mxu0 %vm1978_vm12, %v1949_v1  ;;  %v5326_v38 = vunpack.i.h.bf16 %v5324_v59  ;;  %v5325_v54 = vunpack.i.l.bf16 %v5324_v59 }
 0x1b0   : > { %v1933_v45 = vsel %vm1902_vm11, %v1900_v40, %v5325_v54  ;;  %v1934_v53 = vsel %vm1902_vm11, %v1901_v52, %v5326_v38 }
 0x1b1   : > { %v1950_v46 = vpack.c.bf16 %v1934_v53, %v1933_v45  ;;  %5348 = vrot.lane.b32.xlu0 %v9657_v34, %s6024_s29 }
 0x1b3   : > { %4477 = vmatmul.mubr.msk.bf16.gmra.mrb[28].mxu0 %vm1978_vm12, %v1950_v46 }
 0x232   : > { %v4450_v16 = vpop.f32.mrb[0].mxu0 }
 0x233   : > { %v2074_v48 = vadd.f32 %v4450_v16, %v7769_v23  ;;  %v2065_v42 = vpop.f32.mrb[1].mxu0 }
 0x234   : > { %v2066_v44 = vadd.f32 %v7769_v23, %v2065_v42  ;;  %v4451_v24 = vpop.f32.mrb[2].mxu0 }
 0x235   : > { %v2201_v3 = vmul.f32 %v7774_v9, %v2074_v48  ;;  %v2077_v25 = vadd.f32 %v4451_v24, %v7769_v23  ;;  %v2068_v55 = vpop.f32.mrb[3].mxu0 }
 0x236   : > { %v2199_v39 = vmul.f32 %v7774_v9, %v2066_v44  ;;  %v2069_v41 = vadd.f32 %v7769_v23, %v2068_v55 }
 0x237   : > { %v2240_v31 = vadd.f32 %v7780_v61, %v2201_v3  ;;  %v2202_v17 = vmul.f32 %v7774_v9, %v2077_v25 }
 0x238   : > { %v2238_v22 = vadd.f32 %v7780_v61, %v2199_v39  ;;  %v2200_v18 = vmul.f32 %v7774_v9, %v2069_v41 }
 0x239   : > { %v2272_v57 = vmax.f32 %v2240_v31, 0.0  ;;  %v2241_v29 = vadd.f32 %v7780_v61, %v2202_v17 }
 0x23a   : > { %v2270_v37 = vmax.f32 %v2238_v22, 0.0  ;;  %v2239_v32 = vadd.f32 %v7780_v61, %v2200_v18 }
 0x23b   : > { %v2337_v20 = vrot.slane %v2272_v57, 7  ;;  %v2273_v21 = vmax.f32 %v2241_v29, 0.0 }
 0x23c   : > { %v2334_v0 = vrot.slane %v2270_v37, 7  ;;  %v2271_v62 = vmax.f32 %v2239_v32, 0.0 }
 0x23d   : > { %v7794_v30 = vsel %vm563_vm0, 0.0, %v2337_v20  ;;  %v2338_v19 = vrot.slane %v2273_v21, 7 }
 0x23e   : > { %9660 = vst [vmem:[#allocation21_spill] sm:$0xff] %v7794_v30  ;;  %v7797_v7 = vsel %vm563_vm0, 0.0, %v2334_v0  ;;  %v2335_v15 = vrot.slane %v2271_v62, 7  ;;  %v4454_v43 = vpop.f32.mrb[4].mxu0  ;;  %v2496_v28 = vrot.slane %v7794_v30, 1  ;;  %v2571_v33 = vrot.slane %v7794_v30, 2 }
 0x23f   : > { %9661 = vst [vmem:[#allocation14_spill] sm:$0xff] %v7797_v7  ;;  %v7802_v51 = vsel %vm563_vm0, %v2337_v20, %v2338_v19  ;;  %v2446_v2 = vsel %vm563_vm0, %v2338_v19, 0.0  ;;  %v2081_v36 = vpop.f32.mrb[5].mxu0  ;;  %v2491_v47 = vrot.slane %v7797_v7, 1  ;;  %v2090_v26 = vadd.f32 %v4454_v43, %v7769_v23 }
 0x240   : > { %9662 = vst [vmem:[#allocation48_spill] sm:$0xff] %v7802_v51  ;;  %v2499_v12 = vrot.slane %v2446_v2, 1  ;;  %v7807_v10 = vsel %vm563_vm0, %v2334_v0, %v2335_v15  ;;  %v7810_v56 = vsel %vm563_vm0, %v2335_v15, 0.0  ;;  %v4455_v4 = vpop.f32.mrb[6].mxu0  ;;  %v2574_v60 = vrot.slane %v2446_v2, 2 }
 0x241   : > { %9663 = vst [vmem:[#allocation11_spill] sm:$0xff] %v7807_v10  ;;  %v2494_v6 = vrot.slane %v7810_v56, 1  ;;  %v2082_v35 = vadd.f32 %v7769_v23, %v2081_v36  ;;  %v2084_v49 = vpop.f32.mrb[7].mxu0  ;;  %v2093_v58 = vadd.f32 %v4455_v4, %v7769_v23  ;;  %v5352_v11 = vpack.i.bf16 %v7802_v51, %v7794_v30 }
 0x242   : > { %v2085_v27 = vadd.f32 %v7769_v23, %v2084_v49  ;;  %v5362_v63 = vpack.i.bf16 %v7807_v10, %v7797_v7  ;;  %v2205_v5 = vmul.f32 %v7774_v9, %v2090_v26  ;;  %v2497_v59 = vrot.slane %v7802_v51, 1 }
 0x243   : > { %v2203_v1 = vmul.f32 %v7774_v9, %v2082_v35  ;;  %v2206_v14 = vmul.f32 %v7774_v9, %v2093_v58  ;;  %5353 = vrot.lane.b32.xlu1 %v5352_v11, %s6019_s19  ;;  %v2492_v38 = vrot.slane %v7807_v10, 1  ;;  %v2572_v54 = vrot.slane %v7802_v51, 2 }
 0x244   : > { %v2204_v8 = vmul.f32 %v7774_v9, %v2085_v27  ;;  %5363 = vrot.lane.b32.xlu0 %v5362_v63, %s6019_s19  ;;  %v2244_v40 = vadd.f32 %v7780_v61, %v2205_v5  ;;  %v2498_v45 = vsel %vm729_vm1, %v2496_v28, %v2497_v59  ;;  %v2500_v53 = vsel %vm729_vm1, %v2497_v59, %v2499_v12 }
 0x245   : > { %v2242_v52 = vadd.f32 %v7780_v61, %v2203_v1  ;;  %v2245_v46 = vadd.f32 %v7780_v61, %v2206_v14  ;;  %v7836_v13 = vpack.i.bf16 %v2500_v53, %v2498_v45  ;;  %v2493_v50 = vsel %vm729_vm1, %v2491_v47, %v2492_v38 }
 0x246   : > { %v2243_v34 = vadd.f32 %v7780_v61, %v2204_v8  ;;  %v2276_v16 = vmax.f32 %v2244_v40, 0.0  ;;  %v2495_v42 = vsel %vm729_vm1, %v2492_v38, %v2494_v6  ;;  %v2573_v44 = vsel %vm810_vm2, %v2571_v33, %v2572_v54 }
 0x247   : > { %v2274_v48 = vmax.f32 %v2242_v52, 0.0  ;;  %v2277_v24 = vmax.f32 %v2245_v46, 0.0  ;;  %5358 = vrot.lane.b32.xlu1 %v5352_v11, %s6022_s25  ;;  %v2575_v25 = vsel %vm810_vm2, %v2572_v54, %v2574_v60  ;;  %v5387_v41 = vpack.i.bf16 %v2495_v42, %v2493_v50 }
 0x248   : > { %v2275_v3 = vmax.f32 %v2243_v34, 0.0  ;;  %5368 = vrot.lane.b32.xlu0 %v7836_v13, %s6015_s28  ;;  %v2343_v55 = vrot.slane %v2276_v16, 7  ;;  %v7845_v18 = vpack.i.bf16 %v2575_v25, %v2573_v44  ;;  %v2567_v57 = vrot.slane %v7807_v10, 2 }
 0x249   : > { %v2340_v39 = vrot.slane %v2274_v48, 7  ;;  %v2344_v31 = vrot.slane %v2277_v24, 7  ;;  %v2566_v20 = vrot.slane %v7797_v7, 2  ;;  %v2569_v21 = vrot.slane %v7810_v56, 2 }
 0x24a   : > { %v2341_v17 = vrot.slane %v2275_v3, 7  ;;  %v4458_v22 = vpop.f32.mrb[8].mxu0  ;;  %v7849_v29 = vsel %vm563_vm0, 0.0, %v2343_v55 }
 0x24b   : > { %9664 = vst [vmem:[#allocation18_spill] sm:$0xff] %v7849_v29  ;;  %v2106_v37 = vadd.f32 %v4458_v22, %v7769_v23  ;;  %v2097_v32 = vpop.f32.mrb[9].mxu0  ;;  %5388 = vrot.lane.b32.xlu1 %v5387_v41, %s6015_s28  ;;  %v7858_v62 = vsel %vm563_vm0, 0.0, %v2340_v39  ;;  %v7861_v19 = vsel %vm563_vm0, %v2343_v55, %v2344_v31  ;;  %v2506_v33 = vrot.slane %v7849_v29, 1 }
 0x24c   : > { %5373 = vrot.lane.b32.xlu0 %v7845_v18, %s6017_s30  ;;  %v4459_v0 = vpop.f32.mrb[10].mxu0  ;;  %9665 = vst [vmem:[#allocation22_spill] sm:$0xff] %v7858_v62  ;;  %9666 = vst [vmem:[#allocation17_spill] sm:$0xff] %v7861_v19  ;;  %v7864_v15 = vsel %vm563_vm0, %v2340_v39, %v2341_v17  ;;  %v7867_v43 = vsel %vm563_vm0, %v2341_v17, 0.0  ;;  %v2581_v2 = vrot.slane %v7849_v29, 2  ;;  %v7872_v36 = vsel %vm563_vm0, %v2344_v31, 0.0 }
 0x24d   : > { %9667 = vst [vmem:[#allocation24_spill] sm:$0xff] %v7864_v15  ;;  %v2100_v28 = vpop.f32.mrb[11].mxu0  ;;  %v2568_v47 = vsel %vm810_vm2, %v2566_v20, %v2567_v57  ;;  %v2209_v12 = vmul.f32 %v7774_v9, %v2106_v37  ;;  %v2098_v56 = vadd.f32 %v7769_v23, %v2097_v32  ;;  %v2109_v4 = vadd.f32 %v4459_v0, %v7769_v23 }
 0x24e   : > { %v2101_v60 = vadd.f32 %v7769_v23, %v2100_v28  ;;  %v2501_v6 = vrot.slane %v7858_v62, 1  ;;  %v2504_v26 = vrot.slane %v7867_v43, 1  ;;  %v2570_v35 = vsel %vm810_vm2, %v2567_v57, %v2569_v21 }
 0x24f   : > { %v2502_v49 = vrot.slane %v7864_v15, 1  ;;  %v2248_v58 = vadd.f32 %v7780_v61, %v2209_v12  ;;  %v2207_v27 = vmul.f32 %v7774_v9, %v2098_v56  ;;  %v2210_v11 = vmul.f32 %v7774_v9, %v2109_v4 }
 0x250   : > { %5378 = vrot.lane.b32.xlu0 %v7836_v13, %s6021_s24  ;;  %v2208_v63 = vmul.f32 %v7774_v9, %v2101_v60  ;;  %v2576_v5 = vrot.slane %v7858_v62, 2  ;;  %v2509_v1 = vrot.slane %v7872_v36, 1  ;;  %v5392_v59 = vpack.i.bf16 %v2570_v35, %v2568_v47 }
 0x251   : > { %v2280_v14 = vmax.f32 %v2248_v58, 0.0  ;;  %v2246_v8 = vadd.f32 %v7780_v61, %v2207_v27  ;;  %v2249_v38 = vadd.f32 %v7780_v61, %v2210_v11  ;;  %v2584_v40 = vrot.slane %v7872_v36, 2 }
 0x252   : > { %v2247_v54 = vadd.f32 %v7780_v61, %v2208_v63  ;;  %5393 = vrot.lane.b32.xlu1 %v5392_v59, %s6017_s30  ;;  %v2503_v52 = vsel %vm729_vm1, %v2501_v6, %v2502_v49  ;;  %v2505_v45 = vsel %vm729_vm1, %v2502_v49, %v2504_v26  ;;  %v2507_v53 = vrot.slane %v7861_v19, 1 }
 0x253   : > { %v2349_v46 = vrot.slane %v2280_v14, 7  ;;  %v2278_v34 = vmax.f32 %v2246_v8, 0.0  ;;  %v2281_v50 = vmax.f32 %v2249_v38, 0.0  ;;  %v2579_v48 = vrot.slane %v7867_v43, 2 }
 0x254   : > { %5383 = vrot.lane.b32.xlu0 %v7845_v18, %s6025_s22  ;;  %v2279_v16 = vmax.f32 %v2247_v54, 0.0  ;;  %v7904_v44 = vpack.i.bf16 %v7864_v15, %v7858_v62  ;;  %v2577_v24 = vrot.slane %v7864_v15, 2  ;;  %v7915_v37 = vpack.i.bf16 %v2505_v45, %v2503_v52 }
 0x255   : > { %v7908_v3 = vsel %vm563_vm0, 0.0, %v2349_v46  ;;  %v2346_v25 = vrot.slane %v2278_v34, 7  ;;  %v2350_v55 = vrot.slane %v2281_v50, 7  ;;  %v2582_v32 = vrot.slane %v7861_v19, 2 }
 0x256   : > { %v4462_v42 = vpop.f32.mrb[12].mxu0  ;;  %v2347_v39 = vrot.slane %v2279_v16, 7  ;;  %5398 = vrot.lane.b32.xlu1 %v5387_v41, %s6021_s24  ;;  %v2508_v41 = vsel %vm729_vm1, %v2506_v33, %v2507_v53  ;;  %v2510_v43 = vsel %vm729_vm1, %v2507_v53, %v2509_v1  ;;  %v2516_v28 = vrot.slane %v7908_v3, 1 }
 0x257   : > { %v2113_v31 = vpop.f32.mrb[13].mxu0  ;;  %v2122_v17 = vadd.f32 %v4462_v42, %v7769_v23  ;;  %v7919_v20 = vsel %vm563_vm0, %v2349_v46, %v2350_v55  ;;  %v2591_v36 = vrot.slane %v7908_v3, 2  ;;  %v2578_v47 = vsel %vm810_vm2, %v2576_v5, %v2577_v24 }
 0x258   : > { %v2114_v22 = vadd.f32 %v7769_v23, %v2113_v31  ;;  %5408 = vrot.lane.b32.xlu0 %v7904_v44, %s6019_s19  ;;  %v4463_v57 = vpop.f32.mrb[14].mxu0  ;;  %v7922_v21 = vsel %vm563_vm0, %v2346_v25, %v2347_v39  ;;  %v2580_v12 = vsel %vm810_vm2, %v2577_v24, %v2579_v48  ;;  %v7931_v56 = vsel %vm563_vm0, %v2347_v39, 0.0 }
 0x259   : > { %9668 = vst [vmem:[#allocation25_spill] sm:$0xff] %v7922_v21  ;;  %v2116_v0 = vpop.f32.mrb[15].mxu0  ;;  %v2213_v4 = vmul.f32 %v7774_v9, %v2122_v17  ;;  %v2125_v6 = vadd.f32 %v4463_v57, %v7769_v23  ;;  %v7937_v33 = vsel %vm563_vm0, 0.0, %v2346_v25  ;;  %v7940_v26 = vsel %vm563_vm0, %v2350_v55, 0.0 }
 0x25a   : > { %v2211_v60 = vmul.f32 %v7774_v9, %v2114_v22  ;;  %9669 = vst [vmem:[#allocation28_spill] sm:$0xff] %v7937_v33  ;;  %5403 = vrot.lane.b32.xlu1 %v5392_v59, %s6025_s22  ;;  %v2117_v35 = vadd.f32 %v7769_v23, %v2116_v0  ;;  %v7944_v49 = vpack.i.bf16 %v2510_v43, %v2508_v41  ;;  %v2514_v58 = vrot.slane %v7931_v56, 1 }
 0x25b   : > { %v2252_v27 = vadd.f32 %v7780_v61, %v2213_v4  ;;  %v2214_v63 = vmul.f32 %v7774_v9, %v2125_v6  ;;  %v2583_v1 = vsel %vm810_vm2, %v2581_v2, %v2582_v32  ;;  %v2585_v59 = vsel %vm810_vm2, %v2582_v32, %v2584_v40 }
 0x25c   : > { %v2250_v11 = vadd.f32 %v7780_v61, %v2211_v60  ;;  %v2212_v5 = vmul.f32 %v7774_v9, %v2117_v35  ;;  %5413 = vrot.lane.b32.xlu0 %v7944_v49, %s6015_s28  ;;  %v2512_v14 = vrot.slane %v7922_v21, 1  ;;  %v2519_v8 = vrot.slane %v7940_v26, 1 }
 0x25d   : > { %v2284_v38 = vmax.f32 %v2252_v27, 0.0  ;;  %v2253_v52 = vadd.f32 %v7780_v61, %v2214_v63  ;;  %v2511_v45 = vrot.slane %v7937_v33, 1  ;;  %v7964_v46 = vpack.i.bf16 %v2585_v59, %v2583_v1 }
 0x25e   : > { %v2282_v54 = vmax.f32 %v2250_v11, 0.0  ;;  %v2251_v53 = vadd.f32 %v7780_v61, %v2212_v5  ;;  %5423 = vrot.lane.b32.xlu1 %v7915_v37, %s6015_s28  ;;  %v2517_v2 = vrot.slane %v7919_v20, 1  ;;  %v2586_v40 = vrot.slane %v7937_v33, 2 }
 0x25f   : > { %v2285_v50 = vmax.f32 %v2253_v52, 0.0  ;;  %v7968_v16 = vpack.i.bf16 %v2580_v12, %v2578_v47  ;;  %v2355_v48 = vrot.slane %v2284_v38, 7  ;;  %v2513_v25 = vsel %vm729_vm1, %v2511_v45, %v2512_v14 }
 0x260   : > { %v2352_v34 = vrot.slane %v2282_v54, 7  ;;  %v2283_v42 = vmax.f32 %v2251_v53, 0.0  ;;  %5418 = vrot.lane.b32.xlu0 %v7964_v46, %s6017_s30  ;;  %v2515_v55 = vsel %vm729_vm1, %v2512_v14, %v2514_v58  ;;  %v2518_v22 = vsel %vm729_vm1, %v2516_v28, %v2517_v2 }
 0x261   : > { %v2356_v39 = vrot.slane %v2285_v50, 7  ;;  %v2520_v57 = vsel %vm729_vm1, %v2517_v2, %v2519_v8  ;;  %v2594_v32 = vrot.slane %v7940_v26, 2  ;;  %v2589_v0 = vrot.slane %v7931_v56, 2 }
 0x262   : > { %v4466_v24 = vpop.f32.mrb[16].mxu0  ;;  %v7980_v41 = vsel %vm563_vm0, 0.0, %v2352_v34  ;;  %5428 = vrot.lane.b32.xlu1 %v7968_v16, %s6017_s30  ;;  %v2587_v47 = vrot.slane %v7922_v21, 2  ;;  %v2353_v4 = vrot.slane %v2283_v42, 7  ;;  %v7993_v56 = vsel %vm563_vm0, 0.0, %v2355_v48 }
 0x263   : > { %v2138_v31 = vadd.f32 %v4466_v24, %v7769_v23  ;;  %v2129_v17 = vpop.f32.mrb[17].mxu0  ;;  %v7986_v12 = vsel %vm563_vm0, %v2355_v48, %v2356_v39  ;;  %v7989_v28 = vsel %vm563_vm0, %v2356_v39, 0.0  ;;  %v7995_v26 = vpack.i.bf16 %v2515_v55, %v2513_v25 }
 0x264   : > { %v4467_v43 = vpop.f32.mrb[18].mxu0  ;;  %v2130_v35 = vadd.f32 %v7769_v23, %v2129_v17  ;;  %v7998_v58 = vpack.i.bf16 %v2520_v57, %v2518_v22  ;;  %v2521_v27 = vrot.slane %v7980_v41, 1  ;;  %v8002_v11 = vsel %vm563_vm0, %v2352_v34, %v2353_v4 }
 0x265   : > { %v2217_v60 = vmul.f32 %v7774_v9, %v2138_v31  ;;  %v2132_v6 = vpop.f32.mrb[19].mxu0  ;;  %v2141_v5 = vadd.f32 %v4467_v43, %v7769_v23  ;;  %v2529_v1 = vrot.slane %v7989_v28, 1  ;;  %v2451_v59 = vsel %vm563_vm0, %v2353_v4, 0.0 }
 0x266   : > { %5443 = vrot.lane.b32.xlu1 %v7995_v26, %s6015_s28  ;;  %v2215_v14 = vmul.f32 %v7774_v9, %v2130_v35  ;;  %5433 = vrot.lane.b32.xlu0 %v7998_v58, %s6015_s28  ;;  %v2133_v8 = vadd.f32 %v7769_v23, %v2132_v6  ;;  %v2588_v52 = vsel %vm810_vm2, %v2586_v40, %v2587_v47  ;;  %v2592_v50 = vrot.slane %v7919_v20, 2 }
 0x267   : > { %v2256_v63 = vadd.f32 %v7780_v61, %v2217_v60  ;;  %v2218_v54 = vmul.f32 %v7774_v9, %v2141_v5  ;;  %v2590_v45 = vsel %vm810_vm2, %v2587_v47, %v2589_v0  ;;  %v2524_v48 = vrot.slane %v2451_v59, 1 }
 0x268   : > { %v2254_v53 = vadd.f32 %v7780_v61, %v2215_v14  ;;  %v2216_v2 = vmul.f32 %v7774_v9, %v2133_v8  ;;  %v8019_v34 = vpack.i.bf16 %v2590_v45, %v2588_v52  ;;  %v2522_v24 = vrot.slane %v8002_v11, 1 }
 0x269   : > { %v2288_v38 = vmax.f32 %v2256_v63, 0.0  ;;  %v2257_v42 = vadd.f32 %v7780_v61, %v2218_v54  ;;  %v2527_v25 = vrot.slane %v7986_v12, 1  ;;  %v2593_v39 = vsel %vm810_vm2, %v2591_v36, %v2592_v50 }
 0x26a   : > { %v2286_v55 = vmax.f32 %v2254_v53, 0.0  ;;  %v2255_v40 = vadd.f32 %v7780_v61, %v2216_v2  ;;  %5448 = vrot.lane.b32.xlu1 %v8019_v34, %s6017_s30  ;;  %v2595_v31 = vsel %vm810_vm2, %v2592_v50, %v2594_v32  ;;  %v2526_v17 = vrot.slane %v7993_v56, 1 }
 0x26b   : > { %v2289_v22 = vmax.f32 %v2257_v42, 0.0  ;;  %v8033_v57 = vpack.i.bf16 %v2595_v31, %v2593_v39  ;;  %v2523_v0 = vsel %vm729_vm1, %v2521_v27, %v2522_v24  ;;  %v2361_v43 = vrot.slane %v2288_v38, 7 }
 0x26c   : > { %v2287_v47 = vmax.f32 %v2255_v40, 0.0  ;;  %v2525_v6 = vsel %vm729_vm1, %v2522_v24, %v2524_v48  ;;  %v2528_v36 = vsel %vm729_vm1, %v2526_v17, %v2527_v25  ;;  %v2530_v32 = vsel %vm729_vm1, %v2527_v25, %v2529_v1 }
 0x26d   : > { %v2362_v60 = vrot.slane %v2289_v22, 7  ;;  %5438 = vrot.lane.b32.xlu0 %v8033_v57, %s6017_s30  ;;  %v2358_v63 = vrot.slane %v2286_v55, 7  ;;  %v8041_v14 = vpack.i.bf16 %v2525_v6, %v2523_v0  ;;  %v2599_v27 = vrot.slane %v2451_v59, 2 }
 0x26e   : > { %v4470_v4 = vpop.f32.mrb[20].mxu0  ;;  %v2359_v5 = vrot.slane %v2287_v47, 7  ;;  %v8046_v54 = vpack.i.bf16 %v2530_v32, %v2528_v36  ;;  %v2601_v45 = vrot.slane %v7993_v56, 2  ;;  %v2604_v53 = vrot.slane %v7989_v28, 2 }
 0x26f   : > { %v2145_v35 = vpop.f32.mrb[21].mxu0  ;;  %v8044_v38 = vsel %vm563_vm0, %v2361_v43, %v2362_v60  ;;  %5463 = vrot.lane.b32.xlu1 %v8041_v14, %s6015_s28  ;;  %v2596_v1 = vrot.slane %v7980_v41, 2  ;;  %v8057_v59 = vsel %vm563_vm0, 0.0, %v2361_v43  ;;  %v2154_v50 = vadd.f32 %v4470_v4, %v7769_v23 }
 0x270   : > { %v4471_v8 = vpop.f32.mrb[22].mxu0  ;;  %v8051_v2 = vsel %vm563_vm0, %v2358_v63, %v2359_v5  ;;  %v2597_v48 = vrot.slane %v8002_v11, 2  ;;  %v2146_v28 = vadd.f32 %v7769_v23, %v2145_v35  ;;  %v2602_v42 = vrot.slane %v7986_v12, 2 }
 0x271   : > { %v2148_v52 = vpop.f32.mrb[23].mxu0  ;;  %5453 = vrot.lane.b32.xlu0 %v8046_v54, %s6015_s28  ;;  %v2157_v24 = vadd.f32 %v4471_v8, %v7769_v23  ;;  %v2454_v55 = vsel %vm563_vm0, %v2362_v60, 0.0  ;;  %v2221_v40 = vmul.f32 %v7774_v9, %v2154_v50  ;;  %v5477_v35 = vpack.i.bf16 %v8044_v38, %v8057_v59 }
 0x272   : > { %v2149_v25 = vadd.f32 %v7769_v23, %v2148_v52  ;;  %v2598_v39 = vsel %vm810_vm2, %v2596_v1, %v2597_v48  ;;  %v2600_v31 = vsel %vm810_vm2, %v2597_v48, %v2599_v27  ;;  %v2219_v22 = vmul.f32 %v7774_v9, %v2146_v28 }
 0x273   : > { %v8071_v17 = vpack.i.bf16 %v2600_v31, %v2598_v39  ;;  %v2603_v0 = vsel %vm810_vm2, %v2601_v45, %v2602_v42  ;;  %v2605_v43 = vsel %vm810_vm2, %v2602_v42, %v2604_v53  ;;  %v2260_v47 = vadd.f32 %v7780_v61, %v2221_v40 }
 0x274   : > { %v8077_v4 = vpack.i.bf16 %v2605_v43, %v2603_v0  ;;  %v2222_v60 = vmul.f32 %v7774_v9, %v2157_v24  ;;  %v2220_v6 = vmul.f32 %v7774_v9, %v2149_v25  ;;  %v2539_v36 = vrot.slane %v2454_v55, 1 }
 0x275   : > { %5468 = vrot.lane.b32.xlu1 %v8071_v17, %s6017_s30  ;;  %v2258_v32 = vadd.f32 %v7780_v61, %v2219_v22  ;;  %v2537_v8 = vrot.slane %v8044_v38, 1  ;;  %v2292_v27 = vmax.f32 %v2260_v47, 0.0  ;;  %v2536_v53 = vrot.slane %v8057_v59, 1 }
 0x276   : > { %5458 = vrot.lane.b32.xlu0 %v8077_v4, %s6017_s30  ;;  %v2261_v52 = vadd.f32 %v7780_v61, %v2222_v60  ;;  %v2259_v45 = vadd.f32 %v7780_v61, %v2220_v6  ;;  %v2611_v1 = vrot.slane %v8057_v59, 2  ;;  %v8094_v28 = vsel %vm563_vm0, 0.0, %v2358_v63 }
 0x277   : > { %v2290_v50 = vmax.f32 %v2258_v32, 0.0  ;;  %v2614_v42 = vrot.slane %v2454_v55, 2  ;;  %v2538_v39 = vsel %vm729_vm1, %v2536_v53, %v2537_v8  ;;  %v2540_v31 = vsel %vm729_vm1, %v2537_v8, %v2539_v36 }
 0x278   : > { %v2293_v24 = vmax.f32 %v2261_v52, 0.0  ;;  %v2291_v25 = vmax.f32 %v2259_v45, 0.0  ;;  %v2612_v0 = vrot.slane %v8044_v38, 2  ;;  %v2367_v47 = vrot.slane %v2292_v27, 7 }
 0x279   : > { %5478 = vrot.lane.b32.xlu1 %v5477_v35, %s6022_s25  ;;  %v2453_v32 = vsel %vm563_vm0, %v2359_v5, 0.0  ;;  %v8106_v52 = vrot.slane %v2290_v50, 7  ;;  %v8110_v36 = vpack.i.bf16 %v8051_v2, %v8094_v28  ;;  %v5487_v45 = vpack.i.bf16 %v2540_v31, %v2538_v39 }
 0x27a   : > { %v4474_v48 = vpop.f32.mrb[24].mxu0  ;;  %v2368_v60 = vrot.slane %v2293_v24, 7  ;;  %v8101_v6 = vrot.slane %v2291_v25, 7  ;;  %5473 = vrot.lane.b32.xlu0 %v5477_v35, %s6019_s19  ;;  %v2613_v5 = vsel %vm810_vm2, %v2611_v1, %v2612_v0  ;;  %v2534_v53 = vrot.slane %v2453_v32, 1 }
 0x27b   : > { %v2161_v40 = vpop.f32.mrb[25].mxu0  ;;  %v2170_v22 = vadd.f32 %v4474_v48, %v7769_v23  ;;  %9670 = vst [vmem:[#allocation29_spill] sm:$0xff] %v8110_v36  ;;  %v2532_v24 = vrot.slane %v8051_v2, 1  ;;  %v2615_v25 = vsel %vm810_vm2, %v2612_v0, %v2614_v42  ;;  %v2531_v31 = vrot.slane %v8094_v28, 1 }
 0x27c   : > { %v4475_v43 = vpop.f32.mrb[26].mxu0  ;;  %v2162_v63 = vadd.f32 %v7769_v23, %v2161_v40  ;;  %v8114_v27 = vsel %vm563_vm0, %v2367_v47, %v2368_v60  ;;  %v8119_v35 = vsel %vm563_vm0, %v8106_v52, %v8101_v6  ;;  %v5492_v1 = vpack.i.bf16 %v2615_v25, %v2613_v5 }
 0x27d   : > { %v2164_v55 = vpop.f32.mrb[27].mxu0  ;;  %v2225_v8 = vmul.f32 %v7774_v9, %v2170_v22  ;;  %9671 = vst [vmem:[#allocation32_spill] sm:$0xff] %v8114_v27  ;;  %5483 = vrot.lane.b32.xlu1 %v8110_v36, %s6019_s19  ;;  %v2173_v40 = vadd.f32 %v4475_v43, %v7769_v23  ;;  %v2533_v42 = vsel %vm729_vm1, %v2531_v31, %v2532_v24  ;;  %v2607_v5 = vrot.slane %v8051_v2, 2 }
 0x27e   : > { %5488 = vrot.lane.b32.xlu0 %v5487_v45, %s6015_s28  ;;  %v2223_v48 = vmul.f32 %v7774_v9, %v2162_v63  ;;  %v2165_v39 = vadd.f32 %v7769_v23, %v2164_v55  ;;  %v2535_v0 = vsel %vm729_vm1, %v2532_v24, %v2534_v53  ;;  %v2609_v25 = vrot.slane %v2453_v32, 2 }
 0x27f   : > { %v2264_v50 = vadd.f32 %v7780_v61, %v2225_v8  ;;  %v2226_v62 = vmul.f32 %v7774_v9, %v2173_v40 }
 0x280   : > { %v2262_v22 = vadd.f32 %v7780_v61, %v2223_v48  ;;  %v2224_v8 = vmul.f32 %v7774_v9, %v2165_v39 }
 0x281   : > { %5508 = vrot.lane.b32.xlu1 %v5487_v45, %s6023_s27  ;;  %v2296_v63 = vmax.f32 %v2264_v50, 0.0  ;;  %v2265_v55 = vadd.f32 %v7780_v61, %v2226_v62  ;;  %v2606_v50 = vrot.slane %v8094_v28, 2  ;;  %v8148_v62 = vpack.i.bf16 %v2535_v0, %v2533_v42 }
 0x282   : > { %5493 = vrot.lane.b32.xlu0 %v5492_v1, %s6017_s30  ;;  %v2294_v43 = vmax.f32 %v2262_v22, 0.0  ;;  %v2263_v15 = vadd.f32 %v7780_v61, %v2224_v8  ;;  %v8175_v0 = vsel %vm563_vm0, 0.0, %v2367_v47 }
 0x283   : > { %v2297_v39 = vmax.f32 %v2265_v55, 0.0  ;;  %v8145_v53 = vrot.slane %v2296_v63, 7  ;;  %9672 = vst [vmem:[#allocation26_spill] sm:$0xff] %v8148_v62  ;;  %v2610_v63 = vsel %vm810_vm2, %v2607_v5, %v2609_v25  ;;  %9674 = vst [vmem:[#allocation31_spill] sm:$0xff] %v8175_v0 }
 0x284   : > { %v2295_v30 = vmax.f32 %v2263_v15, 0.0  ;;  %v8151_v32 = vrot.slane %v2294_v43, 7  ;;  %v2608_v15 = vsel %vm810_vm2, %v2606_v50, %v2607_v5 }
 0x285   : > { %5513 = vrot.lane.b32.xlu1 %v5492_v1, %s6024_s29  ;;  %v8153_v8 = vrot.slane %v2297_v39, 7  ;;  %v8179_v43 = vpack.i.bf16 %v2610_v63, %v2608_v15  ;;  %v5537_v39 = vpack.i.bf16 %v8114_v27, %v8175_v0  ;;  %v5970_v63 = vld [vmem:[%s9308_s7] sm:$0xff]  }
 0x286   : > { %v4478_v48 = vpop.f32.mrb[28].mxu0  ;;  %5498 = vrot.lane.b32.xlu0 %v5487_v45, %s6021_s24  ;;  %4556 = vmatprep.subr.bf16.mxu1 %v5970_v63 }
 0x287   : > { %v2186_v40 = vadd.f32 %v4478_v48, %v7769_v23  ;;  %v2177_v10 = vpop.f32.mrb[29].mxu0  ;;  %v8155_v48 = vrot.slane %v2295_v30, 7  ;;  %v8165_v42 = vsel %vm563_vm0, %v8145_v53, %v8153_v8  ;;  %9675 = vst [vmem:[#allocation33_spill] sm:$0xff] %v8179_v43  ;;  %4561 = vmatpush3.bf16.msra.mxu1 %v5970_v63  ;;  %4480 = vmatprep.subr.bf16.mxu0 %v5970_v63 }
 0x288   : > { %v4479_v31 = vpop.f32.mrb[30].mxu0  ;;  %v2178_v7 = vadd.f32 %v7769_v23, %v2177_v10  ;;  %9673 = vst [vmem:[#allocation43_spill] sm:$0xff] %v8165_v42  ;;  %v2456_v10 = vsel %vm563_vm0, %v2368_v60, 0.0  ;;  %4481 = vmatpush3.bf16.msra.mxu0 %v5970_v63 }
 0x289   : > { %v2229_v24 = vmul.f32 %v7774_v9, %v2186_v40  ;;  %v2180_v22 = vpop.f32.mrb[31].mxu0  ;;  %v2189_v45 = vadd.f32 %v4479_v31, %v7769_v23  ;;  %v8170_v30 = vsel %vm563_vm0, %v8151_v32, %v8155_v48  ;;  %5518 = vrot.lane.b32.xlu1 %v8148_v62, %s6015_s28  ;;  %v2547_v31 = vrot.slane %v8114_v27, 1 }
 0x28a   : > { %5503 = vrot.lane.b32.xlu0 %v5492_v1, %s6025_s22  ;;  %v2227_v5 = vmul.f32 %v7774_v9, %v2178_v7  ;;  %v2181_v40 = vadd.f32 %v7769_v23, %v2180_v22  ;;  %v2549_v47 = vrot.slane %v2456_v10, 1  ;;  %v8195_v23 = vsel %vm563_vm0, 0.0, %v8106_v52 }
 0x28b   : > { %v2268_v55 = vadd.f32 %v7780_v61, %v2229_v24  ;;  %v2230_v25 = vmul.f32 %v7774_v9, %v2189_v45  ;;  %v2546_v24 = vrot.slane %v8175_v0, 1  ;;  %v2624_v45 = vrot.slane %v2456_v10, 2  ;;  %v5971_v10 = vld [vmem:[%s9308_s7 + $0x8] sm:$0xff]  }
 0x28c   : > { %v2266_v60 = vadd.f32 %v7780_v61, %v2227_v5  ;;  %v2228_v7 = vmul.f32 %v7774_v9, %v2181_v40  ;;  %v5547_v9 = vpack.i.bf16 %v8119_v35, %v8195_v23  ;;  %4557 = vmatprep.subr.bf16.mxu1 %v5971_v10  ;;  %4482 = vmatprep.subr.bf16.mxu0 %v5971_v10 }
 0x28d   : > { %v2300_v50 = vmax.f32 %v2268_v55, 0.0  ;;  %5523 = vrot.lane.b32.xlu1 %v8179_v43, %s6017_s30  ;;  %v2269_v1 = vadd.f32 %v7780_v61, %v2230_v25  ;;  %v2548_v25 = vsel %vm729_vm1, %v2546_v24, %v2547_v31  ;;  %4562 = vmatpush3.bf16.msra.mxu1 %v5971_v10 }
 0x28e   : > { %5538 = vrot.lane.b32.xlu0 %v5537_v39, %s6019_s19  ;;  %v2298_v22 = vmax.f32 %v2266_v60, 0.0  ;;  %v2267_v55 = vadd.f32 %v7780_v61, %v2228_v7  ;;  %v2550_v60 = vsel %vm729_vm1, %v2547_v31, %v2549_v47  ;;  %v2622_v61 = vrot.slane %v8114_v27, 2  ;;  %4483 = vmatpush3.bf16.msra.mxu0 %v5971_v10 }
 0x28f   : > { %v2301_v15 = vmax.f32 %v2269_v1, 0.0  ;;  %v2379_v5 = vrot.slane %v2300_v50, 7  ;;  %v2621_v1 = vrot.slane %v8175_v0, 2  ;;  %v5557_v31 = vpack.i.bf16 %v2550_v60, %v2548_v25  ;;  %v5972_v25 = vld [vmem:[%s9308_s7 + $0x10] sm:$0xff]  }
 0x290   : > { %v2299_v52 = vmax.f32 %v2267_v55, 0.0  ;;  %v8214_v50 = vrot.slane %v2298_v22, 7  ;;  %v8228_v55 = vpop.permute.xlu0 %5328  ;;  %4558 = vmatprep.subr.bf16.mxu1 %v5972_v25  ;;  %4484 = vmatprep.subr.bf16.mxu0 %v5972_v25 }
 0x291   : > { %v2380_v40 = vrot.slane %v2301_v15, 7  ;;  %5528 = vrot.lane.b32.xlu1 %v8148_v62, %s6021_s24  ;;  %v2623_v22 = vsel %vm810_vm2, %v2621_v1, %v2622_v61  ;;  %v2625_v15 = vsel %vm810_vm2, %v2622_v61, %v2624_v45  ;;  %9677 = vst [vmem:[#allocation36_spill] sm:$0xff] %v8228_v55  ;;  %v2444_v45 = vsel %vm563_vm0, 0.0, %v2379_v5  ;;  %4563 = vmatpush3.bf16.msra.mxu1 %v5972_v25  ;;  %v5973_v61 = vld [vmem:[%s9308_s7 + $0x18] sm:$0xff]  }
 0x292   : > { %5548 = vrot.lane.b32.xlu0 %v5547_v9, %s6022_s25  ;;  %v8217_v24 = vrot.slane %v2299_v52, 7  ;;  %v5562_v63 = vpack.i.bf16 %v2625_v15, %v2623_v22  ;;  %v2455_v52 = vsel %vm563_vm0, %v8101_v6, 0.0  ;;  %v2542_v22 = vrot.slane %v8119_v35, 1  ;;  %4559 = vmatprep.subr.bf16.mxu1 %v5973_v61 }
 0x293   : > { %v2381_v7 = vsel %vm563_vm0, %v2379_v5, %v2380_v40  ;;  %v2460_v1 = vsel %vm563_vm0, %v2380_v40, 0.0  ;;  %v2541_v6 = vrot.slane %v8195_v23, 1  ;;  %v2619_v10 = vrot.slane %v2455_v52, 2  ;;  %4485 = vmatpush3.bf16.msra.mxu0 %v5972_v25 }
 0x294   : > { %v8222_v47 = vsel %vm563_vm0, %v8214_v50, %v8217_v24  ;;  %v8239_v60 = vpop.permute.xlu0 %5333  ;;  %v2643_v5 = vrot.slane %v2444_v45, 1  ;;  %v2648_v15 = vrot.slane %v2444_v45, 2  ;;  %v2646_v51 = vrot.slane %v2460_v1, 1  ;;  %4486 = vmatprep.subr.bf16.mxu0 %v5973_v61 }
 0x295   : > { %9676 = vst [vmem:[#allocation34_spill] sm:$0xff] %v8222_v47  ;;  %5533 = vrot.lane.b32.xlu1 %v8179_v43, %s6025_s22  ;;  %9678 = vst [vmem:[#allocation37_spill] sm:$0xff] %v8239_v60  ;;  %v2651_v43 = vrot.slane %v2460_v1, 2  ;;  %4564 = vmatpush3.bf16.msra.mxu1 %v5973_v61  ;;  %v2543_v0 = vsel %vm729_vm1, %v2541_v6, %v2542_v22  ;;  %v2617_v40 = vrot.slane %v8119_v35, 2  ;;  %v2649_v36 = vrot.slane %v2381_v7, 2 }
 0x296   : > { %5558 = vrot.lane.b32.xlu0 %v5557_v31, %s6015_s28  ;;  %v8251_v27 = vpack.i.bf16 %v2381_v7, %v2444_v45  ;;  %v2616_v60 = vrot.slane %v8195_v23, 2 }
 0x297   : > { %v2650_v45 = vsel %vm810_vm2, %v2648_v15, %v2649_v36  ;;  %v2652_v25 = vsel %vm810_vm2, %v2649_v36, %v2651_v43  ;;  %4487 = vmatpush3.bf16.msra.mxu0 %v5973_v61  ;;  %v2458_v36 = vsel %vm563_vm0, %v8153_v8, 0.0  ;;  %v5974_v43 = vld [vmem:[%s9308_s7 + $0x20] ss:$0 sps:$4 sm:$0xff]  }
 0x298   : > { %v8255_v62 = vpop.permute.xlu0 %5338  ;;  %v2559_v61 = vrot.slane %v2458_v36, 1  ;;  %4664 = vmatprep.subr.msk.bf16.mxu1 %vm3789_vm13, %v5974_v43  ;;  %v3791_v15 = vsel %vm3789_vm13, %v5974_v43, 0  ;;  %4663 = vmatprep.subr.msk.bf16.mxu0 %vm3789_vm13, %v5974_v43 }
 0x299   : > { %5543 = vrot.lane.b32.xlu1 %v5537_v39, %s6022_s25  ;;  %v2544_v39 = vrot.slane %v2455_v52, 1  ;;  %v2644_v52 = vrot.slane %v2381_v7, 1  ;;  %v2618_v7 = vsel %vm810_vm2, %v2616_v60, %v2617_v40  ;;  %v2557_v60 = vrot.slane %v8165_v42, 1  ;;  %4565 = vmatpush3.bf16.msra.mxu1 %v3791_v15 }
 0x29a   : > { %5563 = vrot.lane.b32.xlu0 %v5562_v63, %s6017_s30 }
 0x29b   : > { %v2645_v1 = vsel %vm729_vm1, %v2643_v5, %v2644_v52  ;;  %v2647_v6 = vsel %vm729_vm1, %v2644_v52, %v2646_v51  ;;  %4489 = vmatpush3.bf16.msra.mxu0 %v3791_v15 }
 0x29c   : > { %v8263_v55 = vpack.i.bf16 %v2647_v6, %v2645_v1  ;;  %v8271_v5 = vpop.permute.xlu0 %5343  ;;  %v2560_v1 = vsel %vm729_vm1, %v2557_v60, %v2559_v61  ;;  %v2632_v6 = vrot.slane %v8165_v42, 2  ;;  %v2457_v61 = vsel %vm563_vm0, %v8155_v48, 0.0 }
 0x29d   : > { %5553 = vrot.lane.b32.xlu1 %v5547_v9, %s6019_s19  ;;  %v2545_v9 = vsel %vm729_vm1, %v2542_v22, %v2544_v39  ;;  %v8265_v22 = vpack.i.bf16 %v2652_v25, %v2650_v45  ;;  %v2620_v39 = vsel %vm810_vm2, %v2617_v40, %v2619_v10  ;;  %v2634_v40 = vrot.slane %v2458_v36, 2 }
 0x29e   : > { %5568 = vrot.lane.b32.xlu0 %v5557_v31, %s6021_s24  ;;  %v5602_v51 = vpack.i.bf16 %v2620_v39, %v2618_v7 }
 0x2a0   : > { %v8288_v10 = vpop.permute.xlu0 %5348 }
 0x2a1   : > { %5578 = vrot.lane.b32.xlu1 %v5557_v31, %s6023_s27  ;;  %v5597_v31 = vpack.i.bf16 %v2545_v9, %v2543_v0  ;;  %v8279_v0 = vsel %vm563_vm0, 0.0, %v8145_v53  ;;  %v8294_v53 = vsel %vm563_vm0, 0.0, %v8151_v32 }
 0x2a2   : > { %5573 = vrot.lane.b32.xlu0 %v5562_v63, %s6025_s22  ;;  %9679 = vst [vmem:[#allocation23_spill] sm:$0xff] %v8279_v0  ;;  %v2556_v8 = vrot.slane %v8279_v0, 1  ;;  %v5627_v9 = vpack.i.bf16 %v8170_v30, %v8294_v53  ;;  %v2631_v32 = vrot.slane %v8279_v0, 2 }
 0x2a4   : > { %v2558_v52 = vsel %vm729_vm1, %v2556_v8, %v2557_v60  ;;  %v2633_v39 = vsel %vm810_vm2, %v2631_v32, %v2632_v6  ;;  %v2627_v32 = vrot.slane %v8170_v30, 2 }
 0x2a5   : > { %5583 = vrot.lane.b32.xlu1 %v5562_v63, %s6024_s29  ;;  %v5617_v63 = vpack.i.bf16 %v8165_v42, %v8279_v0  ;;  %v5637_v7 = vpack.i.bf16 %v2560_v1, %v2558_v52  ;;  %v2551_v52 = vrot.slane %v8294_v53, 1 }
 0x2a6   : > { %5598 = vrot.lane.b32.xlu0 %v5597_v31, %s6023_s27 }
 0x2a9   : > { %5588 = vrot.lane.b32.xlu1 %v5597_v31, %s6015_s28 }
 0x2aa   : > { %5603 = vrot.lane.b32.xlu0 %v5602_v51, %s6024_s29 }
 0x2ad   : > { %5593 = vrot.lane.b32.xlu1 %v5602_v51, %s6017_s30 }
 0x2ae   : > { %5618 = vrot.lane.b32.xlu0 %v5617_v63, %s6019_s19 }
 0x2b1   : > { %5608 = vrot.lane.b32.xlu1 %v5597_v31, %s6021_s24  ;;  %v2635_v31 = vsel %vm810_vm2, %v2632_v6, %v2634_v40  ;;  %v2552_v40 = vrot.slane %v8170_v30, 1 }
 0x2b2   : > { %5628 = vrot.lane.b32.xlu0 %v5627_v9, %s6022_s25  ;;  %v5642_v60 = vpack.i.bf16 %v2635_v31, %v2633_v39 }
 0x2b3   : > { %v2553_v48 = vsel %vm729_vm1, %v2551_v52, %v2552_v40 }
 0x2b5   : > { %v8304_v45 = vpop.permute.xlu1 %5353  ;;  %5613 = vrot.lane.b32.xlu1 %v5602_v51, %s6025_s22  ;;  %v2554_v51 = vrot.slane %v2457_v61, 1 }
 0x2b6   : > { %v8306_v25 = vpop.permute.xlu0 %5363  ;;  %5638 = vrot.lane.b32.xlu0 %v5637_v7, %s6015_s28 }
 0x2b7   : > { %v2555_v6 = vsel %vm729_vm1, %v2552_v40, %v2554_v51 }
 0x2b8   : > { %v5677_v42 = vpack.i.bf16 %v2555_v6, %v2553_v48 }
 0x2b9   : > { %v8312_v36 = vpop.permute.xlu1 %5358  ;;  %5623 = vrot.lane.b32.xlu1 %v5617_v63, %s6022_s25  ;;  %v2629_v63 = vrot.slane %v2457_v61, 2 }
 0x2ba   : > { %9680 = vst [vmem:[#allocation49_spill] sm:$0xff] %v8312_v36  ;;  %v8314_v43 = vpop.permute.xlu0 %5368  ;;  %5643 = vrot.lane.b32.xlu0 %v5642_v60, %s6017_s30 }
 0x2bd   : > { %5633 = vrot.lane.b32.xlu1 %v5627_v9, %s6019_s19  ;;  %v8323_v15 = vpop.permute.xlu1 %5388  ;;  %v2626_v9 = vrot.slane %v8294_v53, 2 }
 0x2be   : > { %v8320_v8 = vpop.permute.xlu0 %5373  ;;  %5648 = vrot.lane.b32.xlu0 %v5637_v7, %s6021_s24 }
 0x2bf   : > { %9681 = vst [vmem:[#allocation30_spill] sm:$0xff] %v8320_v8  ;;  %v2628_v61 = vsel %vm810_vm2, %v2626_v9, %v2627_v32 }
 0x2c1   : > { %5658 = vrot.lane.b32.xlu1 %v5637_v7, %s6023_s27  ;;  %v2630_v7 = vsel %vm810_vm2, %v2627_v32, %v2629_v63  ;;  %v8359_v63 = vsel %vm563_vm0, 0.0, %v8214_v50  ;;  %v2459_v32 = vsel %vm563_vm0, %v8217_v24, 0.0  ;;  %v2562_v50 = vrot.slane %v8222_v47, 1 }
 0x2c2   : > { %v8328_v1 = vpop.permute.xlu0 %5378  ;;  %5653 = vrot.lane.b32.xlu0 %v5642_v60, %s6025_s22  ;;  %v5682_v52 = vpack.i.bf16 %v2630_v7, %v2628_v61  ;;  %9688 = vst [vmem:[#allocation10_spill] sm:$0xff] %v8359_v63  ;;  %v5707_v6 = vpack.i.bf16 %v8222_v47, %v8359_v63  ;;  %v2564_v7 = vrot.slane %v2459_v32, 1  ;;  %v2639_v24 = vrot.slane %v2459_v32, 2 }
 0x2c3   : > { %9682 = vst [vmem:[#allocation41_spill] sm:$0xff] %v8328_v1  ;;  %vm3615_vm0 = vcmask 457728  }
 0x2c4   : > { %v8336_v39 = vpop.permute.xlu1 %5393 }
 0x2c5   : > { %5663 = vrot.lane.b32.xlu1 %v5642_v60, %s6024_s29 }
 0x2c6   : > { %v8338_v31 = vpop.permute.xlu0 %5383  ;;  %5678 = vrot.lane.b32.xlu0 %v5677_v42, %s6023_s27 }
 0x2c7   : > { %9683 = vst [vmem:[#allocation42_spill] sm:$0xff] %v8338_v31 }
 0x2c8   : > { %v8344_v51 = vpop.permute.xlu1 %5398 }
 0x2c9   : > { %9684 = vst [vmem:[#allocation46_spill] sm:$0xff] %v8344_v51  ;;  %5668 = vrot.lane.b32.xlu1 %v5677_v42, %s6015_s28 }
 0x2ca   : > { %v8346_v40 = vpop.permute.xlu0 %5408  ;;  %5683 = vrot.lane.b32.xlu0 %v5682_v52, %s6024_s29 }
 0x2cb   : > { %9685 = vst [vmem:[#allocation27_spill] sm:$0xff] %v8346_v40  ;;  %v2636_v40 = vrot.slane %v8359_v63, 2 }
 0x2cc   : > { %v8350_v0 = vpop.permute.xlu1 %5403 }
 0x2cd   : > { %9686 = vst [vmem:[#allocation47_spill] sm:$0xff] %v8350_v0  ;;  %5673 = vrot.lane.b32.xlu1 %v5682_v52, %s6017_s30 }
 0x2ce   : > { %v8353_v60 = vpop.permute.xlu0 %5413  ;;  %5698 = vrot.lane.b32.xlu0 %v8251_v27, %s6019_s19 }
 0x2cf   : > { %9687 = vst [vmem:[#allocation38_spill] sm:$0xff] %v8353_v60 }
 0x2d0   : > { %v8361_v48 = vpop.permute.xlu1 %5423 }
 0x2d1   : > { %9689 = vst [vmem:[#allocation58_spill] sm:$0xff] %v8361_v48  ;;  %5688 = vrot.lane.b32.xlu1 %v5677_v42, %s6021_s24  ;;  %v2561_v48 = vrot.slane %v8359_v63, 1 }
 0x2d2   : > { %5708 = vrot.lane.b32.xlu0 %v5707_v6, %s6022_s25  ;;  %v8369_v9 = vpop.permute.xlu0 %5418 }
 0x2d3   : > { %9690 = vst [vmem:[#allocation35_spill] sm:$0xff] %v8369_v9  ;;  %v2565_v9 = vsel %vm729_vm1, %v2562_v50, %v2564_v7 }
 0x2d4   : > { %v8371_v61 = vpop.permute.xlu1 %5428 }
 0x2d5   : > { %9691 = vst [vmem:[#allocation59_spill] sm:$0xff] %v8371_v61  ;;  %5693 = vrot.lane.b32.xlu1 %v5682_v52, %s6025_s22  ;;  %v2563_v61 = vsel %vm729_vm1, %v2561_v48, %v2562_v50  ;;  %v2637_v52 = vrot.slane %v8222_v47, 2  ;;  %v5847_v47 = vpack.i.bf16 %v7922_v21, %v7937_v33  ;;  %vm3648_vm1 = vcmask 523264  }
 0x2d6   : > { %5718 = vrot.lane.b32.xlu0 %v8263_v55, %s6021_s24 }
 0x2d7   : > { %v2638_v32 = vsel %vm810_vm2, %v2636_v40, %v2637_v52 }
 0x2d8   : > { %v8378_v42 = vpop.permute.xlu1 %5443  ;;  %v8380_v60 = vpop.permute.xlu0 %5433 }
 0x2d9   : > { %9692 = vst [vmem:[#allocation44_spill] sm:$0xff] %v8378_v42  ;;  %9693 = vst [vmem:[#allocation13_spill] sm:$0xff] %v8380_v60  ;;  %5703 = vrot.lane.b32.xlu1 %v8251_v27, %s6022_s25  ;;  %v5747_v42 = vpack.i.bf16 %v2565_v9, %v2563_v61  ;;  %v2640_v27 = vsel %vm810_vm2, %v2637_v52, %v2639_v24  ;;  %v8417_v9 = vld [vmem:[%s9310_s9] sm:$0x3]  ;;  %vm3740_vm2 = vcmask 588800  }
 0x2da   : > { %5723 = vrot.lane.b32.xlu0 %v8265_v22, %s6025_s22  ;;  %v5752_v7 = vpack.i.bf16 %v2640_v27, %v2638_v32  ;;  %4665 = vmatprep.subr.msk.bf16.mxu1 %vm2027_vm3, %v8417_v9 }
 0x2dc   : > { %v8390_v0 = vpop.permute.xlu1 %5448 }
 0x2dd   : > { %9694 = vst [vmem:[#allocation8_spill] sm:$0xff] %v8390_v0  ;;  %5713 = vrot.lane.b32.xlu1 %v5707_v6, %s6019_s19 }
 0x2de   : > { %5748 = vrot.lane.b32.xlu0 %v5747_v42, %s6023_s27 }
 0x2df   : > { %v8396_v48 = vpop.permute.xlu0 %5438 }
 0x2e0   : > { %9695 = vst [vmem:[#allocation12_spill] sm:$0xff] %v8396_v48 }
 0x2e1   : > { %5728 = vrot.lane.b32.xlu1 %v8263_v55, %s6023_s27  ;;  %v8400_v50 = vpop.permute.xlu1 %5463 }
 0x2e2   : > { %9696 = vst [vmem:[#allocation15_spill] sm:$0xff] %v8400_v50  ;;  %5753 = vrot.lane.b32.xlu0 %v5752_v7, %s6024_s29 }
 0x2e3   : > { %v5454_v0 = vpop.permute.xlu0 %5453 }
 0x2e4   : > { %v5455_v50 = vunpack.i.l.bf16 %v5454_v0 }
 0x2e5   : > { %5733 = vrot.lane.b32.xlu1 %v8265_v22, %s6024_s29 }
 0x2e6   : > { %5758 = vrot.lane.b32.xlu0 %v7904_v44, %s6022_s25 }
 0x2e7   : > { %v8407_v40 = vpop.permute.xlu1 %5468 }
 0x2e8   : > { %9697 = vst [vmem:[#allocation61_spill] sm:$0xff] %v8407_v40  ;;  %v5459_v6 = vpop.permute.xlu0 %5458  ;;  %v5817_v40 = vpack.i.bf16 %v7861_v19, %v7849_v29 }
 0x2e9   : > { %5738 = vrot.lane.b32.xlu1 %v5747_v42, %s6015_s28  ;;  %v5461_v48 = vunpack.i.h.bf16 %v5459_v6  ;;  %v5460_v60 = vunpack.i.l.bf16 %v5459_v6 }
 0x2ea   : > { %5778 = vrot.lane.b32.xlu0 %v7915_v37, %s6023_s27 }
 0x2eb   : > { %v8412_v55 = vpop.permute.xlu1 %5478 }
 0x2ec   : > { %v8419_v61 = vpop.permute.xlu0 %5473  ;;  %v5480_v8 = vunpack.i.l.bf16 %v8412_v55 }
 0x2ed   : > { %5743 = vrot.lane.b32.xlu1 %v5752_v7, %s6017_s30 }
 0x2ee   : > { %5788 = vrot.lane.b32.xlu0 %v7968_v16, %s6024_s29 }
 0x2ef   : > { %v5484_v44 = vpop.permute.xlu1 %5483 }
 0x2f0   : > { %v8426_v22 = vpop.permute.xlu0 %5488  ;;  %v5485_v19 = vunpack.i.l.bf16 %v5484_v44 }
 0x2f1   : > { %5763 = vrot.lane.b32.xlu1 %v5747_v42, %s6021_s24 }
 0x2f2   : > { %5798 = vrot.lane.b32.xlu0 %v7915_v37, %s6021_s24 }
 0x2f3   : > { %v8431_v24 = vpop.permute.xlu1 %5508 }
 0x2f4   : > { %v8433_v52 = vpop.permute.xlu0 %5493 }
 0x2f5   : > { %5768 = vrot.lane.b32.xlu1 %v5752_v7, %s6025_s22 }
 0x2f6   : > { %5808 = vrot.lane.b32.xlu0 %v7968_v16, %s6025_s22 }
 0x2f7   : > { %v8438_v32 = vpop.permute.xlu1 %5513 }
 0x2f8   : > { %v8440_v27 = vpop.permute.xlu0 %5498 }
 0x2f9   : > { %5773 = vrot.lane.b32.xlu1 %v7836_v13, %s6023_s27  ;;  %v5456_v13 = vunpack.i.h.bf16 %v5454_v0 }
 0x2fa   : > { %5818 = vrot.lane.b32.xlu0 %v5817_v40, %s6022_s25 }
 0x2fb   : > { %v8447_v37 = vpop.permute.xlu1 %5518  ;;  %v3438_v0 = vsel %vm1704_vm5, %v7986_v12, %v5456_v13 }
 0x2fc   : > { %v8449_v42 = vpop.permute.xlu0 %5503 }
 0x2fd   : > { %5783 = vrot.lane.b32.xlu1 %v7845_v18, %s6024_s29  ;;  %v5486_v18 = vunpack.i.h.bf16 %v5484_v44  ;;  %v3470_v44 = vsel %vm1770_vm7, %v3438_v0, %v5461_v48  ;;  %v5511_v48 = vunpack.i.h.bf16 %v8431_v24 }
 0x2fe   : > { %5828 = vrot.lane.b32.xlu0 %v7944_v49, %s6023_s27 }
 0x2ff   : > { %v8455_v16 = vpop.permute.xlu1 %5523 }
 0x300   : > { %v8457_v7 = vpop.permute.xlu0 %5538 }
 0x301   : > { %5793 = vrot.lane.b32.xlu1 %v5817_v40, %s6019_s19  ;;  %v3437_v40 = vsel %vm1704_vm5, %v7993_v56, %v5455_v50  ;;  %v5481_v50 = vunpack.i.h.bf16 %v8412_v55  ;;  %v5516_v55 = vunpack.i.h.bf16 %v8438_v32 }
 0x302   : > { %5838 = vrot.lane.b32.xlu0 %v7964_v46, %s6024_s29  ;;  %v3469_v6 = vsel %vm1770_vm7, %v3437_v40, %v5460_v60  ;;  %v5521_v40 = vunpack.i.h.bf16 %v8447_v37 }
 0x303   : > { %v5529_v29 = vpop.permute.xlu1 %5528 }
 0x304   : > { %v8462_v63 = vpop.permute.xlu0 %5548  ;;  %v5531_v51 = vunpack.i.h.bf16 %v5529_v29  ;;  %v5530_v31 = vunpack.i.l.bf16 %v5529_v29  ;;  %v3502_v29 = vsel %vm1836_vm9, %v3470_v44, %v5486_v18  ;;  %v5510_v18 = vunpack.i.l.bf16 %v8431_v24 }
 0x305   : > { %5803 = vrot.lane.b32.xlu1 %v7944_v49, %s6021_s24  ;;  %v3501_v49 = vsel %vm1836_vm9, %v3469_v6, %v5485_v19  ;;  %v5520_v24 = vunpack.i.l.bf16 %v8447_v37  ;;  %v5526_v6 = vunpack.i.h.bf16 %v8455_v16 }
 0x306   : > { %5848 = vrot.lane.b32.xlu0 %v5847_v47, %s6019_s19  ;;  %v3533_v36 = vsel %vm1902_vm11, %v3501_v49, %v5530_v31  ;;  %v3534_v60 = vsel %vm1902_vm11, %v3502_v29, %v5531_v51  ;;  %v5515_v31 = vunpack.i.l.bf16 %v8438_v32  ;;  %v5525_v32 = vunpack.i.l.bf16 %v8455_v16 }
 0x307   : > { %v5534_v1 = vpop.permute.xlu1 %5533  ;;  %v3440_v49 = vsel %vm1704_vm5, %v8051_v2, %v5521_v40  ;;  %v5475_v2 = vunpack.i.l.bf16 %v8419_v61  ;;  %v5506_v40 = vunpack.i.h.bf16 %v8449_v42 }
 0x308   : > { %v5536_v33 = vunpack.i.h.bf16 %v5534_v1  ;;  %v5535_v21 = vunpack.i.l.bf16 %v5534_v1  ;;  %v8477_v13 = vpop.permute.xlu0 %5558 }
 0x309   : > { %5813 = vrot.lane.b32.xlu1 %v7964_v46, %s6025_s22 }
 0x30a   : > { %v3566_v19 = vsel %vm3549_vm14, %v3533_v36, %v5535_v21  ;;  %v3567_v1 = vsel %vm3549_vm14, %v3534_v60, %v5536_v33  ;;  %5858 = vrot.lane.b32.xlu0 %v7995_v26, %s6021_s24 }
 0x30b   : > { %v8493_v0 = vpop.permute.xlu1 %5543  ;;  %v3599_v51 = vsel %vm3582_vm15, %v3566_v19, %v5480_v8  ;;  %v3600_v46 = vsel %vm3582_vm15, %v3567_v1, %v5481_v50  ;;  %v3439_v50 = vsel %vm1704_vm5, %v8094_v28, %v5520_v24  ;;  %v5505_v24 = vunpack.i.l.bf16 %v8449_v42 }
 0x30c   : > { %v8499_v21 = vpop.permute.xlu0 %5563  ;;  %v3632_v33 = vsel %vm3615_vm0, %v3599_v51, %v5510_v18  ;;  %v3633_v36 = vsel %vm3615_vm0, %v3600_v46, %v5511_v48  ;;  %v3471_v16 = vsel %vm1770_vm7, %v3439_v50, %v5525_v32  ;;  %v3472_v48 = vsel %vm1770_vm7, %v3440_v49, %v5526_v6 }
 0x30d   : > { %5823 = vrot.lane.b32.xlu1 %v5847_v47, %s6022_s25  ;;  %v3665_v8 = vsel %vm3648_vm1, %v3632_v33, %v5515_v31  ;;  %v3666_v44 = vsel %vm3648_vm1, %v3633_v36, %v5516_v55  ;;  %v5877_v47 = vpack.i.bf16 %v7919_v20, %v7908_v3  ;;  %v5476_v18 = vunpack.i.h.bf16 %v8419_v61 }
 0x30e   : > { %5868 = vrot.lane.b32.xlu0 %v8019_v34, %s6025_s22  ;;  %v3689_v37 = vpack.c.bf16 %v3666_v44, %v3665_v8  ;;  %v3503_v19 = vsel %vm1836_vm9, %v3471_v16, %v5475_v2  ;;  %v5501_v31 = vunpack.i.h.bf16 %v8440_v27  ;;  %v5500_v51 = vunpack.i.l.bf16 %v8440_v27 }
 0x30f   : > { %v8510_v29 = vpop.permute.xlu1 %5553  ;;  %v3504_v1 = vsel %vm1836_vm9, %v3472_v48, %v5476_v18  ;;  %v5551_v36 = vunpack.i.h.bf16 %v8462_v63  ;;  %v5550_v27 = vunpack.i.l.bf16 %v8462_v63  ;;  %v5907_v42 = vpack.i.bf16 %v8002_v11, %v7980_v41 }
 0x310   : > { %v8516_v60 = vpop.permute.xlu0 %5568  ;;  %4506 = vmatprep.mubr.msk.bf16.mxu1 %vm3740_vm2, %v3689_v37  ;;  %v3536_v61 = vsel %vm1902_vm11, %v3504_v1, %v5501_v31 }
 0x311   : > { %5833 = vrot.lane.b32.xlu1 %v7995_v26, %s6023_s27  ;;  %v3535_v26 = vsel %vm1902_vm11, %v3503_v19, %v5500_v51  ;;  %v3569_v6 = vsel %vm3549_vm14, %v3536_v61, %v5506_v40  ;;  %v4027_v51 = vsel %vm2027_vm3, %v8417_v9, 0  ;;  %v5496_v61 = vunpack.i.h.bf16 %v8433_v52 }
 0x312   : > { %5878 = vrot.lane.b32.xlu0 %v5877_v47, %s6022_s25  ;;  %v3602_v63 = vsel %vm3582_vm15, %v3569_v6, %v5551_v36  ;;  %v5495_v40 = vunpack.i.l.bf16 %v8433_v52  ;;  %v5556_v9 = vunpack.i.h.bf16 %v8510_v29 }
 0x313   : > { %v8528_v28 = vpop.permute.xlu1 %5578 }
 0x314   : > { %v8532_v55 = vpop.permute.xlu0 %5573 }
 0x315   : > { %5843 = vrot.lane.b32.xlu1 %v8019_v34, %s6024_s29  ;;  %v3568_v34 = vsel %vm3549_vm14, %v3535_v26, %v5505_v24  ;;  %v5490_v26 = vunpack.i.l.bf16 %v8426_v22 }
 0x316   : > { %5888 = vrot.lane.b32.xlu0 %v7998_v58, %s6023_s27  ;;  %v3601_v49 = vsel %vm3582_vm15, %v3568_v34, %v5550_v27 }
 0x317   : > { %v8542_v46 = vpop.permute.xlu1 %5583  ;;  %v3441_v34 = vsel %vm1704_vm5, %v8057_v59, %v5490_v26  ;;  %v5546_v59 = vunpack.i.h.bf16 %v8493_v0 }
 0x318   : > { %v5599_v33 = vpop.permute.xlu0 %5598  ;;  %v3473_v52 = vsel %vm1770_vm7, %v3441_v34, %v5495_v40  ;;  %v5541_v34 = vunpack.i.h.bf16 %v8457_v7 }
 0x319   : > { %5853 = vrot.lane.b32.xlu1 %v5877_v47, %s6019_s19  ;;  %v5601_v32 = vunpack.i.h.bf16 %v5599_v33  ;;  %v5600_v8 = vunpack.i.l.bf16 %v5599_v33  ;;  %v5555_v33 = vunpack.i.l.bf16 %v8510_v29 }
 0x31a   : > { %5898 = vrot.lane.b32.xlu0 %v8033_v57, %s6024_s29 }
 0x31b   : > { %v8553_v44 = vpop.permute.xlu1 %5588  ;;  %v3634_v16 = vsel %vm3615_vm0, %v3601_v49, %v5600_v8  ;;  %v3635_v48 = vsel %vm3615_vm0, %v3602_v63, %v5601_v32  ;;  %v5937_v32 = vpack.i.bf16 %v7986_v12, %v7993_v56  ;;  %v5545_v63 = vunpack.i.l.bf16 %v8493_v0 }
 0x31c   : > { %v5604_v37 = vpop.permute.xlu0 %5603  ;;  %v5581_v12 = vunpack.i.h.bf16 %v8528_v28  ;;  %v5580_v56 = vunpack.i.l.bf16 %v8528_v28  ;;  %v5585_v0 = vunpack.i.l.bf16 %v8542_v46  ;;  %v5590_v28 = vunpack.i.l.bf16 %v8553_v44 }
 0x31d   : > { %v5606_v50 = vunpack.i.h.bf16 %v5604_v37  ;;  %v5605_v47 = vunpack.i.l.bf16 %v5604_v37  ;;  %5863 = vrot.lane.b32.xlu1 %v7998_v58, %s6021_s24  ;;  %v5491_v58 = vunpack.i.h.bf16 %v8426_v22  ;;  %v3505_v37 = vsel %vm1836_vm9, %v3473_v52, %v5555_v33 }
 0x31e   : > { %5908 = vrot.lane.b32.xlu0 %v5907_v42, %s6019_s19  ;;  %v5540_v52 = vunpack.i.l.bf16 %v8457_v7 }
 0x31f   : > { %v3667_v18 = vsel %vm3648_vm1, %v3634_v16, %v5605_v47  ;;  %v3668_v2 = vsel %vm3648_vm1, %v3635_v48, %v5606_v50  ;;  %v8566_v19 = vpop.permute.xlu1 %5593  ;;  %v3442_v22 = vsel %vm1704_vm5, %v8044_v38, %v5491_v58 }
 0x320   : > { %v3690_v1 = vpack.c.bf16 %v3668_v2, %v3667_v18  ;;  %v8568_v31 = vpop.permute.xlu0 %5618  ;;  %v3474_v6 = vsel %vm1770_vm7, %v3442_v22, %v5496_v61  ;;  %v5586_v18 = vunpack.i.h.bf16 %v8542_v46  ;;  %v5596_v40 = vunpack.i.h.bf16 %v8566_v19 }
 0x321   : > { %5873 = vrot.lane.b32.xlu1 %v8033_v57, %s6025_s22  ;;  %v3506_v8 = vsel %vm1836_vm9, %v3474_v6, %v5556_v9  ;;  %v5595_v46 = vunpack.i.l.bf16 %v8566_v19 }
 0x322   : > { %5918 = vrot.lane.b32.xlu0 %v8041_v14, %s6021_s24  ;;  %4507 = vmatmul.mubr.msk.bf16.vlgmr.msra.gmra.mrb[0].mxu1 %vm3740_vm2, %v3690_v1 }
 0x323   : > { %v5609_v24 = vpop.permute.xlu1 %5608  ;;  %4523 = vmatpush3.bf16.msra.mxu1 %v4027_v51 }
 0x324   : > { %v8583_v57 = vpop.permute.xlu0 %5628  ;;  %v5611_v36 = vunpack.i.h.bf16 %v5609_v24  ;;  %v5610_v27 = vunpack.i.l.bf16 %v5609_v24 }
 0x325   : > { %5883 = vrot.lane.b32.xlu1 %v5907_v42, %s6022_s25 }
 0x326   : > { %5928 = vrot.lane.b32.xlu0 %v8071_v17, %s6025_s22  ;;  %v3537_v50 = vsel %vm1902_vm11, %v3505_v37, %v5610_v27  ;;  %v3538_v47 = vsel %vm1902_vm11, %v3506_v8, %v5611_v36  ;;  %v3443_v27 = vsel %vm1704_vm5, %v8195_v23, %v5590_v28  ;;  %v9698_v8 = vld [vmem:[#allocation36_spill] sm:$0xff] }
 0x327   : > { %v5614_v29 = vpop.permute.xlu1 %5613  ;;  %v5331_v37 = vunpack.i.h.bf16 %v9698_v8 }
 0x328   : > { %v5616_v42 = vunpack.i.h.bf16 %v5614_v29  ;;  %v5615_v38 = vunpack.i.l.bf16 %v5614_v29  ;;  %v8598_v49 = vpop.permute.xlu0 %5638 }
 0x329   : > { %5893 = vrot.lane.b32.xlu1 %v8041_v14, %s6023_s27  ;;  %v5591_v14 = vunpack.i.h.bf16 %v8553_v44 }
 0x32a   : > { %v3570_v16 = vsel %vm3549_vm14, %v3537_v50, %v5615_v38  ;;  %v3571_v48 = vsel %vm3549_vm14, %v3538_v47, %v5616_v42  ;;  %5938 = vrot.lane.b32.xlu0 %v5937_v32, %s6022_s25  ;;  %v5330_v42 = vunpack.i.l.bf16 %v9698_v8  ;;  %v5570_v38 = vunpack.i.l.bf16 %v8516_v60  ;;  %v9699_v50 = vld [vmem:[#allocation37_spill] sm:$0xff] }
 0x32b   : > { %v3603_v2 = vsel %vm3582_vm15, %v3570_v16, %v5545_v63  ;;  %v3604_v1 = vsel %vm3582_vm15, %v3571_v48, %v5546_v59  ;;  %v8615_v51 = vpop.permute.xlu1 %5623  ;;  %v3444_v36 = vsel %vm1704_vm5, %v8119_v35, %v5591_v14  ;;  %v5336_v47 = vunpack.i.h.bf16 %v9699_v50 }
 0x32c   : > { %v8619_v58 = vpop.permute.xlu0 %5643  ;;  %v3636_v26 = vsel %vm3615_vm0, %v3603_v2, %v5580_v56  ;;  %v3637_v61 = vsel %vm3615_vm0, %v3604_v1, %v5581_v12  ;;  %v3476_v22 = vsel %vm1770_vm7, %v3444_v36, %v5596_v40  ;;  %v5335_v12 = vunpack.i.l.bf16 %v9699_v50 }
 0x32d   : > { %5903 = vrot.lane.b32.xlu1 %v8071_v17, %s6024_s29  ;;  %v3669_v24 = vsel %vm3648_vm1, %v3636_v26, %v5585_v0  ;;  %v3670_v9 = vsel %vm3648_vm1, %v3637_v61, %v5586_v18  ;;  %v3475_v17 = vsel %vm1770_vm7, %v3443_v27, %v5595_v46  ;;  %v3508_v6 = vsel %vm1836_vm9, %v3476_v22, %v5541_v34  ;;  %v9700_v18 = vld [vmem:[#allocation2_spill] sm:$0xff]  ;;  %v9701_v0 = vld [vmem:[#allocation3_spill] sm:$0xff] }
 0x32e   : > { %5948 = vrot.lane.b32.xlu0 %v8046_v54, %s6023_s27  ;;  %v3691_v44 = vpack.c.bf16 %v3670_v9, %v3669_v24  ;;  %v3507_v23 = vsel %vm1836_vm9, %v3475_v17, %v5540_v52  ;;  %v5576_v56 = vunpack.i.h.bf16 %v8532_v55  ;;  %v5575_v16 = vunpack.i.l.bf16 %v8532_v55  ;;  %v9702_v17 = vld [vmem:[#allocation29_spill] sm:$0xff] }
 0x32f   : > { %v8631_v33 = vpop.permute.xlu1 %5633  ;;  %v3539_v7 = vsel %vm1902_vm11, %v3507_v23, %v5570_v38  ;;  %v5631_v2 = vunpack.i.h.bf16 %v8583_v57  ;;  %v5630_v1 = vunpack.i.l.bf16 %v8583_v57  ;;  %v5341_v24 = vunpack.i.h.bf16 %v8255_v62 }
 0x330   : > { %v8637_v19 = vpop.permute.xlu0 %5648  ;;  %4510 = vmatprep.mubr.msk.bf16.mxu1 %vm3740_vm2, %v3691_v44  ;;  %v3572_v14 = vsel %vm3549_vm14, %v3539_v7, %v5575_v16  ;;  %v5366_v9 = vunpack.i.h.bf16 %v8306_v25  ;;  %v5340_v22 = vunpack.i.l.bf16 %v8255_v62  ;;  %v5346_v34 = vunpack.i.h.bf16 %v8271_v5 }
 0x331   : > { %5913 = vrot.lane.b32.xlu1 %v5937_v32, %s6019_s19  ;;  %v5571_v32 = vunpack.i.h.bf16 %v8516_v60  ;;  %v3422_v60 = vsel %vm1704_vm5, %v9700_v18, %v5331_v37  ;;  %v3605_v44 = vsel %vm3582_vm15, %v3572_v14, %v5630_v1  ;;  %v5351_v8 = vunpack.i.h.bf16 %v8288_v10  ;;  %v9703_v18 = vld [vmem:[#allocation26_spill] sm:$0xff] }
 0x332   : > { %5958 = vrot.lane.b32.xlu0 %v8077_v4, %s6024_s29  ;;  %v3454_v46 = vsel %vm1770_vm7, %v3422_v60, %v5336_v47  ;;  %v5350_v38 = vunpack.i.l.bf16 %v8288_v10  ;;  %v5561_v7 = vunpack.i.h.bf16 %v8477_v13  ;;  %v5371_v60 = vunpack.i.h.bf16 %v8314_v43 }
 0x333   : > { %v8647_v35 = vpop.permute.xlu1 %5658  ;;  %v3540_v59 = vsel %vm1902_vm11, %v3508_v6, %v5571_v32  ;;  %v5345_v6 = vunpack.i.l.bf16 %v8271_v5  ;;  %v8703_v16 = vsel %vm1836_vm9, %v3454_v46, %v5366_v9  ;;  %v5395_v1 = vunpack.i.l.bf16 %v8336_v39  ;;  %v9705_v46 = vld [vmem:[#allocation31_spill] sm:$0xff] }
 0x334   : > { %v8651_v29 = vpop.permute.xlu0 %5653  ;;  %v3573_v28 = vsel %vm3549_vm14, %v3540_v59, %v5576_v56  ;;  %v5560_v59 = vunpack.i.l.bf16 %v8477_v13  ;;  %v5355_v56 = vunpack.i.l.bf16 %v8304_v45  ;;  %v5566_v13 = vunpack.i.h.bf16 %v8499_v21 }
 0x335   : > { %5923 = vrot.lane.b32.xlu1 %v8046_v54, %s6021_s24  ;;  %v3421_v54 = vsel %vm1704_vm5, %v9701_v0, %v5330_v42  ;;  %v5370_v0 = vunpack.i.l.bf16 %v8314_v43  ;;  %v5636_v14 = vunpack.i.h.bf16 %v8631_v33 }
 0x336   : > { %v8678_v40 = vsel %vm1770_vm7, %v3421_v54, %v5335_v12  ;;  %v5356_v12 = vunpack.i.h.bf16 %v8304_v45  ;;  %v5565_v54 = vunpack.i.l.bf16 %v8499_v21  ;;  %v3445_v9 = vsel %vm1704_vm5, %v9705_v46, %v5560_v59 }
 0x337   : > { %v8661_v63 = vpop.permute.xlu1 %5663  ;;  %v5660_v46 = vunpack.i.l.bf16 %v8647_v35 }
 0x338   : > { %v5679_v48 = vpop.permute.xlu0 %5678 }
 0x339   : > { %5933 = vrot.lane.b32.xlu1 %v8077_v4, %s6025_s22  ;;  %v5681_v26 = vunpack.i.h.bf16 %v5679_v48  ;;  %v5680_v55 = vunpack.i.l.bf16 %v5679_v48  ;;  %v3606_v4 = vsel %vm3582_vm15, %v3573_v28, %v5631_v2  ;;  %v5365_v48 = vunpack.i.l.bf16 %v8306_v25 }
 0x33a   : > { %v5390_v2 = vunpack.i.l.bf16 %v8323_v15  ;;  %v5635_v25 = vunpack.i.l.bf16 %v8631_v33  ;;  %v3477_v33 = vsel %vm1770_vm7, %v3445_v9, %v5565_v54  ;;  %v5666_v9 = vunpack.i.h.bf16 %v8661_v63 }
 0x33b   : > { %v5669_v61 = vpop.permute.xlu1 %5668  ;;  %v3638_v52 = vsel %vm3615_vm0, %v3605_v44, %v5680_v55  ;;  %v3639_v23 = vsel %vm3615_vm0, %v3606_v4, %v5681_v26  ;;  %v9704_v26 = vld [vmem:[#allocation32_spill] sm:$0xff] }
 0x33c   : > { %v5684_v57 = vpop.permute.xlu0 %5683  ;;  %v3446_v55 = vsel %vm1704_vm5, %v9704_v26, %v5561_v7  ;;  %v5670_v44 = vunpack.i.l.bf16 %v5669_v61  ;;  %v5626_v7 = vunpack.i.h.bf16 %v8615_v51 }
 0x33d   : > { %v5686_v36 = vunpack.i.h.bf16 %v5684_v57  ;;  %v5685_v27 = vunpack.i.l.bf16 %v5684_v57  ;;  %5943 = vrot.lane.b32.xlu1 %v9702_v17, %s6022_s25  ;;  %v5671_v57 = vunpack.i.h.bf16 %v5669_v61  ;;  %v5625_v61 = vunpack.i.l.bf16 %v8615_v51 }
 0x33e   : > { %v3447_v54 = vsel %vm1704_vm5, %v8294_v53, %v5670_v44 }
 0x33f   : > { %v3671_v37 = vsel %vm3648_vm1, %v3638_v52, %v5685_v27  ;;  %v3672_v42 = vsel %vm3648_vm1, %v3639_v23, %v5686_v36  ;;  %v5674_v32 = vpop.permute.xlu1 %5673  ;;  %v9706_v52 = vld [vmem:[#allocation33_spill] sm:$0xff]  ;;  %v3478_v23 = vsel %vm1770_vm7, %v3446_v55, %v5566_v13 }
 0x340   : > { %v3692_v50 = vpack.c.bf16 %v3672_v42, %v3671_v37  ;;  %v8698_v47 = vpop.permute.xlu0 %5698  ;;  %v5676_v4 = vunpack.i.h.bf16 %v5674_v32  ;;  %v5675_v36 = vunpack.i.l.bf16 %v5674_v32  ;;  %v5621_v37 = vunpack.i.h.bf16 %v8568_v31 }
 0x341   : > { %5953 = vrot.lane.b32.xlu1 %v9703_v18, %s6023_s27  ;;  %v5620_v42 = vunpack.i.l.bf16 %v8568_v31  ;;  %v3510_v59 = vsel %vm1836_vm9, %v3478_v23, %v5636_v14  ;;  %v3509_v32 = vsel %vm1836_vm9, %v3477_v33, %v5635_v25  ;;  %v3448_v18 = vsel %vm1704_vm5, %v8170_v30, %v5671_v57  ;;  %s9160_s27 = scalar_lea.vmem %s9312_s11, %s4383_s21 }
 0x342   : > { %4511 = vmatmul.mubr.msk.bf16.gmra.mrb[4].mxu1 %vm3740_vm2, %v3692_v50  ;;  %v3479_v31 = vsel %vm1770_vm7, %v3447_v54, %v5675_v36  ;;  %v3480_v55 = vsel %vm1770_vm7, %v3448_v18, %v5676_v4  ;;  %v5661_v25 = vunpack.i.h.bf16 %v8647_v35  ;;  %v5665_v57 = vunpack.i.l.bf16 %v8661_v63  ;;  %v9708_v18 = vld [vmem:[#allocation48_spill] sm:$0xff] }
 0x343   : > { %v5689_v28 = vpop.permute.xlu1 %5688  ;;  %v5651_v23 = vunpack.i.h.bf16 %v8637_v19  ;;  %v5650_v63 = vunpack.i.l.bf16 %v8637_v19  ;;  %v3426_v54 = vsel %vm1704_vm5, %v9708_v18, %v5371_v60 }
 0x344   : > { %v8721_v21 = vpop.permute.xlu0 %5708  ;;  %v5691_v27 = vunpack.i.h.bf16 %v5689_v28  ;;  %v5690_v17 = vunpack.i.l.bf16 %v5689_v28 }
 0x345   : > { %5963 = vrot.lane.b32.xlu1 %v9706_v52, %s6024_s29 }
 0x346   : > { %v3541_v51 = vsel %vm1902_vm11, %v3509_v32, %v5690_v17  ;;  %v3542_v14 = vsel %vm1902_vm11, %v3510_v59, %v5691_v27  ;;  %v3511_v27 = vsel %vm1836_vm9, %v3479_v31, %v5620_v42  ;;  %v3512_v17 = vsel %vm1836_vm9, %v3480_v55, %v5621_v37  ;;  %v9707_v42 = vld [vmem:[#allocation49_spill] sm:$0xff]  ;;  %v9709_v55 = vld [vmem:[#allocation14_spill] sm:$0xff] }
 0x347   : > { %v5694_v50 = vpop.permute.xlu1 %5693  ;;  %v3485_v59 = vsel %vm1836_vm9, %v8678_v40, %v5365_v48  ;;  %v5361_v32 = vunpack.i.h.bf16 %v9707_v42  ;;  %v5360_v37 = vunpack.i.l.bf16 %v9707_v42  ;;  %v3544_v19 = vsel %vm1902_vm11, %v3512_v17, %v5651_v23  ;;  %v9714_v23 = vld [vmem:[#allocation42_spill] sm:$0xff] }
 0x348   : > { %v5696_v13 = vunpack.i.h.bf16 %v5694_v50  ;;  %v5695_v28 = vunpack.i.l.bf16 %v5694_v50  ;;  %v8737_v26 = vpop.permute.xlu0 %5718  ;;  %v5396_v40 = vunpack.i.h.bf16 %v8336_v39  ;;  %v5656_v48 = vunpack.i.h.bf16 %v8651_v29  ;;  %v9713_v39 = vld [vmem:[#allocation41_spill] sm:$0xff] }
 0x349   : > { %v5381_v17 = vunpack.i.h.bf16 %v9713_v39 }
 0x34a   : > { %v3574_v30 = vsel %vm3549_vm14, %v3541_v51, %v5695_v28  ;;  %v3575_v53 = vsel %vm3549_vm14, %v3542_v14, %v5696_v13  ;;  %v5391_v13 = vunpack.i.h.bf16 %v8323_v15  ;;  %v3543_v28 = vsel %vm1902_vm11, %v3511_v27, %v5650_v63  ;;  %v9710_v15 = vld [vmem:[#allocation21_spill] sm:$0xff] }
 0x34b   : > { %v3607_v44 = vsel %vm3582_vm15, %v3574_v30, %v5625_v61  ;;  %v3608_v4 = vsel %vm3582_vm15, %v3575_v53, %v5626_v7  ;;  %v8751_v36 = vpop.permute.xlu1 %5703  ;;  %v3423_v51 = vsel %vm1704_vm5, %v9709_v55, %v5390_v2  ;;  %v5655_v14 = vunpack.i.l.bf16 %v8651_v29 }
 0x34c   : > { %v8755_v52 = vpop.permute.xlu0 %5723  ;;  %v3640_v35 = vsel %vm3615_vm0, %v3607_v44, %v5660_v46  ;;  %v3641_v33 = vsel %vm3615_vm0, %v3608_v4, %v5661_v25  ;;  %v3425_v60 = vsel %vm1704_vm5, %v9710_v15, %v5370_v0  ;;  %v3455_v46 = vsel %vm1770_vm7, %v3423_v51, %v5395_v1  ;;  %v9711_v44 = vld [vmem:[#allocation11_spill] sm:$0xff]  ;;  %v9712_v4 = vld [vmem:[#allocation30_spill] sm:$0xff] }
 0x34d   : > { %v3673_v61 = vsel %vm3648_vm1, %v3640_v35, %v5665_v57  ;;  %v3674_v7 = vsel %vm3648_vm1, %v3641_v33, %v5666_v9  ;;  %v5711_v2 = vunpack.i.h.bf16 %v8721_v21  ;;  %v5710_v30 = vunpack.i.l.bf16 %v8721_v21 }
 0x34e   : > { %v3693_v50 = vpack.c.bf16 %v3674_v7, %v3673_v61  ;;  %v3576_v53 = vsel %vm3549_vm14, %v3543_v28, %v5655_v14  ;;  %v3577_v29 = vsel %vm3549_vm14, %v3544_v19, %v5656_v48  ;;  %v3424_v43 = vsel %vm1704_vm5, %v9711_v44, %v5391_v13  ;;  %v9715_v28 = vld [vmem:[#allocation46_spill] sm:$0xff]  ;;  %v9716_v48 = vld [vmem:[#allocation47_spill] sm:$0xff] }
 0x34f   : > { %v8772_v31 = vpop.permute.xlu1 %5713  ;;  %v5376_v27 = vunpack.i.h.bf16 %v9712_v4  ;;  %v5375_v0 = vunpack.i.l.bf16 %v9712_v4  ;;  %v3456_v35 = vsel %vm1770_vm7, %v3424_v43, %v5396_v40  ;;  %v5380_v21 = vunpack.i.l.bf16 %v9713_v39 }
 0x350   : > { %v5749_v25 = vpop.permute.xlu0 %5748  ;;  %4514 = vmatprep.mubr.msk.bf16.mxu1 %vm3740_vm2, %v3693_v50  ;;  %v3487_v33 = vsel %vm1836_vm9, %v3455_v46, %v5355_v56  ;;  %v5386_v63 = vunpack.i.h.bf16 %v9714_v23  ;;  %v3609_v7 = vsel %vm3582_vm15, %v3576_v53, %v5710_v30  ;;  %v3610_v50 = vsel %vm3582_vm15, %v3577_v29, %v5711_v2  ;;  %v9717_v53 = vld [vmem:[#allocation27_spill] sm:$0xff] }
 0x351   : > { %v5751_v9 = vunpack.i.h.bf16 %v5749_v25  ;;  %v5750_v57 = vunpack.i.l.bf16 %v5749_v25  ;;  %v5401_v19 = vunpack.i.h.bf16 %v9715_v28  ;;  %v5400_v55 = vunpack.i.l.bf16 %v9715_v28 }
 0x352   : > { %v5406_v14 = vunpack.i.h.bf16 %v9716_v48  ;;  %v5405_v56 = vunpack.i.l.bf16 %v9716_v48  ;;  %v3488_v2 = vsel %vm1836_vm9, %v3456_v35, %v5356_v12  ;;  %v5385_v30 = vunpack.i.l.bf16 %v9714_v23 }
 0x353   : > { %v8796_v1 = vpop.permute.xlu1 %5728  ;;  %v3642_v51 = vsel %vm3615_vm0, %v3609_v7, %v5750_v57  ;;  %v3643_v40 = vsel %vm3615_vm0, %v3610_v50, %v5751_v9  ;;  %v5410_v29 = vunpack.i.l.bf16 %v9717_v53  ;;  %v3457_v44 = vsel %vm1770_vm7, %v3425_v60, %v5375_v0 }
 0x354   : > { %v5754_v61 = vpop.permute.xlu0 %5753  ;;  %v3519_v43 = vsel %vm1902_vm11, %v3487_v33, %v5380_v21  ;;  %v5411_v4 = vunpack.i.h.bf16 %v9717_v53  ;;  %v5640_v39 = vunpack.i.l.bf16 %v8598_v49  ;;  %v3518_v45 = vsel %vm1902_vm11, %v8703_v16, %v5401_v19  ;;  %v9719_v19 = vld [vmem:[#allocation43_spill] sm:$0xff]  ;;  %v9720_v53 = vld [vmem:[#allocation34_spill] sm:$0xff] }
 0x355   : > { %v5756_v18 = vunpack.i.h.bf16 %v5754_v61  ;;  %v5755_v13 = vunpack.i.l.bf16 %v5754_v61  ;;  %v3517_v12 = vsel %vm1902_vm11, %v3485_v59, %v5400_v55  ;;  %v5641_v35 = vunpack.i.h.bf16 %v8598_v49 }
 0x356   : > { %v5645_v23 = vunpack.i.l.bf16 %v8619_v58  ;;  %v3520_v61 = vsel %vm1902_vm11, %v3488_v2, %v5381_v17  ;;  %v3550_v60 = vsel %vm3549_vm14, %v3517_v12, %v5405_v56  ;;  %v3551_v0 = vsel %vm3549_vm14, %v3518_v45, %v5406_v14 }
 0x357   : > { %v3675_v25 = vsel %vm3648_vm1, %v3642_v51, %v5755_v13  ;;  %v3676_v15 = vsel %vm3648_vm1, %v3643_v40, %v5756_v18  ;;  %v8814_v46 = vpop.permute.xlu1 %5733  ;;  %v5646_v21 = vunpack.i.h.bf16 %v8619_v58  ;;  %v3458_v7 = vsel %vm1770_vm7, %v3426_v54, %v5376_v27  ;;  %v9718_v18 = vld [vmem:[#allocation23_spill] sm:$0xff] }
 0x358   : > { %v3694_v57 = vpack.c.bf16 %v3676_v15, %v3675_v25  ;;  %v8821_v9 = vpop.permute.xlu0 %5758  ;;  %v3552_v16 = vsel %vm3549_vm14, %v3519_v43, %v5385_v30  ;;  %v3553_v59 = vsel %vm3549_vm14, %v3520_v61, %v5386_v63  ;;  %v8841_v49 = vsel %vm1836_vm9, %v3457_v44, %v5410_v29 }
 0x359   : > { %v8846_v17 = vsel %vm1836_vm9, %v3458_v7, %v5411_v4  ;;  %v3449_v13 = vsel %vm1704_vm5, %v9718_v18, %v5640_v39  ;;  %v3450_v54 = vsel %vm1704_vm5, %v9719_v19, %v5641_v35  ;;  %v8856_v63 = vsel %vm3582_vm15, %v3550_v60, %v5360_v37 }
 0x35a   : > { %4515 = vmatmul.mubr.msk.bf16.gmra.mrb[8].mxu1 %vm3740_vm2, %v3694_v57  ;;  %v3481_v27 = vsel %vm1770_vm7, %v3449_v13, %v5645_v23  ;;  %v8861_v55 = vsel %vm3582_vm15, %v3551_v0, %v5361_v32  ;;  %v3482_v51 = vsel %vm1770_vm7, %v3450_v54, %v5646_v21  ;;  %v5701_v40 = vunpack.i.h.bf16 %v8698_v47  ;;  %v9721_v57 = vld [vmem:[#allocation10_spill] sm:$0xff] }
 0x35b   : > { %v5739_v33 = vpop.permute.xlu1 %5738  ;;  %v5700_v48 = vunpack.i.l.bf16 %v8698_v47  ;;  %v5716_v14 = vunpack.i.h.bf16 %v8772_v31  ;;  %v5721_v25 = vunpack.i.h.bf16 %v8737_v26  ;;  %v5720_v15 = vunpack.i.l.bf16 %v8737_v26 }
 0x35c   : > { %v8843_v50 = vpop.permute.xlu0 %5778  ;;  %v5741_v28 = vunpack.i.h.bf16 %v5739_v33  ;;  %v5740_v58 = vunpack.i.l.bf16 %v5739_v33  ;;  %v5706_v42 = vunpack.i.h.bf16 %v8751_v36  ;;  %v5705_v32 = vunpack.i.l.bf16 %v8751_v36 }
 0x35d   : > { %v5726_v44 = vunpack.i.h.bf16 %v8755_v52  ;;  %v5715_v43 = vunpack.i.l.bf16 %v8772_v31  ;;  %v5725_v39 = vunpack.i.l.bf16 %v8755_v52  ;;  %v3514_v45 = vsel %vm1836_vm9, %v3482_v51, %v5716_v14 }
 0x35e   : > { %v3452_v29 = vsel %vm1704_vm5, %v9720_v53, %v5741_v28  ;;  %v3451_v47 = vsel %vm1704_vm5, %v9721_v57, %v5740_v58  ;;  %v5761_v23 = vunpack.i.h.bf16 %v8821_v9  ;;  %v5760_v61 = vunpack.i.l.bf16 %v8821_v9 }
 0x35f   : > { %v5744_v56 = vpop.permute.xlu1 %5743  ;;  %v3513_v18 = vsel %vm1836_vm9, %v3481_v27, %v5715_v43  ;;  %v5731_v13 = vunpack.i.h.bf16 %v8796_v1  ;;  %v5730_v58 = vunpack.i.l.bf16 %v8796_v1  ;;  %v5736_v19 = vunpack.i.h.bf16 %v8814_v46 }
 0x360   : > { %v5746_v37 = vunpack.i.h.bf16 %v5744_v56  ;;  %v5745_v2 = vunpack.i.l.bf16 %v5744_v56  ;;  %v8869_v30 = vpop.permute.xlu0 %5788  ;;  %v5735_v54 = vunpack.i.l.bf16 %v8814_v46  ;;  %v5780_v51 = vunpack.i.l.bf16 %v8843_v50 }
 0x361   : > { %v3585_v27 = vsel %vm3582_vm15, %v3552_v16, %v5760_v61  ;;  %v5790_v16 = vunpack.i.l.bf16 %v8869_v30 }
 0x362   : > { %v3483_v26 = vsel %vm1770_vm7, %v3451_v47, %v5745_v2  ;;  %v3484_v4 = vsel %vm1770_vm7, %v3452_v29, %v5746_v37  ;;  %v3618_v37 = vsel %vm3615_vm0, %v3585_v27, %v5780_v51  ;;  %v5791_v2 = vunpack.i.h.bf16 %v8869_v30 }
 0x363   : > { %v3515_v36 = vsel %vm1836_vm9, %v3483_v26, %v5700_v48  ;;  %v3516_v12 = vsel %vm1836_vm9, %v3484_v4, %v5701_v40  ;;  %v5764_v35 = vpop.permute.xlu1 %5763  ;;  %v3586_v48 = vsel %vm3582_vm15, %v3553_v59, %v5761_v23  ;;  %v3651_v26 = vsel %vm3648_vm1, %v3618_v37, %v5790_v16  ;;  %v9722_v37 = vld [vmem:[#allocation5_spill] sm:$0xff] }
 0x364   : > { %v3547_v60 = vsel %vm1902_vm11, %v3515_v36, %v5720_v15  ;;  %v3548_v31 = vsel %vm1902_vm11, %v3516_v12, %v5721_v25  ;;  %v8889_v0 = vpop.permute.xlu0 %5798  ;;  %v5766_v33 = vunpack.i.h.bf16 %v5764_v35  ;;  %v5765_v7 = vunpack.i.l.bf16 %v5764_v35 }
 0x365   : > { %v3580_v21 = vsel %vm3549_vm14, %v3547_v60, %v5725_v39  ;;  %v3581_v52 = vsel %vm3549_vm14, %v3548_v31, %v5726_v44  ;;  %v5781_v25 = vunpack.i.h.bf16 %v8843_v50  ;;  %v5975_v39 = vld [vmem:[%s6124_s26] sm:$0xff]  ;;  %v5801_v10 = vunpack.i.h.bf16 %v8889_v0 }
 0x366   : > { %v3613_v9 = vsel %vm3582_vm15, %v3580_v21, %v5340_v22  ;;  %v3614_v28 = vsel %vm3582_vm15, %v3581_v52, %v5341_v24  ;;  %v3545_v62 = vsel %vm1902_vm11, %v3513_v18, %v5765_v7  ;;  %v3546_v24 = vsel %vm1902_vm11, %v3514_v45, %v5766_v33  ;;  %v5976_v45 = vld [vmem:[%s6124_s26 + $0x8] sm:$0xff] }
 0x367   : > { %v5769_v40 = vpop.permute.xlu1 %5768  ;;  %v3646_v1 = vsel %vm3615_vm0, %v3613_v9, %v5345_v6  ;;  %v3647_v46 = vsel %vm3615_vm0, %v3614_v28, %v5346_v34  ;;  %v3619_v43 = vsel %vm3615_vm0, %v3586_v48, %v5781_v25  ;;  %v3954_v36 = vpack.c.bf16 %v5976_v45, %v5975_v39  ;;  %v9728_v39 = vld [vmem:[#allocation59_spill] sm:$0xff] }
 0x368   : > { %v5771_v14 = vunpack.i.h.bf16 %v5769_v40  ;;  %v5770_v56 = vunpack.i.l.bf16 %v5769_v40  ;;  %v5809_v22 = vpop.permute.xlu0 %5808  ;;  %v3679_v57 = vsel %vm3648_vm1, %v3646_v1, %v5350_v38  ;;  %v3680_v30 = vsel %vm3648_vm1, %v3647_v46, %v5351_v8 }
 0x369   : > { %v3652_v38 = vsel %vm3648_vm1, %v3619_v43, %v5791_v2  ;;  %v5800_v8 = vunpack.i.l.bf16 %v8889_v0  ;;  %v3696_v35 = vpack.c.bf16 %v3680_v30, %v3679_v57  ;;  %v5811_v23 = vunpack.i.h.bf16 %v5809_v22  ;;  %v9723_v2 = vld [vmem:[#allocation4_spill] sm:$0xff] }
 0x36a   : > { %v3578_v59 = vsel %vm3549_vm14, %v3545_v62, %v5770_v56  ;;  %v3579_v15 = vsel %vm3549_vm14, %v3546_v24, %v5771_v14  ;;  %v5810_v61 = vunpack.i.l.bf16 %v5809_v22  ;;  %v5977_v62 = vld [vmem:[%s6124_s26 + $0x20] sm:$0xff]  ;;  %v5978_v24 = vld [vmem:[%s6124_s26 + $0x28] sm:$0xff]  ;;  %v5979_v43 = vld [vmem:[%s6124_s26 + $0x30] sm:$0xff]  ;;  %v5431_v45 = vunpack.i.h.bf16 %v9728_v39 }
 0x36b   : > { %v3611_v53 = vsel %vm3582_vm15, %v3578_v59, %v5705_v32  ;;  %v3612_v5 = vsel %vm3582_vm15, %v3579_v15, %v5706_v42  ;;  %v5774_v6 = vpop.permute.xlu1 %5773  ;;  %v3956_v1 = vpack.c.bf16 %v5978_v24, %v5977_v62 }
 0x36c   : > { %v5819_v34 = vpop.permute.xlu0 %5818  ;;  %v3644_v50 = vsel %vm3615_vm0, %v3611_v53, %v5730_v58  ;;  %v3645_v29 = vsel %vm3615_vm0, %v3612_v5, %v5731_v13  ;;  %v5776_v47 = vunpack.i.h.bf16 %v5774_v6  ;;  %v5775_v44 = vunpack.i.l.bf16 %v5774_v6  ;;  %v9725_v5 = vld [vmem:[#allocation38_spill] sm:$0xff] }
 0x36d   : > { %v3677_v32 = vsel %vm3648_vm1, %v3644_v50, %v5735_v54  ;;  %v3678_v42 = vsel %vm3648_vm1, %v3645_v29, %v5736_v19  ;;  %v5821_v7 = vunpack.i.h.bf16 %v5819_v34  ;;  %v5820_v18 = vunpack.i.l.bf16 %v5819_v34  ;;  %v9726_v29 = vld [vmem:[#allocation58_spill] sm:$0xff] }
 0x36e   : > { %v3695_v4 = vpack.c.bf16 %v3678_v42, %v3677_v32  ;;  %v3616_v52 = vsel %vm3615_vm0, %v8856_v63, %v5775_v44  ;;  %v3617_v33 = vsel %vm3615_vm0, %v8861_v55, %v5776_v47  ;;  %v3521_v58 = vsel %vm1902_vm11, %v8841_v49, %v5800_v8  ;;  %v9727_v44 = vld [vmem:[#allocation35_spill] sm:$0xff] }
 0x36f   : > { %v5784_v12 = vpop.permute.xlu1 %5783  ;;  %v3522_v63 = vsel %vm1902_vm11, %v8846_v17, %v5801_v10  ;;  %v3682_v54 = vpack.c.bf16 %v3652_v38, %v3651_v26  ;;  %v3554_v51 = vsel %vm3549_vm14, %v3521_v58, %v5810_v61  ;;  %v9724_v53 = vpack.c.bf16 %v9722_v37, %v9723_v2  ;;  %v5980_v26 = vld [vmem:[%s6124_s26 + $0x38] sm:$0xff]  ;;  %v5981_v38 = vld [vmem:[%s6124_s26 + $0x40] sm:$0xff]  ;;  %v5982_v10 = vld [vmem:[%s6124_s26 + $0x48] sm:$0xff] }
 0x370   : > { %v5786_v60 = vunpack.i.h.bf16 %v5784_v12  ;;  %v5785_v31 = vunpack.i.l.bf16 %v5784_v12  ;;  %v5829_v21 = vpop.permute.xlu0 %5828  ;;  %4518 = vmatprep.mubr.msk.bf16.mxu1 %vm3740_vm2, %v3695_v4  ;;  %v3555_v40 = vsel %vm3549_vm14, %v3522_v63, %v5811_v23  ;;  %v3587_v48 = vsel %vm3582_vm15, %v3554_v51, %v5820_v18  ;;  %v9729_v12 = vld [vmem:[#allocation17_spill] sm:$0xff]  ;;  %v9730_v23 = vld [vmem:[#allocation18_spill] sm:$0xff] }
 0x371   : > { %4519 = vmatmul.mubr.msk.bf16.gmra.mrb[12].mxu1 %vm3740_vm2, %v3696_v35  ;;  %v5831_v9 = vunpack.i.h.bf16 %v5829_v21  ;;  %v5830_v28 = vunpack.i.l.bf16 %v5829_v21  ;;  %v3588_v14 = vsel %vm3582_vm15, %v3555_v40, %v5821_v7  ;;  %v5416_v6 = vunpack.i.h.bf16 %v9725_v5 }
 0x372   : > { %v3649_v0 = vsel %vm3648_vm1, %v3616_v52, %v5785_v31  ;;  %v3650_v13 = vsel %vm3648_vm1, %v3617_v33, %v5786_v60  ;;  %4524 = vmatprep.mubr.msk.bf16.mxu1 %vm1671_vm4, %v3954_v36  ;;  %v5415_v34 = vunpack.i.l.bf16 %v9725_v5  ;;  %v5426_v57 = vunpack.i.h.bf16 %v9726_v29  ;;  %v9731_v31 = vld [vmem:[#allocation24_spill] sm:$0xff]  ;;  %v9732_v52 = vld [vmem:[#allocation22_spill] sm:$0xff] }
 0x373   : > { %v3681_v55 = vpack.c.bf16 %v3650_v13, %v3649_v0  ;;  %v8953_v19 = vpop.permute.xlu1 %5793  ;;  %v3620_v17 = vsel %vm3615_vm0, %v3587_v48, %v5830_v28  ;;  %v3621_v22 = vsel %vm3615_vm0, %v3588_v14, %v5831_v9  ;;  %v5425_v30 = vunpack.i.l.bf16 %v9726_v29  ;;  %v5983_v48 = vld [vmem:[%s6124_s26 + $0x50] sm:$0xff]  ;;  %v5984_v14 = vld [vmem:[%s6124_s26 + $0x58] sm:$0xff] }
 0x374   : > { %v5839_v27 = vpop.permute.xlu0 %5838  ;;  %v5421_v32 = vunpack.i.h.bf16 %v9727_v44  ;;  %v5420_v42 = vunpack.i.l.bf16 %v9727_v44  ;;  %v3957_v4 = vpack.c.bf16 %v5980_v26, %v5979_v43  ;;  %v5430_v36 = vunpack.i.l.bf16 %v9728_v39 }
 0x375   : > { %v5841_v56 = vunpack.i.h.bf16 %v5839_v27  ;;  %v5840_v49 = vunpack.i.l.bf16 %v5839_v27  ;;  %4490 = vmatprep.mubr.msk.bf16.mxu0 %vm3740_vm2, %v3681_v55  ;;  %v3958_v8 = vpack.c.bf16 %v5982_v10, %v5981_v38  ;;  %v3430_v35 = vsel %vm1704_vm5, %v9729_v12, %v5416_v6 }
 0x376   : > { %4491 = vmatmul.mubr.msk.bf16.vlgmr.msra.gmra.mrb[32].mxu0 %vm3740_vm2, %v3682_v54  ;;  %v3429_v61 = vsel %vm1704_vm5, %v9730_v23, %v5415_v34  ;;  %v3428_v21 = vsel %vm1704_vm5, %v9731_v31, %v5426_v57  ;;  %v3427_v33 = vsel %vm1704_vm5, %v9732_v52, %v5425_v30  ;;  %v5796_v7 = vunpack.i.h.bf16 %v8953_v19  ;;  %v5987_v52 = vld [vmem:[%s6124_s26 + $0x70] sm:$0xff] }
 0x377   : > { %v3653_v46 = vsel %vm3648_vm1, %v3620_v17, %v5840_v49  ;;  %v3654_v25 = vsel %vm3648_vm1, %v3621_v22, %v5841_v56  ;;  %v5804_v16 = vpop.permute.xlu1 %5803  ;;  %v5795_v18 = vunpack.i.l.bf16 %v8953_v19  ;;  %v3461_v13 = vsel %vm1770_vm7, %v3429_v61, %v5420_v42  ;;  %v5985_v49 = vld [vmem:[%s6124_s26 + $0x60] sm:$0xff]  ;;  %v5986_v17 = vld [vmem:[%s6124_s26 + $0x68] sm:$0xff] }
 0x378   : > { %v3683_v59 = vpack.c.bf16 %v3654_v25, %v3653_v46  ;;  %v5849_v15 = vpop.permute.xlu0 %5848  ;;  %v3462_v9 = vsel %vm1770_vm7, %v3430_v35, %v5421_v32  ;;  %v5806_v28 = vunpack.i.h.bf16 %v5804_v16  ;;  %v5805_v58 = vunpack.i.l.bf16 %v5804_v16 }
 0x379   : > { %4525 = vmatmul.mubr.msk.bf16.vlgmr.msra.gmra.mrb[16].mxu1 %vm1671_vm4, %v9724_v53  ;;  %v3459_v63 = vsel %vm1770_vm7, %v3427_v33, %v5430_v36  ;;  %v3460_v55 = vsel %vm1770_vm7, %v3428_v21, %v5431_v45  ;;  %v5851_v54 = vunpack.i.h.bf16 %v5849_v15  ;;  %v5850_v51 = vunpack.i.l.bf16 %v5849_v15  ;;  %v5988_v33 = vld [vmem:[%s6124_s26 + $0x78] sm:$0xff] }
 0x37a   : > { %4494 = vmatprep.mubr.msk.bf16.mxu0 %vm3740_vm2, %v3683_v59  ;;  %4528 = vmatprep.mubr.msk.bf16.mxu1 %vm1671_vm4, %v3956_v1  ;;  %v3959_v56 = vpack.c.bf16 %v5984_v14, %v5983_v48  ;;  %v3960_v22 = vpack.c.bf16 %v5986_v17, %v5985_v49  ;;  %v3491_v62 = vsel %vm1836_vm9, %v3459_v63, %v5795_v18  ;;  %v5989_v63 = vld [vmem:[%s6124_s26 + $0x80] sm:$0xff]  ;;  %v9733_v14 = vld [vmem:[#allocation44_spill] sm:$0xff] }
 0x37b   : > { %v5814_v50 = vpop.permute.xlu1 %5813  ;;  %v3492_v24 = vsel %vm1836_vm9, %v3460_v55, %v5796_v7  ;;  %v3523_v16 = vsel %vm1902_vm11, %v3491_v62, %v5805_v58  ;;  %v3493_v2 = vsel %vm1836_vm9, %v3461_v13, %v5850_v51  ;;  %v3494_v53 = vsel %vm1836_vm9, %v3462_v9, %v5851_v54  ;;  %v5990_v55 = vld [vmem:[%s6124_s26 + $0x88] sm:$0xff] }
 0x37c   : > { %v8977_v47 = vpop.permute.xlu0 %5858  ;;  %v5816_v19 = vunpack.i.h.bf16 %v5814_v50  ;;  %v5815_v40 = vunpack.i.l.bf16 %v5814_v50  ;;  %v3524_v59 = vsel %vm1902_vm11, %v3492_v24, %v5806_v28  ;;  %v3961_v7 = vpack.c.bf16 %v5988_v33, %v5987_v52  ;;  %v5998_v52 = vld [vmem:[%s6124_s26 + $0xc8] sm:$0xff] }
 0x37d   : > { %v5861_v5 = vunpack.i.h.bf16 %v8977_v47  ;;  %v5860_v6 = vunpack.i.l.bf16 %v8977_v47  ;;  %v3962_v54 = vpack.c.bf16 %v5990_v55, %v5989_v63  ;;  %v5445_v49 = vunpack.i.l.bf16 %v9733_v14 }
 0x37e   : > { %v3556_v34 = vsel %vm3549_vm14, %v3523_v16, %v5815_v40  ;;  %v3557_v50 = vsel %vm3549_vm14, %v3524_v59, %v5816_v19  ;;  %v5991_v59 = vld [vmem:[%s6124_s26 + $0x90] sm:$0xff] }
 0x37f   : > { %v5824_v60 = vpop.permute.xlu1 %5823  ;;  %v3525_v12 = vsel %vm1902_vm11, %v3493_v2, %v5860_v6  ;;  %v3526_v35 = vsel %vm1902_vm11, %v3494_v53, %v5861_v5  ;;  %v9736_v2 = vld [vmem:[#allocation12_spill] sm:$0xff]  ;;  %v5993_v6 = vld [vmem:[%s6124_s26 + $0xa0] sm:$0xff] }
 0x380   : > { %v5869_v0 = vpop.permute.xlu0 %5868  ;;  %v5826_v1 = vunpack.i.h.bf16 %v5824_v60  ;;  %v5825_v46 = vunpack.i.l.bf16 %v5824_v60  ;;  %v5441_v53 = vunpack.i.h.bf16 %v9736_v2  ;;  %v5440_v5 = vunpack.i.l.bf16 %v9736_v2 }
 0x381   : > { %4529 = vmatmul.mubr.msk.bf16.gmra.mrb[20].mxu1 %vm1671_vm4, %v3957_v4  ;;  %v5871_v29 = vunpack.i.h.bf16 %v5869_v0  ;;  %v5870_v57 = vunpack.i.l.bf16 %v5869_v0 }
 0x382   : > { %4532 = vmatprep.mubr.msk.bf16.mxu1 %vm1671_vm4, %v3958_v8  ;;  %v3589_v44 = vsel %vm3582_vm15, %v3556_v34, %v5825_v46  ;;  %v3590_v32 = vsel %vm3582_vm15, %v3557_v50, %v5826_v1  ;;  %v9735_v46 = vld [vmem:[#allocation8_spill] sm:$0xff]  ;;  %v5994_v34 = vld [vmem:[%s6124_s26 + $0xa8] sm:$0xff] }
 0x383   : > { %v5834_v27 = vpop.permute.xlu1 %5833  ;;  %v3558_v60 = vsel %vm3549_vm14, %v3525_v12, %v5870_v57  ;;  %v3559_v31 = vsel %vm3549_vm14, %v3526_v35, %v5871_v29  ;;  %v5450_v16 = vunpack.i.l.bf16 %v9735_v46  ;;  %v3964_v50 = vpack.c.bf16 %v5994_v34, %v5993_v6  ;;  %v9737_v29 = vld [vmem:[#allocation25_spill] sm:$0xff] }
 0x384   : > { %v5879_v25 = vpop.permute.xlu0 %5878  ;;  %v5836_v15 = vunpack.i.h.bf16 %v5834_v27  ;;  %v5835_v37 = vunpack.i.l.bf16 %v5834_v27 }
 0x385   : > { %v5881_v47 = vunpack.i.h.bf16 %v5879_v25  ;;  %v5880_v45 = vunpack.i.l.bf16 %v5879_v25  ;;  %v5451_v25 = vunpack.i.h.bf16 %v9735_v46 }
 0x386   : > { %v3622_v4 = vsel %vm3615_vm0, %v3589_v44, %v5835_v37  ;;  %v3623_v39 = vsel %vm3615_vm0, %v3590_v32, %v5836_v15  ;;  %v5992_v15 = vld [vmem:[%s6124_s26 + $0x98] sm:$0xff] }
 0x387   : > { %v5844_v30 = vpop.permute.xlu1 %5843  ;;  %v3591_v18 = vsel %vm3582_vm15, %v3558_v60, %v5880_v45  ;;  %v3592_v0 = vsel %vm3582_vm15, %v3559_v31, %v5881_v47  ;;  %v3963_v37 = vpack.c.bf16 %v5992_v15, %v5991_v59  ;;  %v5996_v60 = vld [vmem:[%s6124_s26 + $0xb8] sm:$0xff] }
 0x388   : > { %v5846_v42 = vunpack.i.h.bf16 %v5844_v30  ;;  %v5845_v43 = vunpack.i.l.bf16 %v5844_v30  ;;  %v5889_v26 = vpop.permute.xlu0 %5888  ;;  %v9738_v30 = vld [vmem:[#allocation28_spill] sm:$0xff] }
 0x389   : > { %4533 = vmatmul.mubr.msk.bf16.gmra.mrb[24].mxu1 %vm1671_vm4, %v3959_v56  ;;  %v5891_v10 = vunpack.i.h.bf16 %v5889_v26  ;;  %v5890_v8 = vunpack.i.l.bf16 %v5889_v26  ;;  %v5446_v56 = vunpack.i.h.bf16 %v9733_v14  ;;  %v3431_v44 = vsel %vm1704_vm5, %v9738_v30, %v5445_v49 }
 0x38a   : > { %v3655_v36 = vsel %vm3648_vm1, %v3622_v4, %v5845_v43  ;;  %v3656_v38 = vsel %vm3648_vm1, %v3623_v39, %v5846_v42  ;;  %4536 = vmatprep.mubr.msk.bf16.mxu1 %vm1671_vm4, %v3960_v22  ;;  %v9734_v22 = vld [vmem:[#allocation13_spill] sm:$0xff]  ;;  %v3463_v47 = vsel %vm1770_vm7, %v3431_v44, %v5450_v16  ;;  %v5999_v44 = vld [vmem:[%s6124_s26 + $0xd0] sm:$0xff] }
 0x38b   : > { %v3684_v23 = vpack.c.bf16 %v3656_v38, %v3655_v36  ;;  %v9027_v61 = vpop.permute.xlu1 %5853  ;;  %v3624_v28 = vsel %vm3615_vm0, %v3591_v18, %v5890_v8  ;;  %v3625_v58 = vsel %vm3615_vm0, %v3592_v0, %v5891_v10  ;;  %v5436_v62 = vunpack.i.h.bf16 %v9734_v22 }
 0x38c   : > { %v5899_v21 = vpop.permute.xlu0 %5898  ;;  %v5435_v24 = vunpack.i.l.bf16 %v9734_v22  ;;  %v3432_v57 = vsel %vm1704_vm5, %v9737_v29, %v5446_v56  ;;  %v5856_v26 = vunpack.i.h.bf16 %v9027_v61  ;;  %v5855_v4 = vunpack.i.l.bf16 %v9027_v61  ;;  %v5995_v61 = vld [vmem:[%s6124_s26 + $0xb0] sm:$0xff] }
 0x38d   : > { %v5901_v13 = vunpack.i.h.bf16 %v5899_v21  ;;  %v5900_v9 = vunpack.i.l.bf16 %v5899_v21  ;;  %4495 = vmatmul.mubr.msk.bf16.gmra.mrb[36].mxu0 %vm3740_vm2, %v3684_v23  ;;  %v3434_v42 = vsel %vm1704_vm5, %v7919_v20, %v5436_v62  ;;  %v3464_v45 = vsel %vm1770_vm7, %v3432_v57, %v5451_v25  ;;  %v5997_v21 = vld [vmem:[%s6124_s26 + $0xc0] sm:$0xff] }
 0x38e   : > { %v3433_v43 = vsel %vm1704_vm5, %v7908_v3, %v5435_v24  ;;  %v3466_v3 = vsel %vm1770_vm7, %v3434_v42, %v5441_v53  ;;  %v3965_v31 = vpack.c.bf16 %v5996_v60, %v5995_v61  ;;  %v3966_v33 = vpack.c.bf16 %v5998_v52, %v5997_v21  ;;  %v6004_v61 = vld [vmem:[%s6124_s26 + $0xf8] sm:$0xff] }
 0x38f   : > { %v3657_v51 = vsel %vm3648_vm1, %v3624_v28, %v5900_v9  ;;  %v3658_v19 = vsel %vm3648_vm1, %v3625_v58, %v5901_v13  ;;  %v5864_v40 = vpop.permute.xlu1 %5863  ;;  %v3465_v20 = vsel %vm1770_vm7, %v3433_v43, %v5440_v5  ;;  %v3496_v18 = vsel %vm1836_vm9, %v3464_v45, %v5856_v26 }
 0x390   : > { %v3685_v27 = vpack.c.bf16 %v3658_v19, %v3657_v51  ;;  %v5909_v48 = vpop.permute.xlu0 %5908  ;;  %v5866_v36 = vunpack.i.h.bf16 %v5864_v40  ;;  %v5865_v38 = vunpack.i.l.bf16 %v5864_v40 }
 0x391   : > { %4537 = vmatmul.mubr.msk.bf16.gmra.mrb[28].mxu1 %vm1671_vm4, %v3961_v7  ;;  %v5911_v10 = vunpack.i.h.bf16 %v5909_v48  ;;  %v5910_v8 = vunpack.i.l.bf16 %v5909_v48  ;;  %v3495_v7 = vsel %vm1836_vm9, %v3463_v47, %v5855_v4 }
 0x392   : > { %4498 = vmatprep.mubr.msk.bf16.mxu0 %vm3740_vm2, %v3685_v27  ;;  %4540 = vmatprep.mubr.msk.bf16.mxu1 %vm1671_vm4, %v3962_v54  ;;  %v3527_v28 = vsel %vm1902_vm11, %v3495_v7, %v5865_v38  ;;  %v3528_v58 = vsel %vm1902_vm11, %v3496_v18, %v5866_v36  ;;  %v6001_v36 = vld [vmem:[%s6124_s26 + $0xe0] sm:$0xff]  ;;  %v6002_v38 = vld [vmem:[%s6124_s26 + $0xe8] sm:$0xff]  ;;  %v9740_v7 = vld [vmem:[#allocation61_spill] sm:$0xff] }
 0x393   : > { %v5874_v17 = vpop.permute.xlu1 %5873  ;;  %v3497_v54 = vsel %vm1836_vm9, %v3465_v20, %v5910_v8  ;;  %v3498_v51 = vsel %vm1836_vm9, %v3466_v3, %v5911_v10  ;;  %v3968_v20 = vpack.c.bf16 %v6002_v38, %v6001_v36  ;;  %v5471_v18 = vunpack.i.h.bf16 %v9740_v7 }
 0x394   : > { %v9049_v1 = vpop.permute.xlu0 %5918  ;;  %v5876_v12 = vunpack.i.h.bf16 %v5874_v17  ;;  %v5875_v35 = vunpack.i.l.bf16 %v5874_v17 }
 0x395   : > { %v5921_v19 = vunpack.i.h.bf16 %v9049_v1  ;;  %v5920_v40 = vunpack.i.l.bf16 %v9049_v1 }
 0x396   : > { %v3560_v27 = vsel %vm3549_vm14, %v3527_v28, %v5875_v35  ;;  %v3561_v48 = vsel %vm3549_vm14, %v3528_v58, %v5876_v12 }
 0x397   : > { %v5884_v32 = vpop.permute.xlu1 %5883  ;;  %v3529_v5 = vsel %vm1902_vm11, %v3497_v54, %v5920_v40  ;;  %v3530_v6 = vsel %vm1902_vm11, %v3498_v51, %v5921_v19 }
 0x398   : > { %v5929_v39 = vpop.permute.xlu0 %5928  ;;  %v5886_v0 = vunpack.i.h.bf16 %v5884_v32  ;;  %v5885_v13 = vunpack.i.l.bf16 %v5884_v32  ;;  %v6000_v32 = vld [vmem:[%s6124_s26 + $0xd8] sm:$0xff] }
 0x399   : > { %4541 = vmatmul.mubr.msk.bf16.gmra.mrb[0].mxu1 %vm1671_vm4, %v3963_v37  ;;  %v5931_v14 = vunpack.i.h.bf16 %v5929_v39  ;;  %v5930_v56 = vunpack.i.l.bf16 %v5929_v39  ;;  %v3967_v42 = vpack.c.bf16 %v6000_v32, %v5999_v44  ;;  %v9151_v44 = vld [vmem:[%s9311_s10] ss:$0 sm:$0xff] }
 0x39a   : > { %4544 = vmatprep.mubr.msk.bf16.mxu1 %vm1671_vm4, %v3964_v50  ;;  %v3593_v17 = vsel %vm3582_vm15, %v3560_v27, %v5885_v13  ;;  %v3594_v22 = vsel %vm3582_vm15, %v3561_v48, %v5886_v0  ;;  %v5470_v0 = vunpack.i.l.bf16 %v9740_v7 }
 0x39b   : > { %v5894_v23 = vpop.permute.xlu1 %5893  ;;  %v3562_v29 = vsel %vm3549_vm14, %v3529_v5, %v5930_v56  ;;  %v3563_v57 = vsel %vm3549_vm14, %v3530_v6, %v5931_v14  ;;  %v9144_v6 = vld [vmem:[%s9309_s8] ss:$0 sm:$0xff] }
 0x39c   : > { %v5939_v9 = vpop.permute.xlu0 %5938  ;;  %v5896_v63 = vunpack.i.h.bf16 %v5894_v23  ;;  %v5895_v55 = vunpack.i.l.bf16 %v5894_v23  ;;  %v6003_v23 = vld [vmem:[%s6124_s26 + $0xf0] sm:$0xff] }
 0x39d   : > { %v5941_v1 = vunpack.i.h.bf16 %v5939_v9  ;;  %v5940_v59 = vunpack.i.l.bf16 %v5939_v9  ;;  %v3969_v60 = vpack.c.bf16 %v6004_v61, %v6003_v23 }
 0x39e   : > { %v3626_v25 = vsel %vm3615_vm0, %v3593_v17, %v5895_v55  ;;  %v3627_v16 = vsel %vm3615_vm0, %v3594_v22, %v5896_v63 }
 0x39f   : > { %v5904_v49 = vpop.permute.xlu1 %5903  ;;  %v3595_v43 = vsel %vm3582_vm15, %v3562_v29, %v5940_v59  ;;  %v3596_v26 = vsel %vm3582_vm15, %v3563_v57, %v5941_v1 }
 0x3a0   : > { %v5906_v62 = vunpack.i.h.bf16 %v5904_v49  ;;  %v5905_v24 = vunpack.i.l.bf16 %v5904_v49  ;;  %v5949_v46 = vpop.permute.xlu0 %5948 }
 0x3a1   : > { %4545 = vmatmul.mubr.msk.bf16.gmra.mrb[4].mxu1 %vm1671_vm4, %v3965_v31  ;;  %v5951_v2 = vunpack.i.h.bf16 %v5949_v46  ;;  %v5950_v53 = vunpack.i.l.bf16 %v5949_v46  ;;  %v9739_v31 = vld [vmem:[#allocation15_spill] sm:$0xff] }
 0x3a2   : > { %v3659_v15 = vsel %vm3648_vm1, %v3626_v25, %v5905_v24  ;;  %v3660_v37 = vsel %vm3648_vm1, %v3627_v16, %v5906_v62  ;;  %4548 = vmatprep.mubr.msk.bf16.mxu1 %vm1671_vm4, %v3966_v33  ;;  %v5466_v21 = vunpack.i.h.bf16 %v9739_v31  ;;  %v5465_v52 = vunpack.i.l.bf16 %v9739_v31 }
 0x3a3   : > { %v3686_v34 = vpack.c.bf16 %v3660_v37, %v3659_v15  ;;  %v5914_v50 = vpop.permute.xlu1 %5913  ;;  %v3628_v47 = vsel %vm3615_vm0, %v3595_v43, %v5950_v53  ;;  %v3629_v45 = vsel %vm3615_vm0, %v3596_v26, %v5951_v2 }
 0x3a4   : > { %v5959_v30 = vpop.permute.xlu0 %5958  ;;  %v5916_v13 = vunpack.i.h.bf16 %v5914_v50  ;;  %v5915_v9 = vunpack.i.l.bf16 %v5914_v50  ;;  %v3436_v63 = vsel %vm1704_vm5, %v8002_v11, %v5466_v21  ;;  %v3435_v55 = vsel %vm1704_vm5, %v7980_v41, %v5465_v52 }
 0x3a5   : > { %v5961_v4 = vunpack.i.h.bf16 %v5959_v30  ;;  %v5960_v39 = vunpack.i.l.bf16 %v5959_v30  ;;  %4499 = vmatmul.mubr.msk.bf16.gmra.mrb[40].mxu0 %vm3740_vm2, %v3686_v34  ;;  %v3467_v40 = vsel %vm1770_vm7, %v3435_v55, %v5470_v0  ;;  %v3468_v27 = vsel %vm1770_vm7, %v3436_v63, %v5471_v18 }
 0x3a6   : > { %v3499_v56 = vsel %vm1836_vm9, %v3467_v40, %v5915_v9  ;;  %v3500_v49 = vsel %vm1836_vm9, %v3468_v27, %v5916_v13 }
 0x3a7   : > { %v3661_v3 = vsel %vm3648_vm1, %v3628_v47, %v5960_v39  ;;  %v3662_v10 = vsel %vm3648_vm1, %v3629_v45, %v5961_v4  ;;  %v5924_v8 = vpop.permute.xlu1 %5923 }
 0x3a8   : > { %v3687_v12 = vpack.c.bf16 %v3662_v10, %v3661_v3  ;;  %v5926_v28 = vunpack.i.h.bf16 %v5924_v8  ;;  %v5925_v58 = vunpack.i.l.bf16 %v5924_v8 }
 0x3a9   : > { %4549 = vmatmul.mubr.msk.bf16.gmra.mrb[8].mxu1 %vm1671_vm4, %v3967_v42 }
 0x3aa   : > { %4502 = vmatprep.mubr.msk.bf16.mxu0 %vm3740_vm2, %v3687_v12  ;;  %4552 = vmatprep.mubr.msk.bf16.mxu1 %vm1671_vm4, %v3968_v20  ;;  %v3531_v11 = vsel %vm1902_vm11, %v3499_v56, %v5925_v58  ;;  %v3532_v62 = vsel %vm1902_vm11, %v3500_v49, %v5926_v28 }
 0x3ab   : > { %v5934_v35 = vpop.permute.xlu1 %5933 }
 0x3ac   : > { %v5936_v54 = vunpack.i.h.bf16 %v5934_v35  ;;  %v5935_v51 = vunpack.i.l.bf16 %v5934_v35 }
 0x3ae   : > { %v3564_v41 = vsel %vm3549_vm14, %v3531_v11, %v5935_v51  ;;  %v3565_v24 = vsel %vm3549_vm14, %v3532_v62, %v5936_v54  ;;  %v9206_v11 = vadd.f32 %v9151_v44, %v9144_v6 }
 0x3af   : > { %v5944_v33 = vpop.permute.xlu1 %5943 }
 0x3b0   : > { %v5946_v48 = vunpack.i.h.bf16 %v5944_v33  ;;  %v5945_v14 = vunpack.i.l.bf16 %v5944_v33 }
 0x3b1   : > { %4553 = vmatmul.mubr.msk.bf16.gmra.mrb[12].mxu1 %vm1671_vm4, %v3969_v60 }
 0x3b2   : > { %v3597_v25 = vsel %vm3582_vm15, %v3564_v41, %v5945_v14  ;;  %v3598_v16 = vsel %vm3582_vm15, %v3565_v24, %v5946_v48 }
 0x3b3   : > { %v5954_v19 = vpop.permute.xlu1 %5953 }
 0x3b4   : > { %v5956_v17 = vunpack.i.h.bf16 %v5954_v19  ;;  %v5955_v22 = vunpack.i.l.bf16 %v5954_v19 }
 0x3b6   : > { %v3630_v15 = vsel %vm3615_vm0, %v3597_v25, %v5955_v22  ;;  %v3631_v37 = vsel %vm3615_vm0, %v3598_v16, %v5956_v17 }
 0x3b7   : > { %v5964_v46 = vpop.permute.xlu1 %5963 }
 0x3b8   : > { %v5966_v1 = vunpack.i.h.bf16 %v5964_v46  ;;  %v5965_v59 = vunpack.i.l.bf16 %v5964_v46 }
 0x3ba   : > { %v3663_v2 = vsel %vm3648_vm1, %v3630_v15, %v5965_v59  ;;  %v3664_v53 = vsel %vm3648_vm1, %v3631_v37, %v5966_v1 }
 0x3bb   : > { %v3688_v5 = vpack.c.bf16 %v3664_v53, %v3663_v2 }
 0x3bd   : > { %4503 = vmatmul.mubr.msk.bf16.gmra.mrb[44].mxu0 %vm3740_vm2, %v3688_v5 }
 0x449   : > { %v4492_v34 = vpop.f32.mrb[32].mxu0 }
 0x44a   : > { %v3836_v50 = vadd.f32 %v4492_v34, %v9144_v6  ;;  %v3827_v29 = vpop.f32.mrb[33].mxu0 }
 0x44b   : > { %v3828_v57 = vadd.f32 %v9144_v6, %v3827_v29  ;;  %v4493_v30 = vpop.f32.mrb[34].mxu0 }
 0x44c   : > { %v3839_v32 = vadd.f32 %v4493_v30, %v9144_v6  ;;  %v3830_v42 = vpop.f32.mrb[35].mxu0  ;;  %v4526_v43 = vpop.f32.mrb[16].mxu1 }
 0x44d   : > { %v3831_v26 = vadd.f32 %v9144_v6, %v3830_v42  ;;  %v4567_v4 = vadd.f32 %v4526_v43, %v3836_v50  ;;  %v4063_v39 = vpop.f32.mrb[17].mxu1 }
 0x44e   : > { %v4570_v47 = vadd.f32 %v4063_v39, %v3828_v57  ;;  %v4527_v45 = vpop.f32.mrb[18].mxu1  ;;  %v4573_v36 = vadd.f32 %v9151_v44, %v3839_v32 }
 0x44f   : > { %v4568_v38 = vadd.f32 %v4567_v4, %v9151_v44  ;;  %v4066_v20 = vpop.f32.mrb[19].mxu1  ;;  %v4576_v3 = vadd.f32 %v9151_v44, %v3831_v26 }
 0x450   : > { %v4571_v10 = vadd.f32 %v4570_v47, %v9151_v44  ;;  %v4574_v8 = vadd.f32 %v4573_v36, %v4527_v45 }
 0x451   : > { %4224 = vst.msk [vmem:[%s9160_s27 + $0x10] sm:$0xff] %vm1704_vm5, %v4568_v38  ;;  %v4577_v12 = vadd.f32 %v4576_v3, %v4066_v20 }
 0x452   : > { %4222 = vst.msk [vmem:[%s9160_s27] sm:$0xff] %vm1704_vm5, %v4571_v10  ;;  %4225 = vst.msk [vmem:[%s9160_s27 + $0x18] sm:$0xff] %vm1704_vm5, %v4574_v8 }
 0x453   : > { %4223 = vst.msk [vmem:[%s9160_s27 + $0x8] sm:$0xff] %vm1704_vm5, %v4577_v12 }
 0x454   : > { %v4530_v35 = vpop.f32.mrb[20].mxu1 }
 0x455   : > { %v4079_v23 = vpop.f32.mrb[21].mxu1 }
 0x456   : > { %v4531_v61 = vpop.f32.mrb[22].mxu1 }
 0x457   : > { %v4082_v60 = vpop.f32.mrb[23].mxu1 }
 0x45c   : > { %v9174_v31 = vpop.f32.mrb[24].mxu1 }
 0x45d   : > { %v9176_v21 = vpop.f32.mrb[25].mxu1 }
 0x45e   : > { %v9178_v52 = vpop.f32.mrb[26].mxu1 }
 0x45f   : > { %v9180_v33 = vpop.f32.mrb[27].mxu1 }
 0x460   : > { %v4496_v7 = vpop.f32.mrb[36].mxu0 }
 0x461   : > { %v3852_v18 = vadd.f32 %v4496_v7, %v9144_v6  ;;  %v3843_v0 = vpop.f32.mrb[37].mxu0 }
 0x462   : > { %v3844_v13 = vadd.f32 %v9144_v6, %v3843_v0  ;;  %v4497_v9 = vpop.f32.mrb[38].mxu0 }
 0x463   : > { %v4579_v28 = vadd.f32 %v9151_v44, %v3852_v18  ;;  %v3855_v58 = vadd.f32 %v4497_v9, %v9144_v6  ;;  %v3846_v63 = vpop.f32.mrb[39].mxu0 }
 0x464   : > { %v4582_v55 = vadd.f32 %v9151_v44, %v3844_v13  ;;  %v3847_v54 = vadd.f32 %v9144_v6, %v3846_v63  ;;  %v9188_v51 = vpop.f32.mrb[28].mxu1 }
 0x465   : > { %v4580_v19 = vadd.f32 %v4579_v28, %v4530_v35  ;;  %v4585_v40 = vadd.f32 %v9151_v44, %v3855_v58  ;;  %v9191_v27 = vpop.f32.mrb[29].mxu1 }
 0x466   : > { %v4583_v48 = vadd.f32 %v4582_v55, %v4079_v23  ;;  %v4588_v14 = vadd.f32 %v9151_v44, %v3847_v54  ;;  %v9194_v56 = vpop.f32.mrb[30].mxu1 }
 0x467   : > { %4228 = vst.msk [vmem:[%s9160_s27 + $0x30] sm:$0xff] %vm1704_vm5, %v4580_v19  ;;  %v4586_v49 = vadd.f32 %v4585_v40, %v4531_v61  ;;  %v9198_v17 = vpop.f32.mrb[31].mxu1 }
 0x468   : > { %4226 = vst.msk [vmem:[%s9160_s27 + $0x20] sm:$0xff] %vm1704_vm5, %v4583_v48  ;;  %v4589_v22 = vadd.f32 %v4588_v14, %v4082_v60 }
 0x469   : > { %4229 = vst.msk [vmem:[%s9160_s27 + $0x38] sm:$0xff] %vm1704_vm5, %v4586_v49 }
 0x46a   : > { %4227 = vst.msk [vmem:[%s9160_s27 + $0x28] sm:$0xff] %vm1704_vm5, %v4589_v22 }
 0x46c   : > { %v4542_v62 = vpop.f32.mrb[0].mxu1 }
 0x46d   : > { %v4615_v41 = vadd.f32 %v9206_v11, %v4542_v62  ;;  %v4127_v24 = vpop.f32.mrb[1].mxu1 }
 0x46e   : > { %v4617_v46 = vadd.f32 %v9206_v11, %v4127_v24  ;;  %v4543_v25 = vpop.f32.mrb[2].mxu1 }
 0x46f   : > { %4240 = vst.msk [vmem:[%s9160_s27 + $0x90] sm:$0xff] %vm1704_vm5, %v4615_v41  ;;  %v4619_v16 = vadd.f32 %v9206_v11, %v4543_v25  ;;  %v4130_v1 = vpop.f32.mrb[3].mxu1 }
 0x470   : > { %4238 = vst.msk [vmem:[%s9160_s27 + $0x80] sm:$0xff] %vm1704_vm5, %v4617_v46  ;;  %v4621_v59 = vadd.f32 %v9206_v11, %v4130_v1 }
 0x471   : > { %4241 = vst.msk [vmem:[%s9160_s27 + $0x98] sm:$0xff] %vm1704_vm5, %v4619_v16 }
 0x472   : > { %4239 = vst.msk [vmem:[%s9160_s27 + $0x88] sm:$0xff] %vm1704_vm5, %v4621_v59 }
 0x474   : > { %v4546_v15 = vpop.f32.mrb[4].mxu1 }
 0x475   : > { %v4623_v37 = vadd.f32 %v9206_v11, %v4546_v15  ;;  %v4143_v2 = vpop.f32.mrb[5].mxu1 }
 0x476   : > { %v4625_v53 = vadd.f32 %v9206_v11, %v4143_v2  ;;  %v4547_v5 = vpop.f32.mrb[6].mxu1 }
 0x477   : > { %4244 = vst.msk [vmem:[%s9160_s27 + $0xb0] sm:$0xff] %vm1704_vm5, %v4623_v37  ;;  %v4627_v34 = vadd.f32 %v9206_v11, %v4547_v5  ;;  %v4146_v50 = vpop.f32.mrb[7].mxu1 }
 0x478   : > { %4242 = vst.msk [vmem:[%s9160_s27 + $0xa0] sm:$0xff] %vm1704_vm5, %v4625_v53  ;;  %v4629_v29 = vadd.f32 %v9206_v11, %v4146_v50  ;;  %v4500_v57 = vpop.f32.mrb[40].mxu0 }
 0x479   : > { %4245 = vst.msk [vmem:[%s9160_s27 + $0xb8] sm:$0xff] %vm1704_vm5, %v4627_v34  ;;  %v3868_v30 = vadd.f32 %v4500_v57, %v9144_v6  ;;  %v3859_v32 = vpop.f32.mrb[41].mxu0 }
 0x47a   : > { %4243 = vst.msk [vmem:[%s9160_s27 + $0xa8] sm:$0xff] %vm1704_vm5, %v4629_v29  ;;  %v3860_v42 = vadd.f32 %v9144_v6, %v3859_v32  ;;  %v4501_v43 = vpop.f32.mrb[42].mxu0 }
 0x47b   : > { %v4591_v26 = vadd.f32 %v9151_v44, %v3868_v30  ;;  %v3871_v4 = vadd.f32 %v4501_v43, %v9144_v6  ;;  %v3862_v39 = vpop.f32.mrb[43].mxu0 }
 0x47c   : > { %v4594_v47 = vadd.f32 %v9151_v44, %v3860_v42  ;;  %v3863_v45 = vadd.f32 %v9144_v6, %v3862_v39  ;;  %v4550_v36 = vpop.f32.mrb[8].mxu1 }
 0x47d   : > { %v4592_v38 = vadd.f32 %v4591_v26, %v9174_v31  ;;  %v4597_v20 = vadd.f32 %v9151_v44, %v3871_v4  ;;  %v4631_v3 = vadd.f32 %v9206_v11, %v4550_v36  ;;  %v4159_v10 = vpop.f32.mrb[9].mxu1 }
 0x47e   : > { %v4595_v8 = vadd.f32 %v4594_v47, %v9176_v21  ;;  %v4600_v12 = vadd.f32 %v9151_v44, %v3863_v45  ;;  %v4633_v35 = vadd.f32 %v9206_v11, %v4159_v10  ;;  %v4551_v23 = vpop.f32.mrb[10].mxu1 }
 0x47f   : > { %4232 = vst.msk [vmem:[%s9160_s27 + $0x50] sm:$0xff] %vm1704_vm5, %v4592_v38  ;;  %v4598_v61 = vadd.f32 %v4597_v20, %v9178_v52  ;;  %4248 = vst.msk [vmem:[%s9160_s27 + $0xd0] sm:$0xff] %vm1704_vm5, %v4631_v3  ;;  %v4635_v60 = vadd.f32 %v9206_v11, %v4551_v23  ;;  %v4162_v31 = vpop.f32.mrb[11].mxu1 }
 0x480   : > { %4230 = vst.msk [vmem:[%s9160_s27 + $0x40] sm:$0xff] %vm1704_vm5, %v4595_v8  ;;  %v4601_v21 = vadd.f32 %v4600_v12, %v9180_v33  ;;  %4246 = vst.msk [vmem:[%s9160_s27 + $0xc0] sm:$0xff] %vm1704_vm5, %v4633_v35  ;;  %v4637_v7 = vadd.f32 %v9206_v11, %v4162_v31 }
 0x481   : > { %4233 = vst.msk [vmem:[%s9160_s27 + $0x58] sm:$0xff] %vm1704_vm5, %v4598_v61  ;;  %4249 = vst.msk [vmem:[%s9160_s27 + $0xd8] sm:$0xff] %vm1704_vm5, %v4635_v60 }
 0x482   : > { %4231 = vst.msk [vmem:[%s9160_s27 + $0x48] sm:$0xff] %vm1704_vm5, %v4601_v21  ;;  %4247 = vst.msk [vmem:[%s9160_s27 + $0xc8] sm:$0xff] %vm1704_vm5, %v4637_v7 }
 0x484   : > { %v4554_v52 = vpop.f32.mrb[12].mxu1 }
 0x485   : > { %v4639_v18 = vadd.f32 %v9206_v11, %v4554_v52  ;;  %v4175_v0 = vpop.f32.mrb[13].mxu1 }
 0x486   : > { %v4641_v33 = vadd.f32 %v9206_v11, %v4175_v0  ;;  %v4555_v13 = vpop.f32.mrb[14].mxu1 }
 0x487   : > { %4252 = vst.msk [vmem:[%s9160_s27 + $0xf0] sm:$0xff] %vm1704_vm5, %v4639_v18  ;;  %v4643_v9 = vadd.f32 %v9206_v11, %v4555_v13  ;;  %v4178_v28 = vpop.f32.mrb[15].mxu1 }
 0x488   : > { %4250 = vst.msk [vmem:[%s9160_s27 + $0xe0] sm:$0xff] %vm1704_vm5, %v4641_v33  ;;  %v4645_v58 = vadd.f32 %v9206_v11, %v4178_v28 }
 0x489   : > { %4253 = vst.msk [vmem:[%s9160_s27 + $0xf8] sm:$0xff] %vm1704_vm5, %v4643_v9 }
 0x48a   : > { %4251 = vst.msk [vmem:[%s9160_s27 + $0xe8] sm:$0xff] %vm1704_vm5, %v4645_v58 }
 0x490   : > { %v4504_v63 = vpop.f32.mrb[44].mxu0 }
 0x491   : > { %v3884_v55 = vadd.f32 %v4504_v63, %v9144_v6  ;;  %v3875_v54 = vpop.f32.mrb[45].mxu0 }
 0x492   : > { %v3876_v19 = vadd.f32 %v9144_v6, %v3875_v54  ;;  %v4505_v40 = vpop.f32.mrb[46].mxu0 }
 0x493   : > { %v4603_v48 = vadd.f32 %v9151_v44, %v3884_v55  ;;  %v3887_v14 = vadd.f32 %v4505_v40, %v9144_v6  ;;  %v3878_v49 = vpop.f32.mrb[47].mxu0 }
 0x494   : > { %v4606_v22 = vadd.f32 %v9151_v44, %v3876_v19  ;;  %v3879_v11 = vadd.f32 %v9144_v6, %v3878_v49 }
 0x495   : > { %v4604_v62 = vadd.f32 %v4603_v48, %v9188_v51  ;;  %v4609_v41 = vadd.f32 %v9151_v44, %v3887_v14 }
 0x496   : > { %v4607_v24 = vadd.f32 %v4606_v22, %v9191_v27  ;;  %v4612_v46 = vadd.f32 %v9151_v44, %v3879_v11 }
 0x497   : > { %4236 = vst.msk [vmem:[%s9160_s27 + $0x70] sm:$0xff] %vm1704_vm5, %v4604_v62  ;;  %v4610_v25 = vadd.f32 %v4609_v41, %v9194_v56 }
 0x498   : > { %4234 = vst.msk [vmem:[%s9160_s27 + $0x60] sm:$0xff] %vm1704_vm5, %v4607_v24  ;;  %v4613_v16 = vadd.f32 %v4612_v46, %v9198_v17 }
 0x499   : > { %4237 = vst.msk [vmem:[%s9160_s27 + $0x78] sm:$0xff] %vm1704_vm5, %v4610_v25 }
 0x49a   : > { %4235 = vst.msk [vmem:[%s9160_s27 + $0x68] sm:$0xff] %vm1704_vm5, %v4613_v16 }
 0x49b PF: > { %s21_s17 = sadd.s32 1, %s6011_s17  }
 0x49c   : > { %p18_p4 = scmp.ge.s32.totalorder %s21_s17, 4  }
 0x49e   :  { %20 = sbr.rel (!%p18_p4) target bundleno = 1 (0x1), region = 94 }

</bundles_post_ra>
